<compile_context>
chip_gen: v6e
topology: v6e:2x2x1
jax: 0.10.0
libtpu: 0.0.40
codegen_flags: <defaults>
</compile_context>

<pallas_src>
import jax
import jax.numpy as jnp
from jax.experimental import pallas as pl
from jax.experimental.pallas import tpu as pltpu

EPS = 1e-5  # nn.BatchNorm2d default eps


def _round_up(x, m):
    return (x + m - 1) // m * m


# ----------------------------------------------------------------------------
# Kernel 1: batched matmul (single K tile) with fused per-tile BN statistics.
#   x: (B, M, K) bf16, w: (B, K, N) bf16
#   out: (B, M, N) bf16, stats: (B, n_m_tiles, 2, N) f32  ([sum, sum_sq])
# ----------------------------------------------------------------------------
def _mm_stats_kernel(x_ref, w_ref, o_ref, st_ref):
    acc = jnp.dot(x_ref[...], w_ref[...], preferred_element_type=jnp.float32)
    o_ref[...] = acc.astype(o_ref.dtype)                    # bf16 writeback
    st_ref[0:1, :] = jnp.sum(acc, axis=0, keepdims=True)    # stats from f32
    st_ref[1:2, :] = jnp.sum(acc * acc, axis=0, keepdims=True)


def _pick_tm(m, k_cols, n_cols, tm_max=512, budget=12 << 20):
    # Double-buffered bf16 LHS + bf16 out per row; double-buffered bf16 weight
    # block is a fixed cost.  vmem_limit_bytes=32MiB leaves ample headroom.
    fixed = 2 * k_cols * n_cols * 2
    per_row = 2 * k_cols * 2 + 2 * n_cols * 2
    avail = max(budget - fixed, 2 << 20)
    tm = max(16, min(tm_max, avail // max(per_row, 1)) // 16 * 16)
    return min(tm, _round_up(m, 16))


def matmul_bn_stats(x, w, *, tm_max=512):
    B, M, K = x.shape
    Nc = w.shape[-1]
    TM = _pick_tm(M, K, Nc, tm_max=tm_max)
    Mp = _round_up(M, TM)
    if Mp != M:  # zero rows -> zero outputs -> stats unaffected
        x = jnp.pad(x, ((0, 0), (0, Mp - M), (0, 0)))
    n_m = Mp // TM

    out, stats = pl.pallas_call(
        _mm_stats_kernel,
        out_shape=(
            jax.ShapeDtypeStruct((B, Mp, Nc), jnp.bfloat16),
            jax.ShapeDtypeStruct((B, n_m, 2, Nc), jnp.float32),
        ),
        grid=(B, n_m),
        in_specs=[
            pl.BlockSpec((None, TM, K), lambda b, i: (b, i, 0)),
            pl.BlockSpec((None, K, Nc), lambda b, i: (b, 0, 0)),
        ],
        out_specs=(
            pl.BlockSpec((None, TM, Nc), lambda b, i: (b, i, 0)),
            pl.BlockSpec((None, None, 2, Nc), lambda b, i: (b, i, 0, 0)),
        ),
        compiler_params=pltpu.CompilerParams(
            dimension_semantics=("parallel", "parallel"),
            vmem_limit_bytes=32 << 20),
    )(x, w)
    return out, stats


# ----------------------------------------------------------------------------
# Kernel 2: tiled BatchNorm apply (+ReLU).   Kernel 3: same, fused with the
# final 1x1 conv (block-diagonal weight) + Tanh epilogue.
# ----------------------------------------------------------------------------
def _bn_relu_kernel(x_ref, sc_ref, sh_ref, o_ref):
    y = x_ref[...] * sc_ref[...] + sh_ref[...]
    o_ref[...] = jnp.maximum(y, 0.0).astype(o_ref.dtype)


def _bn_relu_conv_tanh_kernel(x_ref, sc_ref, sh_ref, w_ref, o_ref):
    y = jnp.maximum(x_ref[...] * sc_ref[...] + sh_ref[...], 0.0)
    z = jnp.dot(y.astype(jnp.bfloat16), w_ref[...],
                preferred_element_type=jnp.float32)
    o_ref[...] = jnp.tanh(z)


def _row_tile(r, in_cols, out_cols, in_bytes, out_bytes, fixed_bytes=0,
              tr_max=1024, budget=8 << 20):
    # Double-buffered input + double-buffered output per row; fixed_bytes
    # covers any resident weight block (fused kernel).
    per_row = 2 * in_cols * in_bytes + 2 * out_cols * out_bytes
    avail = max(budget - fixed_bytes, 2 << 20)
    cap = max(8, (avail // max(per_row, 1)) // 8 * 8)
    return min(tr_max, cap, _round_up(r, 8))


def bn_relu_apply(x2d, scale_cols, shift_cols, *, out_dtype=jnp.bfloat16):
    R, C = x2d.shape
    TR = _row_tile(R, C, C, 2, 2)
    Rp = _round_up(R, TR)
    if Rp != R:
        x2d = jnp.pad(x2d, ((0, Rp - R), (0, 0)))
    sc = scale_cols.reshape(1, C).astype(jnp.float32)
    sh = shift_cols.reshape(1, C).astype(jnp.float32)
    y = pl.pallas_call(
        _bn_relu_kernel,
        out_shape=jax.ShapeDtypeStruct((Rp, C), out_dtype),
        grid=(Rp // TR,),
        in_specs=[
            pl.BlockSpec((TR, C), lambda i: (i, 0)),
            pl.BlockSpec((1, C), lambda i: (0, 0)),
            pl.BlockSpec((1, C), lambda i: (0, 0)),
        ],
        out_specs=pl.BlockSpec((TR, C), lambda i: (i, 0)),
        compiler_params=pltpu.CompilerParams(
            dimension_semantics=("parallel",), vmem_limit_bytes=32 << 20),
    )(x2d, sc, sh)
    return y[:R]


def bn_relu_conv_tanh(x2d, scale_cols, shift_cols, w_kron):
    R, C = x2d.shape
    Ow = w_kron.shape[1]
    TR = _row_tile(R, C, Ow, 2, 4, fixed_bytes=2 * C * Ow * 2)
    Rp = _round_up(R, TR)
    if Rp != R:
        x2d = jnp.pad(x2d, ((0, Rp - R), (0, 0)))
    sc = scale_cols.reshape(1, C).astype(jnp.float32)
    sh = shift_cols.reshape(1, C).astype(jnp.float32)
    y = pl.pallas_call(
        _bn_relu_conv_tanh_kernel,
        out_shape=jax.ShapeDtypeStruct((Rp, Ow), jnp.float32),
        grid=(Rp // TR,),
        in_specs=[
            pl.BlockSpec((TR, C), lambda i: (i, 0)),
            pl.BlockSpec((1, C), lambda i: (0, 0)),
            pl.BlockSpec((1, C), lambda i: (0, 0)),
            pl.BlockSpec((C, Ow), lambda i: (0, 0)),
        ],
        out_specs=pl.BlockSpec((TR, Ow), lambda i: (i, 0)),
        compiler_params=pltpu.CompilerParams(
            dimension_semantics=("parallel",), vmem_limit_bytes=32 << 20),
    )(x2d, sc, sh, w_kron)
    return y[:R]


# ----------------------------------------------------------------------------
# ConvTranspose2d(k=4, s=2, p=1) via sub-pixel phase decomposition, with the
# two W (px) phases merged into the matmul column dimension:
#   out[2q+py] uses H-taps _TAPS[py]; for each H-tap, the slab carries the
#   dx in {-1,0,+1} W-shifts (6*Cin columns total), and the (6*Cin, 2*Cout)
#   weight routes each (tap, dx) row block to the px column block that uses it
#   (structured zeros elsewhere).
# ----------------------------------------------------------------------------
_TAPS = {0: ((1, 0), (3, -1)), 1: ((0, 1), (2, 0))}   # py -> ((ky, dy), ...)
_WTAPS = {0: {0: 1, -1: 3}, 1: {1: 0, 0: 2}}          # px -> {dx: kx}


def _shift2d(x, dy, dx):
    N, H, W, C = x.shape
    xp = jnp.pad(x, ((0, 0), (1, 1), (1, 1), (0, 0)))
    return xp[:, 1 + dy:1 + dy + H, 1 + dx:1 + dx + W, :]


def _phase_slab(x, w_t):
    # x: (N, H, W, Cin) bf16; w_t: (Cin, Cout, 4, 4) f32
    N, H, W, Cin = x.shape
    Cout = w_t.shape[1]
    zeros = jnp.zeros((Cin, Cout), w_t.dtype)
    xs, ws = [], []
    for py in (0, 1):
        cols, wrows = [], []
        for ky, dy in _TAPS[py]:
            for dx in (-1, 0, 1):
                cols.append(_shift2d(x, dy, dx))
                wrows.append(jnp.concatenate(
                    [w_t[:, :, ky, _WTAPS[px][dx]] if dx in _WTAPS[px] else zeros
                     for px in (0, 1)], axis=1))
        xs.append(jnp.concatenate(cols, axis=-1).reshape(N * H * W, 6 * Cin))
        ws.append(jnp.concatenate(wrows, axis=0))
    return (jnp.stack(xs).astype(jnp.bfloat16),        # (2, M, 6*Cin)
            jnp.stack(ws).astype(jnp.bfloat16))        # (2, 6*Cin, 2*Cout)


def _bn_scale_shift(stat_sum, stat_sq, count, gamma, beta):
    mean = stat_sum / count
    var = jnp.maximum(stat_sq / count - mean * mean, 0.0)
    scale = gamma * jax.lax.rsqrt(var + EPS)
    shift = beta - mean * scale
    return scale, shift


def tconv_s2_bn_block(x, w_t, gamma, beta, final_w5=None):
    N, H, W, Cin = x.shape
    Cout = w_t.shape[1]
    Ho, Wo = 2 * H, 2 * W
    M = N * H * W

    xs, ws = _phase_slab(x, w_t)
    y, st = matmul_bn_stats(xs, ws)                 # y: (2, Mp, 2*Cout) bf16
    Mp = y.shape[1]

    # Per-channel batch stats: sum over phases / tiles, fold the px column halves.
    s = st.sum(axis=(0, 1)).reshape(2, 2, Cout).sum(axis=1)
    scale, shift = _bn_scale_shift(s[0], s[1], 4 * M, gamma, beta)

    if final_w5 is None:
        # BN + ReLU per phase on the bf16 matmul output (lane width 2*Cout),
        # THEN interleave phases at bf16.
        a = bn_relu_apply(y.reshape(2 * Mp, 2 * Cout),
                          jnp.tile(scale, 2), jnp.tile(shift, 2))
        a = a.reshape(2, Mp, 2 * Cout)[:, :M]
        a = a.reshape(2, N, H, W, 2, Cout).transpose(1, 2, 0, 3, 4, 5)
        return a.reshape(N, Ho, Wo, Cout)           # bf16, NHWC

    # Final layer: interleave the bf16 pre-BN output first, then run the fused
    # BN + ReLU + 1x1 conv + Tanh kernel on a lane-dense (N*Ho, Wo*Cout) slab.
    # The per-pixel 1x1 conv becomes a block-diagonal matmul with kron(I_Wo, w5).
    yb = y[:, :M].reshape(2, N, H, W, 2, Cout).transpose(1, 2, 0, 3, 4, 5)
    y2d = yb.reshape(N * Ho, Wo * Cout)
    w5 = final_w5.reshape(final_w5.shape[0], final_w5.shape[1]).astype(jnp.float32)
    out_ch = w5.shape[1]
    wk = jnp.kron(jnp.eye(Wo, dtype=jnp.float32), w5).astype(jnp.bfloat16)
    o = bn_relu_conv_tanh(y2d, jnp.tile(scale, Wo), jnp.tile(shift, Wo), wk)
    return o.reshape(N, Ho, Wo, out_ch)              # f32, NHWC


# ----------------------------------------------------------------------------
# Generator forward:  z (N, inp, 1, 1) -> (N, out_ch, 32, 32)
# ----------------------------------------------------------------------------
def generator_forward(z_nchw, params):
    N = z_nchw.shape[0]
    inp = z_nchw.shape[1]
    z = z_nchw.reshape(N, inp).astype(jnp.float32)

    # Layer 1: ConvTranspose2d(inp -> ngf*8, k=4, s=1, p=0) on a 1x1 input plus
    # BN + ReLU, in plain JAX (per perf review: far below MXU fill, dominated
    # by launch/padding overhead as a Pallas kernel; XLA fuses it cheaply).
    w1 = params["w1"]
    c1 = w1.shape[1]
    y1 = (z @ w1.reshape(inp, c1 * 16)).reshape(N, c1, 4, 4)   # cols (co,ky,kx)
    mean = y1.mean(axis=(0, 2, 3))
    var = jnp.square(y1 - mean[None, :, None, None]).mean(axis=(0, 2, 3))
    scale = params["g1"] * jax.lax.rsqrt(var + EPS)
    shift = params["b1"] - mean * scale
    a1 = jnp.maximum(y1 * scale[None, :, None, None]
                     + shift[None, :, None, None], 0.0)
    x = a1.transpose(0, 2, 3, 1).astype(jnp.bfloat16)          # NHWC bf16

    # Layers 2-4: ConvTranspose2d(k=4, s=2, p=1) + BN + ReLU; layer 4 also
    # fuses the final 1x1 conv + Tanh into its BN epilogue.
    x = tconv_s2_bn_block(x, params["w2"], params["g2"], params["b2"])
    x = tconv_s2_bn_block(x, params["w3"], params["g3"], params["b3"])
    out_nhwc = tconv_s2_bn_block(x, params["w4"], params["g4"], params["b4"],
                                 final_w5=params["w5"])
    return out_nhwc.transpose(0, 3, 1, 2)                      # NCHW


# ----------------------------------------------------------------------------
# Pure-JAX f32 reference (for numerical cross-check)
# ----------------------------------------------------------------------------
def _ref_conv_transpose(x, w, stride, padding):
    N, H, W, Cin = x.shape
    Cout, K = w.shape[1], w.shape[2]
    Hc = (H - 1) * stride + K
    Wc = (W - 1) * stride + K
    contrib = jnp.einsum('nhwc,cokl->nhwklo', x, w)
    full = jnp.zeros((N, Hc, Wc, Cout), jnp.float32)
    for ky in range(K):
        for kx in range(K):
            full = full.at[:, ky:ky + (H - 1) * stride + 1:stride,
                           kx:kx + (W - 1) * stride + 1:stride, :].add(
                               contrib[:, :, :, ky, kx, :])
    return full[:, padding:Hc - padding, padding:Wc - padding, :]


def _ref_bn_relu(x, gamma, beta):
    mean = x.mean(axis=(0, 1, 2))
    var = jnp.square(x - mean).mean(axis=(0, 1, 2))
    y = (x - mean) * jax.lax.rsqrt(var + EPS) * gamma + beta
    return jnp.maximum(y, 0.0)


def ref_generator(z_nchw, params):
    x = jnp.transpose(z_nchw, (0, 2, 3, 1)).astype(jnp.float32)
    x = _ref_bn_relu(_ref_conv_transpose(x, params["w1"], 1, 0), params["g1"], params["b1"])
    x = _ref_bn_relu(_ref_conv_transpose(x, params["w2"], 2, 1), params["g2"], params["b2"])
    x = _ref_bn_relu(_ref_conv_transpose(x, params["w3"], 2, 1), params["g3"], params["b3"])
    x = _ref_bn_relu(_ref_conv_transpose(x, params["w4"], 2, 1), params["g4"], params["b4"])
    y = jnp.tanh(jnp.einsum('nhwc,co->nhwo', x, params["w5"][:, :, 0, 0]))
    return jnp.transpose(y, (0, 3, 1, 2))


# ----------------------------------------------------------------------------
# Deterministic parameter init
# ----------------------------------------------------------------------------
def init_params(key, inp, ngf, out_ch):
    ks = jax.random.split(key, 9)

    def w(k, shape, sd=0.05):
        return sd * jax.random.normal(k, shape, jnp.float32)

    def bn(k, c):
        g = 1.0 + 0.05 * jax.random.normal(k, (c,), jnp.float32)
        b = 0.05 * jax.random.normal(jax.random.fold_in(k, 1), (c,), jnp.float32)
        return g, b

    g1, b1 = bn(ks[5], ngf * 8)
    g2, b2 = bn(ks[6], ngf * 4)
    g3, b3 = bn(ks[7], ngf * 2)
    g4, b4 = bn(ks[8], ngf)
    return {
        "w1": w(ks[0], (inp, ngf * 8, 4, 4)),
        "w2": w(ks[1], (ngf * 8, ngf * 4, 4, 4)),
        "w3": w(ks[2], (ngf * 4, ngf * 2, 4, 4)),
        "w4": w(ks[3], (ngf * 2, ngf, 4, 4)),
        "w5": w(ks[4], (ngf, out_ch, 1, 1), 0.4),
        "g1": g1, "b1": b1, "g2": g2, "b2": b2,
        "g3": g3, "b3": b3, "g4": g4, "b4": b4,
    }


if __name__ == "__main__":
    # Small config: Generator(out=3, inp=16, batch_size=8) -- the module's
    # "batch_size" arg is really the feature-map multiplier ngf.
    N, INP, NGF, OUT_CH = 2, 16, 8, 3

    key = jax.random.PRNGKey(0)
    kp, kz = jax.random.split(key)
    params = init_params(kp, INP, NGF, OUT_CH)
    z = jax.random.normal(kz, (N, INP, 1, 1), jnp.float32)

    out = jax.block_until_ready(jax.jit(generator_forward)(z, params))

    assert out.shape == (N, OUT_CH, 32, 32), out.shape
    assert bool(jnp.all(jnp.isfinite(out)))
    assert bool(jnp.all(jnp.abs(out) <= 1.0 + 1e-6))  # tanh range

    # Cross-check against the pure-JAX f32 reference (only bf16 MXU noise).
    ref = jax.block_until_ready(jax.jit(ref_generator)(z, params))
    err = float(jnp.max(jnp.abs(out - ref)))
    assert err < 0.15, f"mismatch vs reference: {err}"

    print("KERNEL_OK")
</pallas_src>

<mosaic_0001>
module attributes {stable_mosaic.version = 11 : i64} {
  func.func @_mm_stats_kernel(%arg0: i32, %arg1: i32, %arg2: memref<1x32x384xbf16, #tpu.memory_space<vmem>>, %arg3: memref<1x384x64xbf16, #tpu.memory_space<vmem>>, %arg4: memref<1x32x64xbf16, #tpu.memory_space<vmem>>, %arg5: memref<1x1x2x64xf32, #tpu.memory_space<vmem>>) attributes {dimension_semantics = [#tpu.dimension_semantics<parallel>, #tpu.dimension_semantics<parallel>], iteration_bounds = array<i64: 2, 1>, scalar_prefetch = 0 : i64, scratch_operands = 0 : i64, tpu.core_type = #tpu.core_type<tc>, window_params = [{transform_indices = @transform_0, window_bounds = array<i64: 1, 32, 384>}, {transform_indices = @transform_1, window_bounds = array<i64: 1, 384, 64>}, {transform_indices = @transform_2, window_bounds = array<i64: 1, 32, 64>}, {transform_indices = @transform_3, window_bounds = array<i64: 1, 1, 2, 64>}]} {
    %c0 = arith.constant 0 : index
    %c0_0 = arith.constant 0 : index
    %c0_1 = arith.constant 0 : index
    %0 = vector.load %arg2[%c0, %c0_0, %c0_1] : memref<1x32x384xbf16, #tpu.memory_space<vmem>>, vector<1x32x384xbf16>
    %1 = vector.shape_cast %0 : vector<1x32x384xbf16> to vector<32x384xbf16>
    %c0_2 = arith.constant 0 : index
    %c0_3 = arith.constant 0 : index
    %c0_4 = arith.constant 0 : index
    %2 = vector.load %arg3[%c0_2, %c0_3, %c0_4] : memref<1x384x64xbf16, #tpu.memory_space<vmem>>, vector<1x384x64xbf16>
    %3 = vector.shape_cast %2 : vector<1x384x64xbf16> to vector<384x64xbf16>
    %cst = arith.constant dense<0.000000e+00> : vector<32x64xf32>
    %4 = tpu.matmul %1, %3, %cst {dimension_numbers = #tpu.dot_dimension_numbers<[1], [0], [0], [1], [0, 0, 1, 1], [], []>} : vector<32x384xbf16>, vector<384x64xbf16>, vector<32x64xf32> -> vector<32x64xf32>
    %5 = arith.truncf %4 : vector<32x64xf32> to vector<32x64xbf16>
    %c0_5 = arith.constant 0 : index
    %c0_6 = arith.constant 0 : index
    %c0_7 = arith.constant 0 : index
    %6 = vector.load %arg4[%c0_5, %c0_6, %c0_7] : memref<1x32x64xbf16, #tpu.memory_space<vmem>>, vector<1x32x64xbf16>
    %7 = vector.shape_cast %6 : vector<1x32x64xbf16> to vector<32x64xbf16>
    %8 = vector.shape_cast %5 : vector<32x64xbf16> to vector<1x32x64xbf16>
    tpu.vector_store %arg4[%c0_5, %c0_6, %c0_7], %8 {strides = array<i32>} : memref<1x32x64xbf16, #tpu.memory_space<vmem>>, vector<1x32x64xbf16>,
    %cst_8 = arith.constant dense<0.000000e+00> : vector<64xf32>
    %9 = vector.multi_reduction <add>, %4, %cst_8 [0] : vector<32x64xf32> to vector<64xf32>
    %10 = vector.shape_cast %9 : vector<64xf32> to vector<1x64xf32>
    %c0_9 = arith.constant 0 : index
    %c0_10 = arith.constant 0 : index
    %c0_11 = arith.constant 0 : index
    %c0_12 = arith.constant 0 : index
    %11 = vector.load %arg5[%c0_9, %c0_10, %c0_11, %c0_12] : memref<1x1x2x64xf32, #tpu.memory_space<vmem>>, vector<1x1x1x64xf32>
    %12 = vector.shape_cast %11 : vector<1x1x1x64xf32> to vector<1x64xf32>
    %13 = vector.shape_cast %10 : vector<1x64xf32> to vector<1x1x1x64xf32>
    tpu.vector_store %arg5[%c0_9, %c0_10, %c0_11, %c0_12], %13 {strides = array<i32>} : memref<1x1x2x64xf32, #tpu.memory_space<vmem>>, vector<1x1x1x64xf32>,
    %14 = arith.mulf %4, %4 : vector<32x64xf32>
    %cst_13 = arith.constant dense<0.000000e+00> : vector<64xf32>
    %15 = vector.multi_reduction <add>, %14, %cst_13 [0] : vector<32x64xf32> to vector<64xf32>
    %16 = vector.shape_cast %15 : vector<64xf32> to vector<1x64xf32>
    %c0_14 = arith.constant 0 : index
    %c0_15 = arith.constant 0 : index
    %c1 = arith.constant 1 : index
    %c0_16 = arith.constant 0 : index
    %17 = vector.load %arg5[%c0_14, %c0_15, %c1, %c0_16] : memref<1x1x2x64xf32, #tpu.memory_space<vmem>>, vector<1x1x1x64xf32>
    %18 = vector.shape_cast %17 : vector<1x1x1x64xf32> to vector<1x64xf32>
    %19 = vector.shape_cast %16 : vector<1x64xf32> to vector<1x1x1x64xf32>
    tpu.vector_store %arg5[%c0_14, %c0_15, %c1, %c0_16], %19 {strides = array<i32>} : memref<1x1x2x64xf32, #tpu.memory_space<vmem>>, vector<1x1x1x64xf32>,
    return
  }
  func.func @transform_0(%arg0: i32, %arg1: i32) -> (i32, i32, i32) {
    %c0_i32 = arith.constant 0 : i32
    %c0_i32_0 = arith.constant 0 : i32
    return %arg0, %arg1, %c0_i32 : i32, i32, i32
  }
  func.func @transform_1(%arg0: i32, %arg1: i32) -> (i32, i32, i32) {
    %c0_i32 = arith.constant 0 : i32
    %c0_i32_0 = arith.constant 0 : i32
    %c0_i32_1 = arith.constant 0 : i32
    return %arg0, %c0_i32, %c0_i32_0 : i32, i32, i32
  }
  func.func @transform_2(%arg0: i32, %arg1: i32) -> (i32, i32, i32) {
    %c0_i32 = arith.constant 0 : i32
    %c0_i32_0 = arith.constant 0 : i32
    return %arg0, %arg1, %c0_i32 : i32, i32, i32
  }
  func.func @transform_3(%arg0: i32, %arg1: i32) -> (i32, i32, i32, i32) {
    %c0_i32 = arith.constant 0 : i32
    %c0_i32_0 = arith.constant 0 : i32
    %c0_i32_1 = arith.constant 0 : i32
    return %arg0, %arg1, %c0_i32, %c0_i32_0 : i32, i32, i32, i32
  }
}

module attributes {stable_mosaic.version = 11 : i64} {
  func.func @_bn_relu_kernel(%arg0: i32, %arg1: memref<64x64xbf16, #tpu.memory_space<vmem>>, %arg2: memref<1x64xf32, #tpu.memory_space<vmem>>, %arg3: memref<1x64xf32, #tpu.memory_space<vmem>>, %arg4: memref<64x64xbf16, #tpu.memory_space<vmem>>) attributes {dimension_semantics = [#tpu.dimension_semantics<parallel>], iteration_bounds = array<i64: 1>, scalar_prefetch = 0 : i64, scratch_operands = 0 : i64, tpu.core_type = #tpu.core_type<tc>, window_params = [{transform_indices = @transform_0, window_bounds = array<i64: 64, 64>}, {pipeline_mode = #tpu.pipeline_mode<synchronous>, transform_indices = @transform_1, window_bounds = array<i64: 1, 64>}, {pipeline_mode = #tpu.pipeline_mode<synchronous>, transform_indices = @transform_2, window_bounds = array<i64: 1, 64>}, {transform_indices = @transform_3, window_bounds = array<i64: 64, 64>}]} {
    %c0 = arith.constant 0 : index
    %c0_0 = arith.constant 0 : index
    %0 = vector.load %arg1[%c0, %c0_0] : memref<64x64xbf16, #tpu.memory_space<vmem>>, vector<64x64xbf16>
    %c0_1 = arith.constant 0 : index
    %c0_2 = arith.constant 0 : index
    %1 = vector.load %arg2[%c0_1, %c0_2] : memref<1x64xf32, #tpu.memory_space<vmem>>, vector<1x64xf32>
    %2 = arith.extf %0 : vector<64x64xbf16> to vector<64x64xf32>
    %3 = vector.broadcast %1 : vector<1x64xf32> to vector<64x64xf32>
    %4 = arith.mulf %2, %3 : vector<64x64xf32>
    %c0_3 = arith.constant 0 : index
    %c0_4 = arith.constant 0 : index
    %5 = vector.load %arg3[%c0_3, %c0_4] : memref<1x64xf32, #tpu.memory_space<vmem>>, vector<1x64xf32>
    %6 = vector.broadcast %5 : vector<1x64xf32> to vector<64x64xf32>
    %7 = arith.addf %4, %6 : vector<64x64xf32>
    %cst = arith.constant 0.000000e+00 : f32
    %8 = vector.broadcast %cst : f32 to vector<64x64xf32>
    %9 = arith.maximumf %7, %8 : vector<64x64xf32>
    %10 = arith.truncf %9 : vector<64x64xf32> to vector<64x64xbf16>
    %c0_5 = arith.constant 0 : index
    %c0_6 = arith.constant 0 : index
    %11 = vector.load %arg4[%c0_5, %c0_6] : memref<64x64xbf16, #tpu.memory_space<vmem>>, vector<64x64xbf16>
    tpu.vector_store %arg4[%c0_5, %c0_6], %10 {strides = array<i32>} : memref<64x64xbf16, #tpu.memory_space<vmem>>, vector<64x64xbf16>,
    return
  }
  func.func @transform_0(%arg0: i32) -> (i32, i32) {
    %c0_i32 = arith.constant 0 : i32
    %c0_i32_0 = arith.constant 0 : i32
    return %arg0, %c0_i32 : i32, i32
  }
  func.func @transform_1(%arg0: i32) -> (i32, i32) {
    %c0_i32 = arith.constant 0 : i32
    %c0_i32_0 = arith.constant 0 : i32
    %c0_i32_1 = arith.constant 0 : i32
    return %c0_i32, %c0_i32_0 : i32, i32
  }
  func.func @transform_2(%arg0: i32) -> (i32, i32) {
    %c0_i32 = arith.constant 0 : i32
    %c0_i32_0 = arith.constant 0 : i32
    %c0_i32_1 = arith.constant 0 : i32
    return %c0_i32, %c0_i32_0 : i32, i32
  }
  func.func @transform_3(%arg0: i32) -> (i32, i32) {
    %c0_i32 = arith.constant 0 : i32
    %c0_i32_0 = arith.constant 0 : i32
    return %arg0, %c0_i32 : i32, i32
  }
}

module attributes {stable_mosaic.version = 11 : i64} {
  func.func @_mm_stats_kernel(%arg0: i32, %arg1: i32, %arg2: memref<1x128x192xbf16, #tpu.memory_space<vmem>>, %arg3: memref<1x192x32xbf16, #tpu.memory_space<vmem>>, %arg4: memref<1x128x32xbf16, #tpu.memory_space<vmem>>, %arg5: memref<1x1x2x32xf32, #tpu.memory_space<vmem>>) attributes {dimension_semantics = [#tpu.dimension_semantics<parallel>, #tpu.dimension_semantics<parallel>], iteration_bounds = array<i64: 2, 1>, scalar_prefetch = 0 : i64, scratch_operands = 0 : i64, tpu.core_type = #tpu.core_type<tc>, window_params = [{transform_indices = @transform_0, window_bounds = array<i64: 1, 128, 192>}, {transform_indices = @transform_1, window_bounds = array<i64: 1, 192, 32>}, {transform_indices = @transform_2, window_bounds = array<i64: 1, 128, 32>}, {transform_indices = @transform_3, window_bounds = array<i64: 1, 1, 2, 32>}]} {
    %c0 = arith.constant 0 : index
    %c0_0 = arith.constant 0 : index
    %c0_1 = arith.constant 0 : index
    %0 = vector.load %arg2[%c0, %c0_0, %c0_1] : memref<1x128x192xbf16, #tpu.memory_space<vmem>>, vector<1x128x192xbf16>
    %1 = vector.shape_cast %0 : vector<1x128x192xbf16> to vector<128x192xbf16>
    %c0_2 = arith.constant 0 : index
    %c0_3 = arith.constant 0 : index
    %c0_4 = arith.constant 0 : index
    %2 = vector.load %arg3[%c0_2, %c0_3, %c0_4] : memref<1x192x32xbf16, #tpu.memory_space<vmem>>, vector<1x192x32xbf16>
    %3 = vector.shape_cast %2 : vector<1x192x32xbf16> to vector<192x32xbf16>
    %cst = arith.constant dense<0.000000e+00> : vector<128x32xf32>
    %4 = tpu.matmul %1, %3, %cst {dimension_numbers = #tpu.dot_dimension_numbers<[1], [0], [0], [1], [0, 0, 1, 1], [], []>} : vector<128x192xbf16>, vector<192x32xbf16>, vector<128x32xf32> -> vector<128x32xf32>
    %5 = arith.truncf %4 : vector<128x32xf32> to vector<128x32xbf16>
    %c0_5 = arith.constant 0 : index
    %c0_6 = arith.constant 0 : index
    %c0_7 = arith.constant 0 : index
    %6 = vector.load %arg4[%c0_5, %c0_6, %c0_7] : memref<1x128x32xbf16, #tpu.memory_space<vmem>>, vector<1x128x32xbf16>
    %7 = vector.shape_cast %6 : vector<1x128x32xbf16> to vector<128x32xbf16>
    %8 = vector.shape_cast %5 : vector<128x32xbf16> to vector<1x128x32xbf16>
    tpu.vector_store %arg4[%c0_5, %c0_6, %c0_7], %8 {strides = array<i32>} : memref<1x128x32xbf16, #tpu.memory_space<vmem>>, vector<1x128x32xbf16>,
    %cst_8 = arith.constant dense<0.000000e+00> : vector<32xf32>
    %9 = vector.multi_reduction <add>, %4, %cst_8 [0] : vector<128x32xf32> to vector<32xf32>
    %10 = vector.shape_cast %9 : vector<32xf32> to vector<1x32xf32>
    %c0_9 = arith.constant 0 : index
    %c0_10 = arith.constant 0 : index
    %c0_11 = arith.constant 0 : index
    %c0_12 = arith.constant 0 : index
    %11 = vector.load %arg5[%c0_9, %c0_10, %c0_11, %c0_12] : memref<1x1x2x32xf32, #tpu.memory_space<vmem>>, vector<1x1x1x32xf32>
    %12 = vector.shape_cast %11 : vector<1x1x1x32xf32> to vector<1x32xf32>
    %13 = vector.shape_cast %10 : vector<1x32xf32> to vector<1x1x1x32xf32>
    tpu.vector_store %arg5[%c0_9, %c0_10, %c0_11, %c0_12], %13 {strides = array<i32>} : memref<1x1x2x32xf32, #tpu.memory_space<vmem>>, vector<1x1x1x32xf32>,
    %14 = arith.mulf %4, %4 : vector<128x32xf32>
    %cst_13 = arith.constant dense<0.000000e+00> : vector<32xf32>
    %15 = vector.multi_reduction <add>, %14, %cst_13 [0] : vector<128x32xf32> to vector<32xf32>
    %16 = vector.shape_cast %15 : vector<32xf32> to vector<1x32xf32>
    %c0_14 = arith.constant 0 : index
    %c0_15 = arith.constant 0 : index
    %c1 = arith.constant 1 : index
    %c0_16 = arith.constant 0 : index
    %17 = vector.load %arg5[%c0_14, %c0_15, %c1, %c0_16] : memref<1x1x2x32xf32, #tpu.memory_space<vmem>>, vector<1x1x1x32xf32>
    %18 = vector.shape_cast %17 : vector<1x1x1x32xf32> to vector<1x32xf32>
    %19 = vector.shape_cast %16 : vector<1x32xf32> to vector<1x1x1x32xf32>
    tpu.vector_store %arg5[%c0_14, %c0_15, %c1, %c0_16], %19 {strides = array<i32>} : memref<1x1x2x32xf32, #tpu.memory_space<vmem>>, vector<1x1x1x32xf32>,
    return
  }
  func.func @transform_0(%arg0: i32, %arg1: i32) -> (i32, i32, i32) {
    %c0_i32 = arith.constant 0 : i32
    %c0_i32_0 = arith.constant 0 : i32
    return %arg0, %arg1, %c0_i32 : i32, i32, i32
  }
  func.func @transform_1(%arg0: i32, %arg1: i32) -> (i32, i32, i32) {
    %c0_i32 = arith.constant 0 : i32
    %c0_i32_0 = arith.constant 0 : i32
    %c0_i32_1 = arith.constant 0 : i32
    return %arg0, %c0_i32, %c0_i32_0 : i32, i32, i32
  }
  func.func @transform_2(%arg0: i32, %arg1: i32) -> (i32, i32, i32) {
    %c0_i32 = arith.constant 0 : i32
    %c0_i32_0 = arith.constant 0 : i32
    return %arg0, %arg1, %c0_i32 : i32, i32, i32
  }
  func.func @transform_3(%arg0: i32, %arg1: i32) -> (i32, i32, i32, i32) {
    %c0_i32 = arith.constant 0 : i32
    %c0_i32_0 = arith.constant 0 : i32
    %c0_i32_1 = arith.constant 0 : i32
    return %arg0, %arg1, %c0_i32, %c0_i32_0 : i32, i32, i32, i32
  }
}

module attributes {stable_mosaic.version = 11 : i64} {
  func.func @_bn_relu_kernel(%arg0: i32, %arg1: memref<256x32xbf16, #tpu.memory_space<vmem>>, %arg2: memref<1x32xf32, #tpu.memory_space<vmem>>, %arg3: memref<1x32xf32, #tpu.memory_space<vmem>>, %arg4: memref<256x32xbf16, #tpu.memory_space<vmem>>) attributes {dimension_semantics = [#tpu.dimension_semantics<parallel>], iteration_bounds = array<i64: 1>, scalar_prefetch = 0 : i64, scratch_operands = 0 : i64, tpu.core_type = #tpu.core_type<tc>, window_params = [{transform_indices = @transform_0, window_bounds = array<i64: 256, 32>}, {pipeline_mode = #tpu.pipeline_mode<synchronous>, transform_indices = @transform_1, window_bounds = array<i64: 1, 32>}, {pipeline_mode = #tpu.pipeline_mode<synchronous>, transform_indices = @transform_2, window_bounds = array<i64: 1, 32>}, {transform_indices = @transform_3, window_bounds = array<i64: 256, 32>}]} {
    %c0 = arith.constant 0 : index
    %c0_0 = arith.constant 0 : index
    %0 = vector.load %arg1[%c0, %c0_0] : memref<256x32xbf16, #tpu.memory_space<vmem>>, vector<256x32xbf16>
    %c0_1 = arith.constant 0 : index
    %c0_2 = arith.constant 0 : index
    %1 = vector.load %arg2[%c0_1, %c0_2] : memref<1x32xf32, #tpu.memory_space<vmem>>, vector<1x32xf32>
    %2 = arith.extf %0 : vector<256x32xbf16> to vector<256x32xf32>
    %3 = vector.broadcast %1 : vector<1x32xf32> to vector<256x32xf32>
    %4 = arith.mulf %2, %3 : vector<256x32xf32>
    %c0_3 = arith.constant 0 : index
    %c0_4 = arith.constant 0 : index
    %5 = vector.load %arg3[%c0_3, %c0_4] : memref<1x32xf32, #tpu.memory_space<vmem>>, vector<1x32xf32>
    %6 = vector.broadcast %5 : vector<1x32xf32> to vector<256x32xf32>
    %7 = arith.addf %4, %6 : vector<256x32xf32>
    %cst = arith.constant 0.000000e+00 : f32
    %8 = vector.broadcast %cst : f32 to vector<256x32xf32>
    %9 = arith.maximumf %7, %8 : vector<256x32xf32>
    %10 = arith.truncf %9 : vector<256x32xf32> to vector<256x32xbf16>
    %c0_5 = arith.constant 0 : index
    %c0_6 = arith.constant 0 : index
    %11 = vector.load %arg4[%c0_5, %c0_6] : memref<256x32xbf16, #tpu.memory_space<vmem>>, vector<256x32xbf16>
    tpu.vector_store %arg4[%c0_5, %c0_6], %10 {strides = array<i32>} : memref<256x32xbf16, #tpu.memory_space<vmem>>, vector<256x32xbf16>,
    return
  }
  func.func @transform_0(%arg0: i32) -> (i32, i32) {
    %c0_i32 = arith.constant 0 : i32
    %c0_i32_0 = arith.constant 0 : i32
    return %arg0, %c0_i32 : i32, i32
  }
  func.func @transform_1(%arg0: i32) -> (i32, i32) {
    %c0_i32 = arith.constant 0 : i32
    %c0_i32_0 = arith.constant 0 : i32
    %c0_i32_1 = arith.constant 0 : i32
    return %c0_i32, %c0_i32_0 : i32, i32
  }
  func.func @transform_2(%arg0: i32) -> (i32, i32) {
    %c0_i32 = arith.constant 0 : i32
    %c0_i32_0 = arith.constant 0 : i32
    %c0_i32_1 = arith.constant 0 : i32
    return %c0_i32, %c0_i32_0 : i32, i32
  }
  func.func @transform_3(%arg0: i32) -> (i32, i32) {
    %c0_i32 = arith.constant 0 : i32
    %c0_i32_0 = arith.constant 0 : i32
    return %arg0, %c0_i32 : i32, i32
  }
}

module attributes {stable_mosaic.version = 11 : i64} {
  func.func @_mm_stats_kernel(%arg0: i32, %arg1: i32, %arg2: memref<1x512x96xbf16, #tpu.memory_space<vmem>>, %arg3: memref<1x96x16xbf16, #tpu.memory_space<vmem>>, %arg4: memref<1x512x16xbf16, #tpu.memory_space<vmem>>, %arg5: memref<1x1x2x16xf32, #tpu.memory_space<vmem>>) attributes {dimension_semantics = [#tpu.dimension_semantics<parallel>, #tpu.dimension_semantics<parallel>], iteration_bounds = array<i64: 2, 1>, scalar_prefetch = 0 : i64, scratch_operands = 0 : i64, tpu.core_type = #tpu.core_type<tc>, window_params = [{transform_indices = @transform_0, window_bounds = array<i64: 1, 512, 96>}, {transform_indices = @transform_1, window_bounds = array<i64: 1, 96, 16>}, {transform_indices = @transform_2, window_bounds = array<i64: 1, 512, 16>}, {transform_indices = @transform_3, window_bounds = array<i64: 1, 1, 2, 16>}]} {
    %c0 = arith.constant 0 : index
    %c0_0 = arith.constant 0 : index
    %c0_1 = arith.constant 0 : index
    %0 = vector.load %arg2[%c0, %c0_0, %c0_1] : memref<1x512x96xbf16, #tpu.memory_space<vmem>>, vector<1x512x96xbf16>
    %1 = vector.shape_cast %0 : vector<1x512x96xbf16> to vector<512x96xbf16>
    %c0_2 = arith.constant 0 : index
    %c0_3 = arith.constant 0 : index
    %c0_4 = arith.constant 0 : index
    %2 = vector.load %arg3[%c0_2, %c0_3, %c0_4] : memref<1x96x16xbf16, #tpu.memory_space<vmem>>, vector<1x96x16xbf16>
    %3 = vector.shape_cast %2 : vector<1x96x16xbf16> to vector<96x16xbf16>
    %cst = arith.constant dense<0.000000e+00> : vector<512x16xf32>
    %4 = tpu.matmul %1, %3, %cst {dimension_numbers = #tpu.dot_dimension_numbers<[1], [0], [0], [1], [0, 0, 1, 1], [], []>} : vector<512x96xbf16>, vector<96x16xbf16>, vector<512x16xf32> -> vector<512x16xf32>
    %5 = arith.truncf %4 : vector<512x16xf32> to vector<512x16xbf16>
    %c0_5 = arith.constant 0 : index
    %c0_6 = arith.constant 0 : index
    %c0_7 = arith.constant 0 : index
    %6 = vector.load %arg4[%c0_5, %c0_6, %c0_7] : memref<1x512x16xbf16, #tpu.memory_space<vmem>>, vector<1x512x16xbf16>
    %7 = vector.shape_cast %6 : vector<1x512x16xbf16> to vector<512x16xbf16>
    %8 = vector.shape_cast %5 : vector<512x16xbf16> to vector<1x512x16xbf16>
    tpu.vector_store %arg4[%c0_5, %c0_6, %c0_7], %8 {strides = array<i32>} : memref<1x512x16xbf16, #tpu.memory_space<vmem>>, vector<1x512x16xbf16>,
    %cst_8 = arith.constant dense<0.000000e+00> : vector<16xf32>
    %9 = vector.multi_reduction <add>, %4, %cst_8 [0] : vector<512x16xf32> to vector<16xf32>
    %10 = vector.shape_cast %9 : vector<16xf32> to vector<1x16xf32>
    %c0_9 = arith.constant 0 : index
    %c0_10 = arith.constant 0 : index
    %c0_11 = arith.constant 0 : index
    %c0_12 = arith.constant 0 : index
    %11 = vector.load %arg5[%c0_9, %c0_10, %c0_11, %c0_12] : memref<1x1x2x16xf32, #tpu.memory_space<vmem>>, vector<1x1x1x16xf32>
    %12 = vector.shape_cast %11 : vector<1x1x1x16xf32> to vector<1x16xf32>
    %13 = vector.shape_cast %10 : vector<1x16xf32> to vector<1x1x1x16xf32>
    tpu.vector_store %arg5[%c0_9, %c0_10, %c0_11, %c0_12], %13 {strides = array<i32>} : memref<1x1x2x16xf32, #tpu.memory_space<vmem>>, vector<1x1x1x16xf32>,
    %14 = arith.mulf %4, %4 : vector<512x16xf32>
    %cst_13 = arith.constant dense<0.000000e+00> : vector<16xf32>
    %15 = vector.multi_reduction <add>, %14, %cst_13 [0] : vector<512x16xf32> to vector<16xf32>
    %16 = vector.shape_cast %15 : vector<16xf32> to vector<1x16xf32>
    %c0_14 = arith.constant 0 : index
    %c0_15 = arith.constant 0 : index
    %c1 = arith.constant 1 : index
    %c0_16 = arith.constant 0 : index
    %17 = vector.load %arg5[%c0_14, %c0_15, %c1, %c0_16] : memref<1x1x2x16xf32, #tpu.memory_space<vmem>>, vector<1x1x1x16xf32>
    %18 = vector.shape_cast %17 : vector<1x1x1x16xf32> to vector<1x16xf32>
    %19 = vector.shape_cast %16 : vector<1x16xf32> to vector<1x1x1x16xf32>
    tpu.vector_store %arg5[%c0_14, %c0_15, %c1, %c0_16], %19 {strides = array<i32>} : memref<1x1x2x16xf32, #tpu.memory_space<vmem>>, vector<1x1x1x16xf32>,
    return
  }
  func.func @transform_0(%arg0: i32, %arg1: i32) -> (i32, i32, i32) {
    %c0_i32 = arith.constant 0 : i32
    %c0_i32_0 = arith.constant 0 : i32
    return %arg0, %arg1, %c0_i32 : i32, i32, i32
  }
  func.func @transform_1(%arg0: i32, %arg1: i32) -> (i32, i32, i32) {
    %c0_i32 = arith.constant 0 : i32
    %c0_i32_0 = arith.constant 0 : i32
    %c0_i32_1 = arith.constant 0 : i32
    return %arg0, %c0_i32, %c0_i32_0 : i32, i32, i32
  }
  func.func @transform_2(%arg0: i32, %arg1: i32) -> (i32, i32, i32) {
    %c0_i32 = arith.constant 0 : i32
    %c0_i32_0 = arith.constant 0 : i32
    return %arg0, %arg1, %c0_i32 : i32, i32, i32
  }
  func.func @transform_3(%arg0: i32, %arg1: i32) -> (i32, i32, i32, i32) {
    %c0_i32 = arith.constant 0 : i32
    %c0_i32_0 = arith.constant 0 : i32
    %c0_i32_1 = arith.constant 0 : i32
    return %arg0, %arg1, %c0_i32, %c0_i32_0 : i32, i32, i32, i32
  }
}

module attributes {stable_mosaic.version = 11 : i64} {
  func.func @_bn_relu_conv_tanh_kernel(%arg0: i32, %arg1: memref<64x256xbf16, #tpu.memory_space<vmem>>, %arg2: memref<1x256xf32, #tpu.memory_space<vmem>>, %arg3: memref<1x256xf32, #tpu.memory_space<vmem>>, %arg4: memref<256x96xbf16, #tpu.memory_space<vmem>>, %arg5: memref<64x96xf32, #tpu.memory_space<vmem>>) attributes {dimension_semantics = [#tpu.dimension_semantics<parallel>], iteration_bounds = array<i64: 1>, scalar_prefetch = 0 : i64, scratch_operands = 0 : i64, tpu.core_type = #tpu.core_type<tc>, window_params = [{transform_indices = @transform_0, window_bounds = array<i64: 64, 256>}, {pipeline_mode = #tpu.pipeline_mode<synchronous>, transform_indices = @transform_1, window_bounds = array<i64: 1, 256>}, {pipeline_mode = #tpu.pipeline_mode<synchronous>, transform_indices = @transform_2, window_bounds = array<i64: 1, 256>}, {pipeline_mode = #tpu.pipeline_mode<synchronous>, transform_indices = @transform_3, window_bounds = array<i64: 256, 96>}, {transform_indices = @transform_4, window_bounds = array<i64: 64, 96>}]} {
    %c0 = arith.constant 0 : index
    %c0_0 = arith.constant 0 : index
    %0 = vector.load %arg1[%c0, %c0_0] : memref<64x256xbf16, #tpu.memory_space<vmem>>, vector<64x256xbf16>
    %c0_1 = arith.constant 0 : index
    %c0_2 = arith.constant 0 : index
    %1 = vector.load %arg2[%c0_1, %c0_2] : memref<1x256xf32, #tpu.memory_space<vmem>>, vector<1x256xf32>
    %2 = arith.extf %0 : vector<64x256xbf16> to vector<64x256xf32>
    %3 = vector.broadcast %1 : vector<1x256xf32> to vector<64x256xf32>
    %4 = arith.mulf %2, %3 : vector<64x256xf32>
    %c0_3 = arith.constant 0 : index
    %c0_4 = arith.constant 0 : index
    %5 = vector.load %arg3[%c0_3, %c0_4] : memref<1x256xf32, #tpu.memory_space<vmem>>, vector<1x256xf32>
    %6 = vector.broadcast %5 : vector<1x256xf32> to vector<64x256xf32>
    %7 = arith.addf %4, %6 : vector<64x256xf32>
    %cst = arith.constant 0.000000e+00 : f32
    %8 = vector.broadcast %cst : f32 to vector<64x256xf32>
    %9 = arith.maximumf %7, %8 : vector<64x256xf32>
    %10 = arith.truncf %9 : vector<64x256xf32> to vector<64x256xbf16>
    %c0_5 = arith.constant 0 : index
    %c0_6 = arith.constant 0 : index
    %11 = vector.load %arg4[%c0_5, %c0_6] : memref<256x96xbf16, #tpu.memory_space<vmem>>, vector<256x96xbf16>
    %cst_7 = arith.constant dense<0.000000e+00> : vector<64x96xf32>
    %12 = tpu.matmul %10, %11, %cst_7 {dimension_numbers = #tpu.dot_dimension_numbers<[1], [0], [0], [1], [0, 0, 1, 1], [], []>} : vector<64x256xbf16>, vector<256x96xbf16>, vector<64x96xf32> -> vector<64x96xf32>
    %13 = math.tanh %12 : vector<64x96xf32>
    %c0_8 = arith.constant 0 : index
    %c0_9 = arith.constant 0 : index
    %14 = vector.load %arg5[%c0_8, %c0_9] : memref<64x96xf32, #tpu.memory_space<vmem>>, vector<64x96xf32>
    tpu.vector_store %arg5[%c0_8, %c0_9], %13 {strides = array<i32>} : memref<64x96xf32, #tpu.memory_space<vmem>>, vector<64x96xf32>,
    return
  }
  func.func @transform_0(%arg0: i32) -> (i32, i32) {
    %c0_i32 = arith.constant 0 : i32
    %c0_i32_0 = arith.constant 0 : i32
    return %arg0, %c0_i32 : i32, i32
  }
  func.func @transform_1(%arg0: i32) -> (i32, i32) {
    %c0_i32 = arith.constant 0 : i32
    %c0_i32_0 = arith.constant 0 : i32
    %c0_i32_1 = arith.constant 0 : i32
    return %c0_i32, %c0_i32_0 : i32, i32
  }
  func.func @transform_2(%arg0: i32) -> (i32, i32) {
    %c0_i32 = arith.constant 0 : i32
    %c0_i32_0 = arith.constant 0 : i32
    %c0_i32_1 = arith.constant 0 : i32
    return %c0_i32, %c0_i32_0 : i32, i32
  }
  func.func @transform_3(%arg0: i32) -> (i32, i32) {
    %c0_i32 = arith.constant 0 : i32
    %c0_i32_0 = arith.constant 0 : i32
    %c0_i32_1 = arith.constant 0 : i32
    return %c0_i32, %c0_i32_0 : i32, i32
  }
  func.func @transform_4(%arg0: i32) -> (i32, i32) {
    %c0_i32 = arith.constant 0 : i32
    %c0_i32_0 = arith.constant 0 : i32
    return %arg0, %c0_i32 : i32, i32
  }
}

</mosaic_0001>

<bundles_post_ra>
// kernel: tile.33
= control target key start
LH: loop header
LB: loop body
LE: loop exit
PB: predicated region body
PF: predicated region fallthrough
CT: control target
= control target key end

     0   :  { %s22_s0 = inlined_call_operand.vmem [shape: f32[32], index: 0, kind: input, shape index: {}]   ;;  %s23_s1 = inlined_call_operand.vmem [shape: f32[2,32], index: 1, kind: output, shape index: {}]  }
   0x1   :  { %v4_v0 = vld [vmem:[%s22_s0] ss:$0 sm:$0xff] }
   0x2   :  { %5 = vst [vmem:[%s23_s1] sm:$0x3] %v4_v0 }

// kernel: tile.38
= control target key start
LH: loop header
LB: loop body
LE: loop exit
PB: predicated region body
PF: predicated region fallthrough
CT: control target
= control target key end

     0   :  { %vm8_vm0 = vcmask 261120   ;;  %vm14_vm1 = vcmask 523520   ;;  %s42_s0 = inlined_call_operand.vmem [shape: f32[2,32], index: 0, kind: input, shape index: {}]   ;;  %s43_s1 = inlined_call_operand.vmem [shape: f32[1,64], index: 1, kind: output, shape index: {}]  }
   0x1   :  { %v5_v0 = vld [vmem:[%s42_s0] sm:$0x3]  ;;  %s25_s0 = smov 32  }
   0x2   :  { %6 = vst [vmem:[#allocation1] sm:$0x3] %v5_v0 }
   0x9   :  { %v11_v1 = vld [vmem:[#allocation1 + $0x1] sm:$0x1]   ;;  %v7_v2 = vld [vmem:[#allocation1] sm:$0x1]  }
   0xa   :  { %12 = vrot.lane.b32.xlu0 %v11_v1, %s25_s0  ;;  %9 = vst.msk [vmem:[#allocation0] sm:$0x1] %vm8_vm0, %v7_v2  }
  0x7c   :  { %v13_v3 = vpop.permute.xlu0 %12  }
  0x7d   :  { %15 = vst.msk [vmem:[#allocation0] sm:$0x1] %vm14_vm1, %v13_v3  }
  0x84   :  { %v20_v4 = vld [vmem:[#allocation0] sm:$0x1] }
  0x85   :  { %23 = vst [vmem:[%s43_s1] sm:$0x1] %v20_v4 }

// kernel: generator_forward.6
= control target key start
LH: loop header
LB: loop body
LE: loop exit
PB: predicated region body
PF: predicated region fallthrough
CT: control target
= control target key end

     0   :  { %s992_s12 = smov 0   ;;  %s994_s13 = smov 0   ;;  %s1081_s0 = inlined_call_operand.vmem [shape: bf16[2,32,384], index: 0, kind: input, shape index: {}]   ;;  %s1082_s1 = inlined_call_operand.vmem [shape: bf16[2,384,64], index: 1, kind: input, shape index: {}]   ;;  %s1083_s2 = inlined_call_operand.vmem [shape: bf16[2,32,64], index: 2, kind: output, shape index: {0}]   ;;  %s1084_s3 = inlined_call_operand.vmem [shape: f32[2,1,2,64], index: 3, kind: output, shape index: {1}]  }
   0x1   :  { %s996_s14 = smov 0  }
   0x2 LB: > { %s26_s15 = sadd.s32 1, %s966_s13  ;;  %p785_p0 = scmp.ge.s32.totalorder %s970_s14, 1  ;;  %s970_s14 = sphi %s996_s14, %s14_s14   ;;  %s966_s13 = sphi %s994_s13, %s1086_s13   ;;  %s962_s12 = sphi %s992_s12, %s1085_s12  }
   0x3   : > { %p28_p1 = scmp.ge.s32.totalorder %s26_s15, 2  ;;  %p174_p2 = scmp.lt.s32.totalorder %s970_s14, 3 }
   0x5   : > { %s1088_s15 = smov (%p28_p1, %s26_s15), 0  ;;  %p175_p3 = pnand %p785_p0, %p174_p2 }
   0x6   : > { %p220_p4 = scmp.lt.s32.totalorder (!%p175_p3), %s962_s12, 1 }
   0x7   : > { %178 = sbr.rel (%p175_p3) target bundleno = 279 (0x117), region = 28 }
   0xc   : > { %s1090_s12 = smov (!%p220_p4, %s962_s12), 1  ;;  %vm599_vm0 = vcmask 519168   ;;  %vm604_vm1 = vcmask 523264   ;;  %vm618_vm2 = vcmask 516096  }
   0xd   : > { %s891_s16 = smul.u32 192, %s1090_s12  ;;  %s827_s24 = sshll.u32 %s1090_s12, 4 }
   0xe   : > { %s890_s20 = smul.u32 48, %s1090_s12  ;;  %s1050_s27 = scalar_lea.vmem %s1083_s2, %s827_s24 }
   0xf   : > { %s1016_s19 = scalar_lea.vmem %s1082_s1, %s891_s16  ;;  %s790_s28 = sshll.u32 %s1090_s12, 1 }
  0x10   : > { %v916_v0 = vld [vmem:[%s1016_s19 + $0x78] sm:$0xff]   ;;  %v919_v3 = vld [vmem:[%s1016_s19 + $0x70] sm:$0xff]   ;;  %v922_v6 = vld [vmem:[%s1016_s19 + $0x68] sm:$0xff]   ;;  %s228_s23 = scalar_lea.vmem %s1081_s0, %s890_s20  ;;  %s251_s4 = scalar_lea.vmem %s1084_s3, %s790_s28 }
  0x11   : > { %v917_v1 = vld [vmem:[%s1016_s19 + $0xb8] sm:$0xff]   ;;  %832 = vmatprep.subr.bf16.mxu0 %v916_v0  ;;  %v920_v4 = vld [vmem:[%s1016_s19 + $0xb0] sm:$0xff]   ;;  %v923_v7 = vld [vmem:[%s1016_s19 + $0xa8] sm:$0xff]  }
  0x12   : > { %v918_v2 = vld [vmem:[%s1016_s19 + $0x38] sm:$0xff]   ;;  %870 = vmatprep.subr.bf16.mxu1 %v917_v1  ;;  %v921_v5 = vld [vmem:[%s1016_s19 + $0x30] sm:$0xff]   ;;  %v924_v8 = vld [vmem:[%s1016_s19 + $0x28] sm:$0xff]  }
  0x13   : > { %833 = vmatpush3.bf16.msra.mxu0 %v918_v2  ;;  %871 = vmatpush3.bf16.msra.mxu1 %v917_v1  ;;  %v925_v9 = vld [vmem:[%s1016_s19 + $0x60] sm:$0xff]   ;;  %v928_v12 = vld [vmem:[%s1016_s19 + $0x58] sm:$0xff]   ;;  %v931_v15 = vld [vmem:[%s1016_s19 + $0x50] sm:$0xff]  }
  0x14   : > { %834 = vmatprep.subr.bf16.mxu0 %v919_v3  ;;  %872 = vmatprep.subr.bf16.mxu1 %v920_v4  ;;  %v926_v10 = vld [vmem:[%s1016_s19 + $0xa0] sm:$0xff]   ;;  %v929_v13 = vld [vmem:[%s1016_s19 + $0x98] sm:$0xff]   ;;  %v932_v16 = vld [vmem:[%s1016_s19 + $0x90] sm:$0xff]  }
  0x15   : > { %v927_v11 = vld [vmem:[%s1016_s19 + $0x20] sm:$0xff]   ;;  %v930_v14 = vld [vmem:[%s1016_s19 + $0x18] sm:$0xff]   ;;  %v933_v17 = vld [vmem:[%s1016_s19 + $0x10] sm:$0xff]  }
  0x16   : > { %v934_v18 = vld [vmem:[%s1016_s19 + $0x48] sm:$0xff]   ;;  %v937_v21 = vld [vmem:[%s1016_s19 + $0x40] sm:$0xff]  }
  0x17   : > { %835 = vmatpush3.bf16.msra.mxu0 %v921_v5  ;;  %873 = vmatpush3.bf16.msra.mxu1 %v920_v4  ;;  %v935_v19 = vld [vmem:[%s1016_s19 + $0x88] sm:$0xff]   ;;  %v938_v22 = vld [vmem:[%s1016_s19 + $0x80] sm:$0xff]  }
  0x18   : > { %836 = vmatprep.subr.bf16.mxu0 %v922_v6  ;;  %874 = vmatprep.subr.bf16.mxu1 %v923_v7  ;;  %v936_v20 = vld [vmem:[%s1016_s19 + $0x8] sm:$0xff]   ;;  %v942_v23 = vld [vmem:[%s228_s23 + $0x4] ss:$12 sps:$4 sm:$0xff]  }
  0x19   : > { %v943_v24 = vld [vmem:[%s228_s23 + $0x8] ss:$12 sps:$4 sm:$0xff]   ;;  %517 = vmatprep.mubr.bf16.mxu0 %v942_v23  ;;  %v939_v25 = vld [vmem:[%s1016_s19] sm:$0xff]  }
  0x1a   : > { %886 = vmatprep.mubr.bf16.mxu1 %v943_v24  ;;  %v940_v26 = vld [vmem:[%s228_s23] ss:$12 sps:$4 sm:$0xff]   ;;  %v945_v28 = vld [vmem:[%s228_s23 + $0x1c] ss:$12 sps:$4 sm:$0xff]   ;;  %v947_v29 = vld [vmem:[%s228_s23 + $0x18] ss:$12 sps:$4 sm:$0xff]  }
  0x1b   : > { %837 = vmatpush3.bf16.msra.mxu0 %v924_v8  ;;  %875 = vmatpush3.bf16.msra.mxu1 %v923_v7  ;;  %v944_v27 = vld [vmem:[%s228_s23 + $0x20] ss:$12 sps:$4 sm:$0xff]  }
  0x1c   : > { %838 = vmatprep.subr.bf16.mxu0 %v925_v9  ;;  %876 = vmatprep.subr.bf16.mxu1 %v926_v10 }
  0x1f   : > { %839 = vmatpush3.bf16.msra.mxu0 %v927_v11  ;;  %877 = vmatpush3.bf16.msra.mxu1 %v926_v10 }
  0x20   : > { %840 = vmatprep.subr.bf16.mxu0 %v928_v12  ;;  %878 = vmatprep.subr.bf16.mxu1 %v929_v13 }
  0x23   : > { %841 = vmatpush3.bf16.msra.mxu0 %v930_v14  ;;  %879 = vmatpush3.bf16.msra.mxu1 %v929_v13 }
  0x24   : > { %842 = vmatprep.subr.bf16.mxu0 %v931_v15  ;;  %880 = vmatprep.subr.bf16.mxu1 %v932_v16 }
  0x27   : > { %843 = vmatpush3.bf16.msra.mxu0 %v933_v17  ;;  %881 = vmatpush3.bf16.msra.mxu1 %v932_v16 }
  0x28   : > { %844 = vmatprep.subr.bf16.mxu0 %v934_v18  ;;  %882 = vmatprep.subr.bf16.mxu1 %v935_v19 }
  0x2b   : > { %845 = vmatpush3.bf16.msra.mxu0 %v936_v20  ;;  %883 = vmatpush3.bf16.msra.mxu1 %v935_v19 }
  0x2c   : > { %846 = vmatprep.subr.bf16.mxu0 %v937_v21  ;;  %884 = vmatprep.subr.bf16.mxu1 %v938_v22 }
  0x2f   : > { %847 = vmatpush3.bf16.msra.mxu0 %v939_v25  ;;  %885 = vmatpush3.bf16.msra.mxu1 %v938_v22 }
  0x32   : > { %518 = vmatmul.mubr.bf16.vlgmr.msra.gmra.mxu0 %v940_v26  ;;  %887 = vmatmul.mubr.bf16.vlgmr.msra.gmra.mxu1 %v944_v27 }
  0x33   : > { %525 = vmatprep.mubr.bf16.mxu0 %v945_v28 }
  0x3a   : > { %526 = vmatmul.mubr.bf16.gmra.mxu0 %v947_v29 }
  0xf2   : > { %v848_v30 = vpop.f32.mrf.mxu0  ;;  %v888_v31 = vpop.f32.mrf.mxu1 }
  0xf4   : > { %v849_v32 = vpop.f32.mrf.mxu0  ;;  %v568_v33 = vpop.f32.mrf.mxu1 }
  0xf5   : > { %v850_v34 = vadd.f32 %v849_v32, %v848_v30 }
  0xf6   : > { %v851_v35 = vpop.f32.mrf.mxu0  ;;  %v889_v36 = vpop.f32.mrf.mxu1 }
  0xf7   : > { %v569_v37 = vadd.f32 %v850_v34, %v568_v33 }
  0xf8   : > { %v852_v38 = vpop.f32.mrf.mxu0  ;;  %v571_v41 = vpop.f32.mrf.mxu1 }
  0xf9   : > { %v828_v39 = vpack.c.bf16 %v569_v37, %v569_v37  ;;  %v853_v40 = vadd.f32 %v852_v38, %v851_v35  ;;  %v620_v49 = vmul.f32 %v569_v37, %v569_v37  ;;  %v605_v52 = vsel %vm604_vm1, %v569_v37, 0.0 }
  0xfa   : > { %v854_v42 = vpop.f32.mrf.mxu0 }
  0xfb   : > { %600 = vst.msk [vmem:[%s1050_s27] sm:$0xf] %vm599_vm0, %v828_v39  ;;  %v572_v43 = vadd.f32 %v853_v40, %v571_v41  ;;  %v624_v60 = vsel %vm604_vm1, %v620_v49, 0.0 }
  0xfc   : > { %v855_v44 = vpop.f32.mrf.mxu0 }
  0xfd   : > { %v829_v45 = vpack.c.bf16 %v572_v43, %v572_v43  ;;  %v621_v46 = vmul.f32 %v572_v43, %v572_v43  ;;  %v856_v47 = vadd.f32 %v855_v44, %v854_v42  ;;  %v606_v50 = vsel %vm604_vm1, %v572_v43, 0.0 }
  0xfe   : > { %v857_v48 = vpop.f32.mrf.mxu0  ;;  %v607_v59 = vadd.f32 %v606_v50, %v605_v52 }
  0xff   : > { %601 = vst.msk [vmem:[%s1050_s27 + $0x4] sm:$0xf] %vm599_vm0, %v829_v45  ;;  %v577_v51 = vadd.f32 %v888_v31, %v856_v47  ;;  %v625_v53 = vsel %vm604_vm1, %v621_v46, 0.0 }
 0x100   : > { %v858_v54 = vpop.f32.mrf.mxu0  ;;  %v626_v63 = vadd.f32 %v625_v53, %v624_v60 }
 0x101   : > { %v830_v55 = vpack.c.bf16 %v577_v51, %v577_v51  ;;  %v608_v56 = vsel %vm604_vm1, %v577_v51, 0.0  ;;  %v622_v57 = vmul.f32 %v577_v51, %v577_v51  ;;  %v859_v58 = vadd.f32 %v858_v54, %v857_v48 }
 0x102   : > { %v609_v0 = vadd.f32 %v608_v56, %v607_v59 }
 0x103   : > { %602 = vst.msk [vmem:[%s1050_s27 + $0x8] sm:$0xf] %vm599_vm0, %v830_v55  ;;  %v627_v61 = vsel %vm604_vm1, %v622_v57, 0.0  ;;  %v580_v62 = vadd.f32 %v889_v36, %v859_v58 }
 0x104   : > { %v628_v4 = vadd.f32 %v627_v61, %v626_v63 }
 0x105   : > { %v831_v1 = vpack.c.bf16 %v580_v62, %v580_v62  ;;  %v610_v2 = vsel %vm604_vm1, %v580_v62, 0.0  ;;  %v623_v3 = vmul.f32 %v580_v62, %v580_v62 }
 0x106   : > { %v611_v5 = vadd.f32 %v610_v2, %v609_v0 }
 0x107   : > { %603 = vst.msk [vmem:[%s1050_s27 + $0xc] sm:$0xf] %vm599_vm0, %v831_v1  ;;  %v629_v6 = vsel %vm604_vm1, %v623_v3, 0.0 }
 0x108   : > { %v612_v7 = vrot.slane %v611_v5, 4  ;;  %v630_v8 = vadd.f32 %v629_v6, %v628_v4 }
 0x10a   : > { %v613_v9 = vadd.f32 %v612_v7, %v611_v5  ;;  %v631_v10 = vrot.slane %v630_v8, 4 }
 0x10c   : > { %v614_v11 = vrot.slane %v613_v9, 2  ;;  %v632_v12 = vadd.f32 %v631_v10, %v630_v8 }
 0x10e   : > { %v615_v13 = vadd.f32 %v614_v11, %v613_v9  ;;  %v633_v14 = vrot.slane %v632_v12, 2 }
 0x110   : > { %v616_v15 = vrot.slane %v615_v13, 1  ;;  %v634_v16 = vadd.f32 %v633_v14, %v632_v12 }
 0x112   : > { %v617_v17 = vadd.f32 %v616_v15, %v615_v13  ;;  %v635_v18 = vrot.slane %v634_v16, 1 }
 0x114   : > { %619 = vst.msk [vmem:[%s251_s4] sm:$0x1] %vm618_vm2, %v617_v17  ;;  %v636_v19 = vadd.f32 %v635_v18, %v634_v16 }
 0x116   : > { %637 = vst.msk [vmem:[%s251_s4 + $0x1] sm:$0x1] %vm618_vm2, %v636_v19 }
 0x117 PF: > { %s14_s14 = sadd.s32 1, %s970_s14   ;;  %s1085_s12 = smov %s966_s13 }
 0x118   : > { %p11_p5 = scmp.ge.s32.totalorder %s14_s14, 4   ;;  %s1086_s13 = smov %s1088_s15 }
 0x11a   :  { %13 = sbr.rel (!%p11_p5) target bundleno = 2 (0x2), region = 73 }

// kernel: generator_forward.7
= control target key start
LH: loop header
LB: loop body
LE: loop exit
PB: predicated region body
PF: predicated region fallthrough
CT: control target
= control target key end

     0   :  { %vm100_vm0 = vcmask 519168   ;;  %s220_s0 = inlined_call_operand.vmem [shape: bf16[64,64], index: 0, kind: input, shape index: {}]   ;;  %s221_s1 = inlined_call_operand.vmem [shape: f32[1,64], index: 1, kind: input, shape index: {}]   ;;  %s222_s2 = inlined_call_operand.vmem [shape: f32[1,64], index: 2, kind: input, shape index: {}]   ;;  %s223_s3 = inlined_call_operand.vmem [shape: bf16[64,64], index: 3, kind: output, shape index: {}]  }
   0x1   :  { %v132_v0 = vld [vmem:[%s220_s0] sm:$0xff]   ;;  %v147_v4 = vld [vmem:[%s220_s0 + $0x8] sm:$0xff]   ;;  %v148_v5 = vld [vmem:[%s220_s0 + $0x10] sm:$0xff]  }
   0x2   :  { %v113_v1 = vld [vmem:[%s221_s1] ss:$0 sm:$0xff]  ;;  %v133_v2 = vunpack.c.l.bf16 %v132_v0  ;;  %v134_v3 = vunpack.c.h.bf16 %v132_v0  ;;  %v149_v6 = vld [vmem:[%s220_s0 + $0x18] sm:$0xff]   ;;  %v137_v8 = vunpack.c.l.bf16 %v147_v4  ;;  %v138_v9 = vunpack.c.h.bf16 %v147_v4 }
   0x3   :  { %v114_v7 = vld [vmem:[%s222_s2] ss:$0 sm:$0xff]  ;;  %v141_v10 = vunpack.c.l.bf16 %v148_v5  ;;  %v142_v11 = vunpack.c.h.bf16 %v148_v5  ;;  %v145_v14 = vunpack.c.l.bf16 %v149_v6  ;;  %v146_v15 = vunpack.c.h.bf16 %v149_v6 }
   0x4   :  { %v37_v12 = vmul.f32 %v133_v2, %v113_v1  ;;  %v38_v13 = vmul.f32 %v134_v3, %v113_v1  ;;  %v39_v16 = vmul.f32 %v137_v8, %v113_v1  ;;  %v40_v17 = vmul.f32 %v138_v9, %v113_v1 }
   0x5   :  { %v41_v18 = vmul.f32 %v141_v10, %v113_v1  ;;  %v42_v19 = vmul.f32 %v142_v11, %v113_v1  ;;  %v43_v22 = vmul.f32 %v145_v14, %v113_v1  ;;  %v44_v23 = vmul.f32 %v146_v15, %v113_v1 }
   0x6   :  { %v52_v20 = vadd.f32 %v114_v7, %v37_v12  ;;  %v53_v21 = vadd.f32 %v114_v7, %v38_v13  ;;  %v54_v24 = vadd.f32 %v114_v7, %v39_v16  ;;  %v55_v25 = vadd.f32 %v114_v7, %v40_v17 }
   0x7   :  { %v56_v26 = vadd.f32 %v114_v7, %v41_v18  ;;  %v57_v27 = vadd.f32 %v114_v7, %v42_v19  ;;  %v58_v30 = vadd.f32 %v114_v7, %v43_v22  ;;  %v59_v31 = vadd.f32 %v114_v7, %v44_v23 }
   0x8   :  { %v60_v28 = vmax.f32 %v52_v20, 0.0  ;;  %v61_v29 = vmax.f32 %v53_v21, 0.0  ;;  %v62_v32 = vmax.f32 %v54_v24, 0.0  ;;  %v63_v33 = vmax.f32 %v55_v25, 0.0 }
   0x9   :  { %v64_v34 = vmax.f32 %v56_v26, 0.0  ;;  %v65_v35 = vmax.f32 %v57_v27, 0.0  ;;  %v66_v38 = vmax.f32 %v58_v30, 0.0  ;;  %v67_v39 = vmax.f32 %v59_v31, 0.0 }
   0xa   :  { %v123_v36 = vpack.c.bf16 %v60_v28, %v60_v28  ;;  %v124_v37 = vpack.c.bf16 %v61_v29, %v61_v29  ;;  %v125_v40 = vpack.c.bf16 %v62_v32, %v62_v32  ;;  %v126_v41 = vpack.c.bf16 %v63_v33, %v63_v33 }
   0xb   :  { %v127_v42 = vpack.c.bf16 %v64_v34, %v64_v34  ;;  %v128_v43 = vpack.c.bf16 %v65_v35, %v65_v35  ;;  %v129_v44 = vpack.c.bf16 %v66_v38, %v66_v38  ;;  %v130_v45 = vpack.c.bf16 %v67_v39, %v67_v39 }
   0xc   :  { %101 = vst.msk [vmem:[%s223_s3] sm:$0xf] %vm100_vm0, %v123_v36  ;;  %102 = vst.msk [vmem:[%s223_s3 + $0x4] sm:$0xf] %vm100_vm0, %v124_v37 }
   0xd   :  { %103 = vst.msk [vmem:[%s223_s3 + $0x8] sm:$0xf] %vm100_vm0, %v125_v40  ;;  %104 = vst.msk [vmem:[%s223_s3 + $0xc] sm:$0xf] %vm100_vm0, %v126_v41 }
   0xe   :  { %105 = vst.msk [vmem:[%s223_s3 + $0x10] sm:$0xf] %vm100_vm0, %v127_v42  ;;  %106 = vst.msk [vmem:[%s223_s3 + $0x14] sm:$0xf] %vm100_vm0, %v128_v43 }
   0xf   :  { %107 = vst.msk [vmem:[%s223_s3 + $0x18] sm:$0xf] %vm100_vm0, %v129_v44  ;;  %108 = vst.msk [vmem:[%s223_s3 + $0x1c] sm:$0xf] %vm100_vm0, %v130_v45 }

// kernel: tile.43
= control target key start
LH: loop header
LB: loop body
LE: loop exit
PB: predicated region body
PF: predicated region fallthrough
CT: control target
= control target key end

     0   :  { %s22_s0 = inlined_call_operand.vmem [shape: f32[16], index: 0, kind: input, shape index: {}]   ;;  %s23_s1 = inlined_call_operand.vmem [shape: f32[2,16], index: 1, kind: output, shape index: {}]  }
   0x1   :  { %v4_v0 = vld [vmem:[%s22_s0] ss:$0 sm:$0xff] }
   0x2   :  { %5 = vst [vmem:[%s23_s1] sm:$0x3] %v4_v0 }

// kernel: tile.48
= control target key start
LH: loop header
LB: loop body
LE: loop exit
PB: predicated region body
PF: predicated region fallthrough
CT: control target
= control target key end

     0   :  { %vm8_vm0 = vcmask 130048   ;;  %vm14_vm1 = vcmask 261248   ;;  %s42_s0 = inlined_call_operand.vmem [shape: f32[2,16], index: 0, kind: input, shape index: {}]   ;;  %s43_s1 = inlined_call_operand.vmem [shape: f32[1,32], index: 1, kind: output, shape index: {}]  }
   0x1   :  { %v5_v0 = vld [vmem:[%s42_s0] sm:$0x3]  ;;  %s25_s0 = smov 16  }
   0x2   :  { %6 = vst [vmem:[#allocation1] sm:$0x3] %v5_v0 }
   0x9   :  { %v11_v1 = vld [vmem:[#allocation1 + $0x1] sm:$0x1]   ;;  %v7_v2 = vld [vmem:[#allocation1] sm:$0x1]  }
   0xa   :  { %12 = vrot.lane.b32.xlu0 %v11_v1, %s25_s0  ;;  %9 = vst.msk [vmem:[#allocation0] sm:$0x1] %vm8_vm0, %v7_v2  }
  0x7c   :  { %v13_v3 = vpop.permute.xlu0 %12  }
  0x7d   :  { %15 = vst.msk [vmem:[#allocation0] sm:$0x1] %vm14_vm1, %v13_v3  }
  0x84   :  { %v20_v4 = vld [vmem:[#allocation0] sm:$0x1] }
  0x85   :  { %23 = vst [vmem:[%s43_s1] sm:$0x1] %v20_v4 }

// kernel: generator_forward.8
= control target key start
LH: loop header
LB: loop body
LE: loop exit
PB: predicated region body
PF: predicated region fallthrough
CT: control target
= control target key end

     0   :  { %s1091_s12 = smov 0   ;;  %s1093_s13 = smov 0   ;;  %s1308_s0 = inlined_call_operand.vmem [shape: bf16[2,128,192], index: 0, kind: input, shape index: {}]   ;;  %s1309_s1 = inlined_call_operand.vmem [shape: bf16[2,192,32], index: 1, kind: input, shape index: {}]   ;;  %s1310_s2 = inlined_call_operand.vmem [shape: bf16[2,128,32], index: 2, kind: output, shape index: {0}]   ;;  %s1311_s3 = inlined_call_operand.vmem [shape: f32[2,1,2,32], index: 3, kind: output, shape index: {1}]  }
   0x1   :  { %s1095_s14 = smov 0  }
   0x2 LB: > { %s26_s15 = sadd.s32 1, %s1064_s13  ;;  %p881_p0 = scmp.ge.s32.totalorder %s1068_s14, 1  ;;  %s1068_s14 = sphi %s1095_s14, %s14_s14   ;;  %s1064_s13 = sphi %s1093_s13, %s1313_s13   ;;  %s1060_s12 = sphi %s1091_s12, %s1312_s12  }
   0x3   : > { %p28_p1 = scmp.ge.s32.totalorder %s26_s15, 2  ;;  %p174_p2 = scmp.lt.s32.totalorder %s1068_s14, 3 }
   0x5   : > { %s1315_s15 = smov (%p28_p1, %s26_s15), 0  ;;  %p175_p3 = pnand %p881_p0, %p174_p2 }
   0x6   : > { %p220_p4 = scmp.lt.s32.totalorder (!%p175_p3), %s1060_s12, 1 }
   0x7   : > { %178 = sbr.rel (%p175_p3) target bundleno = 319 (0x13f), region = 28 }
   0xc   : > { %v1070_v0 = vmov 0   ;;  %s1317_s12 = smov (!%p220_p4, %s1060_s12), 1  ;;  %vm437_vm0 = vcmask 523264   ;;  %vm623_vm1 = vcmask 257024   ;;  %vm640_vm2 = vcmask 261120  }
   0xd   : > { %462 = vmatprep.subr.bf16.mxu0 %v1070_v0  ;;  %960 = vmatprep.subr.bf16.mxu1 %v1070_v0  ;;  %s984_s16 = smul.u32 96, %s1317_s12  ;;  %s942_s17 = sshll.u32 %s1317_s12, 7  ;;  %vm678_vm3 = vcmask 253952  }
   0xe   : > { %s1118_s20 = scalar_lea.vmem %s1308_s0, %s942_s17  ;;  %s943_s24 = sshll.u32 %s1317_s12, 6 }
   0xf   : > { %s1123_s23 = scalar_lea.vmem %s1309_s1, %s984_s16  ;;  %v1024_v5 = vld [vmem:[%s1118_s20 + $0x4] ss:$8 sps:$4 sm:$0xff]   ;;  %v1022_v15 = vld [vmem:[%s1118_s20] ss:$8 sps:$4 sm:$0xff]   ;;  %v1025_v17 = vld [vmem:[%s1118_s20 + $0x14] ss:$8 sps:$4 sm:$0xff]   ;;  %s1187_s27 = scalar_lea.vmem %s1310_s2, %s943_s24 }
  0x10   : > { %v1010_v1 = vld [vmem:[%s1123_s23 + $0x38] sm:$0xff]   ;;  %v1011_v2 = vld [vmem:[%s1123_s23 + $0x30] sm:$0xff]   ;;  %v1012_v3 = vld [vmem:[%s1123_s23 + $0x28] sm:$0xff]   ;;  %916 = vmatprep.mubr.msk.bf16.mxu0 %vm437_vm0, %v1024_v5  ;;  %s887_s28 = sshll.u32 %s1317_s12, 1 }
  0x11   : > { %463 = vmatpush1.bf16.msra.mxu0 %v1010_v1  ;;  %972 = vmatpush1.bf16.msra.mxu1 %v1010_v1  ;;  %v1013_v4 = vld [vmem:[%s1123_s23 + $0x20] sm:$0xff]   ;;  %v1014_v6 = vld [vmem:[%s1123_s23 + $0x18] sm:$0xff]   ;;  %v1015_v8 = vld [vmem:[%s1123_s23 + $0x10] sm:$0xff]   ;;  %s251_s4 = scalar_lea.vmem %s1311_s3, %s887_s28 }
  0x12   : > { %464 = vmatprep.subr.bf16.mxu0 %v1070_v0  ;;  %961 = vmatprep.subr.bf16.mxu1 %v1070_v0  ;;  %v1030_v7 = vld [vmem:[%s1118_s20 + $0x44] ss:$8 sps:$4 sm:$0xff]   ;;  %v1018_v11 = vld [vmem:[%s1123_s23 + $0x58] sm:$0xff]   ;;  %v1019_v12 = vld [vmem:[%s1123_s23 + $0x50] sm:$0xff]  }
  0x13   : > { %920 = vmatprep.mubr.msk.bf16.mxu1 %vm437_vm0, %v1030_v7  ;;  %v1016_v9 = vld [vmem:[%s1123_s23 + $0x8] sm:$0xff]   ;;  %v1017_v10 = vld [vmem:[%s1123_s23] sm:$0xff]   ;;  %v1034_v18 = vld [vmem:[%s1118_s20 + $0x54] ss:$8 sps:$4 sm:$0xff]  }
  0x14   : > { %v1020_v13 = vld [vmem:[%s1123_s23 + $0x48] sm:$0xff]   ;;  %v1021_v14 = vld [vmem:[%s1123_s23 + $0x40] sm:$0xff]   ;;  %v1027_v19 = vld [vmem:[%s1118_s20 + $0x10] ss:$8 sps:$4 sm:$0xff]  }
  0x15   : > { %465 = vmatpush1.bf16.msra.mxu0 %v1011_v2  ;;  %973 = vmatpush1.bf16.msra.mxu1 %v1011_v2  ;;  %v1028_v16 = vld [vmem:[%s1118_s20 + $0x40] ss:$8 sps:$4 sm:$0xff]   ;;  %v1036_v20 = vld [vmem:[%s1118_s20 + $0x50] ss:$8 sps:$4 sm:$0xff]   ;;  %v1031_v21 = vld [vmem:[%s1118_s20 + $0x24] ss:$8 sps:$4 sm:$0xff]  }
  0x16   : > { %466 = vmatprep.subr.bf16.mxu0 %v1070_v0  ;;  %962 = vmatprep.subr.bf16.mxu1 %v1070_v0  ;;  %v1040_v22 = vld [vmem:[%s1118_s20 + $0x64] ss:$8 sps:$4 sm:$0xff]   ;;  %v1033_v23 = vld [vmem:[%s1118_s20 + $0x20] ss:$8 sps:$4 sm:$0xff]   ;;  %v1037_v25 = vld [vmem:[%s1118_s20 + $0x34] ss:$8 sps:$4 sm:$0xff]  }
  0x17   : > { %v1042_v24 = vld [vmem:[%s1118_s20 + $0x60] ss:$8 sps:$4 sm:$0xff]   ;;  %v1043_v26 = vld [vmem:[%s1118_s20 + $0x74] ss:$8 sps:$4 sm:$0xff]   ;;  %v1039_v27 = vld [vmem:[%s1118_s20 + $0x30] ss:$8 sps:$4 sm:$0xff]  }
  0x18   : > { %v1045_v28 = vld [vmem:[%s1118_s20 + $0x70] ss:$8 sps:$4 sm:$0xff]  }
  0x19   : > { %467 = vmatpush1.bf16.msra.mxu0 %v1012_v3  ;;  %974 = vmatpush1.bf16.msra.mxu1 %v1012_v3 }
  0x1a   : > { %468 = vmatprep.subr.bf16.mxu0 %v1070_v0  ;;  %963 = vmatprep.subr.bf16.mxu1 %v1070_v0 }
  0x1d   : > { %469 = vmatpush1.bf16.msra.mxu0 %v1013_v4  ;;  %975 = vmatpush1.bf16.msra.mxu1 %v1013_v4 }
  0x1e   : > { %470 = vmatprep.subr.bf16.mxu0 %v1070_v0  ;;  %964 = vmatprep.subr.bf16.mxu1 %v1070_v0 }
  0x21   : > { %471 = vmatpush1.bf16.msra.mxu0 %v1014_v6  ;;  %976 = vmatpush1.bf16.msra.mxu1 %v1014_v6 }
  0x22   : > { %472 = vmatprep.subr.bf16.mxu0 %v1070_v0  ;;  %965 = vmatprep.subr.bf16.mxu1 %v1070_v0 }
  0x25   : > { %473 = vmatpush1.bf16.msra.mxu0 %v1015_v8  ;;  %977 = vmatpush1.bf16.msra.mxu1 %v1015_v8 }
  0x26   : > { %474 = vmatprep.subr.bf16.mxu0 %v1070_v0  ;;  %966 = vmatprep.subr.bf16.mxu1 %v1070_v0 }
  0x29   : > { %475 = vmatpush1.bf16.msra.mxu0 %v1016_v9  ;;  %978 = vmatpush1.bf16.msra.mxu1 %v1016_v9 }
  0x2a   : > { %476 = vmatprep.subr.bf16.mxu0 %v1070_v0  ;;  %967 = vmatprep.subr.bf16.mxu1 %v1070_v0 }
  0x2d   : > { %477 = vmatpush1.bf16.msra.mxu0 %v1017_v10  ;;  %979 = vmatpush1.bf16.msra.mxu1 %v1017_v10 }
  0x2e   : > { %486 = vmatprep.subr.bf16.mxu0 %v1070_v0  ;;  %968 = vmatprep.subr.bf16.mxu1 %v1070_v0 }
  0x31   : > { %487 = vmatpush2.bf16.msra.mxu0 %v1018_v11  ;;  %980 = vmatpush2.bf16.msra.mxu1 %v1018_v11 }
  0x32   : > { %488 = vmatprep.subr.bf16.mxu0 %v1070_v0  ;;  %969 = vmatprep.subr.bf16.mxu1 %v1070_v0 }
  0x35   : > { %489 = vmatpush2.bf16.msra.mxu0 %v1019_v12  ;;  %981 = vmatpush2.bf16.msra.mxu1 %v1019_v12 }
  0x36   : > { %490 = vmatprep.subr.bf16.mxu0 %v1070_v0  ;;  %970 = vmatprep.subr.bf16.mxu1 %v1070_v0 }
  0x39   : > { %491 = vmatpush2.bf16.msra.mxu0 %v1020_v13  ;;  %982 = vmatpush2.bf16.msra.mxu1 %v1020_v13 }
  0x3a   : > { %492 = vmatprep.subr.bf16.mxu0 %v1070_v0  ;;  %971 = vmatprep.subr.bf16.mxu1 %v1070_v0 }
  0x3d   : > { %493 = vmatpush2.bf16.msra.mxu0 %v1021_v14  ;;  %983 = vmatpush2.bf16.msra.mxu1 %v1021_v14 }
  0x40   : > { %495 = vmatmul.mubr.bf16.vlgmr.msra.gmra.mxu0 %v1022_v15  ;;  %527 = vmatmul.mubr.bf16.vlgmr.msra.gmra.mxu1 %v1028_v16 }
  0x41   : > { %917 = vmatprep.mubr.msk.bf16.mxu0 %vm437_vm0, %v1025_v17  ;;  %921 = vmatprep.mubr.msk.bf16.mxu1 %vm437_vm0, %v1034_v18 }
  0x48   : > { %503 = vmatmul.mubr.bf16.gmra.mxu0 %v1027_v19  ;;  %535 = vmatmul.mubr.bf16.gmra.mxu1 %v1036_v20 }
  0x49   : > { %918 = vmatprep.mubr.msk.bf16.mxu0 %vm437_vm0, %v1031_v21  ;;  %922 = vmatprep.mubr.msk.bf16.mxu1 %vm437_vm0, %v1040_v22 }
  0x50   : > { %511 = vmatmul.mubr.bf16.gmra.mxu0 %v1033_v23  ;;  %543 = vmatmul.mubr.bf16.gmra.mxu1 %v1042_v24 }
  0x51   : > { %919 = vmatprep.mubr.msk.bf16.mxu0 %vm437_vm0, %v1037_v25  ;;  %923 = vmatprep.mubr.msk.bf16.mxu1 %vm437_vm0, %v1043_v26 }
  0x58   : > { %519 = vmatmul.mubr.bf16.gmra.mxu0 %v1039_v27  ;;  %551 = vmatmul.mubr.bf16.gmra.mxu1 %v1045_v28 }
 0x100   : > { %v496_v29 = vpop.f32.mrf.mxu0  ;;  %v1189_v30 = vpop.f32.mrf.mxu1 }
 0x101   : > { %v944_v31 = vpack.c.bf16 %v496_v29, %v496_v29  ;;  %v952_v32 = vpack.c.bf16 %v1189_v30, %v1189_v30  ;;  %v680_v54 = vmul.f32 %v496_v29, %v496_v29  ;;  %v641_v57 = vsel %vm640_vm2, %v496_v29, 0.0 }
 0x102   : > { %v498_v33 = vpop.f32.mrf.mxu0  ;;  %v530_v34 = vpop.f32.mrf.mxu1 }
 0x103   : > { %624 = vst.msk [vmem:[%s1187_s27] sm:$0xf] %vm623_vm1, %v944_v31  ;;  %632 = vst.msk [vmem:[%s1187_s27 + $0x20] sm:$0xf] %vm623_vm1, %v952_v32  ;;  %v696_v4 = vsel %vm640_vm2, %v680_v54, 0.0  ;;  %v656_v54 = vsel %vm640_vm2, %v1189_v30, 0.0 }
 0x104   : > { %v499_v35 = vpop.f32.mrf.mxu0  ;;  %v1197_v36 = vpop.f32.mrf.mxu1 }
 0x105   : > { %v945_v37 = vpack.c.bf16 %v499_v35, %v499_v35  ;;  %v953_v38 = vpack.c.bf16 %v1197_v36, %v1197_v36  ;;  %v681_v49 = vmul.f32 %v499_v35, %v499_v35  ;;  %v642_v55 = vsel %vm640_vm2, %v499_v35, 0.0 }
 0x106   : > { %v501_v39 = vpop.f32.mrf.mxu0  ;;  %v533_v40 = vpop.f32.mrf.mxu1  ;;  %v643_v1 = vadd.f32 %v642_v55, %v641_v57  ;;  %v689_v55 = vmul.f32 %v1197_v36, %v1197_v36 }
 0x107   : > { %625 = vst.msk [vmem:[%s1187_s27 + $0x4] sm:$0xf] %vm623_vm1, %v945_v37  ;;  %633 = vst.msk [vmem:[%s1187_s27 + $0x24] sm:$0xf] %vm623_vm1, %v953_v38  ;;  %v697_v61 = vsel %vm640_vm2, %v681_v49, 0.0  ;;  %v688_v39 = vmul.f32 %v1189_v30, %v1189_v30 }
 0x108   : > { %v504_v41 = vpop.f32.mrf.mxu0  ;;  %v1205_v42 = vpop.f32.mrf.mxu1  ;;  %v698_v8 = vadd.f32 %v697_v61, %v696_v4  ;;  %v658_v61 = vsel %vm640_vm2, %v1197_v36, 0.0 }
 0x109   : > { %v946_v43 = vpack.c.bf16 %v504_v41, %v504_v41  ;;  %v954_v44 = vpack.c.bf16 %v1205_v42, %v1205_v42  ;;  %v682_v56 = vmul.f32 %v504_v41, %v504_v41  ;;  %v644_v62 = vsel %vm640_vm2, %v504_v41, 0.0 }
 0x10a   : > { %v506_v45 = vpop.f32.mrf.mxu0  ;;  %v538_v46 = vpop.f32.mrf.mxu1  ;;  %v645_v9 = vadd.f32 %v644_v62, %v643_v1  ;;  %v690_v62 = vmul.f32 %v1205_v42, %v1205_v42  ;;  %v660_v1 = vsel %vm640_vm2, %v1205_v42, 0.0 }
 0x10b   : > { %626 = vst.msk [vmem:[%s1187_s27 + $0x8] sm:$0xf] %vm623_vm1, %v946_v43  ;;  %634 = vst.msk [vmem:[%s1187_s27 + $0x28] sm:$0xf] %vm623_vm1, %v954_v44  ;;  %v699_v5 = vsel %vm640_vm2, %v682_v56, 0.0 }
 0x10c   : > { %v507_v47 = vpop.f32.mrf.mxu0  ;;  %v1213_v48 = vpop.f32.mrf.mxu1  ;;  %v700_v17 = vadd.f32 %v699_v5, %v698_v8  ;;  %v715_v5 = vsel %vm640_vm2, %v690_v62, 0.0 }
 0x10d   : > { %v947_v50 = vpack.c.bf16 %v507_v47, %v507_v47  ;;  %v955_v51 = vpack.c.bf16 %v1213_v48, %v1213_v48  ;;  %v683_v58 = vmul.f32 %v507_v47, %v507_v47  ;;  %v646_v6 = vsel %vm640_vm2, %v507_v47, 0.0 }
 0x10e   : > { %v509_v52 = vpop.f32.mrf.mxu0  ;;  %v541_v53 = vpop.f32.mrf.mxu1  ;;  %v647_v18 = vadd.f32 %v646_v6, %v645_v9  ;;  %v662_v36 = vsel %vm640_vm2, %v1213_v48, 0.0 }
 0x10f   : > { %627 = vst.msk [vmem:[%s1187_s27 + $0xc] sm:$0xf] %vm623_vm1, %v947_v50  ;;  %635 = vst.msk [vmem:[%s1187_s27 + $0x2c] sm:$0xf] %vm623_vm1, %v955_v51  ;;  %v701_v10 = vsel %vm640_vm2, %v683_v58, 0.0 }
 0x110   : > { %v512_v59 = vpop.f32.mrf.mxu0  ;;  %v1223_v60 = vpop.f32.mrf.mxu1  ;;  %v702_v23 = vadd.f32 %v701_v10, %v700_v17 }
 0x111   : > { %v948_v63 = vpack.c.bf16 %v512_v59, %v512_v59  ;;  %v956_v0 = vpack.c.bf16 %v1223_v60, %v1223_v60  ;;  %v684_v7 = vmul.f32 %v512_v59, %v512_v59  ;;  %v648_v13 = vsel %vm640_vm2, %v512_v59, 0.0 }
 0x112   : > { %v514_v2 = vpop.f32.mrf.mxu0  ;;  %v546_v3 = vpop.f32.mrf.mxu1  ;;  %v649_v24 = vadd.f32 %v648_v13, %v647_v18  ;;  %v711_v59 = vsel %vm640_vm2, %v688_v39, 0.0  ;;  %v692_v6 = vmul.f32 %v1223_v60, %v1223_v60  ;;  %v664_v42 = vsel %vm640_vm2, %v1223_v60, 0.0 }
 0x113   : > { %628 = vst.msk [vmem:[%s1187_s27 + $0x10] sm:$0xf] %vm623_vm1, %v948_v63  ;;  %636 = vst.msk [vmem:[%s1187_s27 + $0x30] sm:$0xf] %vm623_vm1, %v956_v0  ;;  %v703_v21 = vsel %vm640_vm2, %v684_v7, 0.0  ;;  %v713_v0 = vsel %vm640_vm2, %v689_v55, 0.0  ;;  %v691_v2 = vmul.f32 %v1213_v48, %v1213_v48 }
 0x114   : > { %v515_v11 = vpop.f32.mrf.mxu0  ;;  %v1237_v12 = vpop.f32.mrf.mxu1  ;;  %v704_v33 = vadd.f32 %v703_v21, %v702_v23 }
 0x115   : > { %v949_v14 = vpack.c.bf16 %v515_v11, %v515_v11  ;;  %v685_v15 = vmul.f32 %v515_v11, %v515_v11  ;;  %v957_v16 = vpack.c.bf16 %v1237_v12, %v1237_v12  ;;  %v650_v22 = vsel %vm640_vm2, %v515_v11, 0.0 }
 0x116   : > { %v517_v19 = vpop.f32.mrf.mxu0  ;;  %v549_v20 = vpop.f32.mrf.mxu1  ;;  %v651_v34 = vadd.f32 %v650_v22, %v649_v24  ;;  %v717_v9 = vsel %vm640_vm2, %v691_v2, 0.0  ;;  %v693_v10 = vmul.f32 %v1237_v12, %v1237_v12  ;;  %v666_v48 = vsel %vm640_vm2, %v1237_v12, 0.0 }
 0x117   : > { %629 = vst.msk [vmem:[%s1187_s27 + $0x14] sm:$0xf] %vm623_vm1, %v949_v14  ;;  %637 = vst.msk [vmem:[%s1187_s27 + $0x34] sm:$0xf] %vm623_vm1, %v957_v16  ;;  %v705_v25 = vsel %vm640_vm2, %v685_v15, 0.0  ;;  %v719_v14 = vsel %vm640_vm2, %v692_v6, 0.0 }
 0x118   : > { %v520_v26 = vpop.f32.mrf.mxu0  ;;  %v552_v27 = vpop.f32.mrf.mxu1  ;;  %v706_v40 = vadd.f32 %v705_v25, %v704_v33  ;;  %v721_v18 = vsel %vm640_vm2, %v693_v10, 0.0 }
 0x119   : > { %v950_v28 = vpack.c.bf16 %v520_v26, %v520_v26  ;;  %v652_v29 = vsel %vm640_vm2, %v520_v26, 0.0  ;;  %v686_v31 = vmul.f32 %v520_v26, %v520_v26  ;;  %v958_v32 = vpack.c.bf16 %v552_v27, %v552_v27 }
 0x11a   : > { %v522_v35 = vpop.f32.mrf.mxu0  ;;  %v554_v37 = vpop.f32.mrf.mxu1  ;;  %v653_v41 = vadd.f32 %v652_v29, %v651_v34  ;;  %v694_v15 = vmul.f32 %v552_v27, %v552_v27  ;;  %v668_v19 = vsel %vm640_vm2, %v552_v27, 0.0 }
 0x11b   : > { %630 = vst.msk [vmem:[%s1187_s27 + $0x18] sm:$0xf] %vm623_vm1, %v950_v28  ;;  %v707_v38 = vsel %vm640_vm2, %v686_v31, 0.0  ;;  %638 = vst.msk [vmem:[%s1187_s27 + $0x38] sm:$0xf] %vm623_vm1, %v958_v32 }
 0x11c   : > { %v523_v43 = vpop.f32.mrf.mxu0  ;;  %v555_v44 = vpop.f32.mrf.mxu1  ;;  %v708_v50 = vadd.f32 %v707_v38, %v706_v40  ;;  %v723_v22 = vsel %vm640_vm2, %v694_v15, 0.0 }
 0x11d   : > { %v951_v45 = vpack.c.bf16 %v523_v43, %v523_v43  ;;  %v654_v46 = vsel %vm640_vm2, %v523_v43, 0.0  ;;  %v687_v47 = vmul.f32 %v523_v43, %v523_v43  ;;  %v959_v49 = vpack.c.bf16 %v555_v44, %v555_v44 }
 0x11e   : > { %v655_v51 = vadd.f32 %v654_v46, %v653_v41  ;;  %v525_v52 = vpop.f32.mrf.mxu0  ;;  %v557_v53 = vpop.f32.mrf.mxu1  ;;  %v695_v20 = vmul.f32 %v555_v44, %v555_v44  ;;  %v670_v23 = vsel %vm640_vm2, %v555_v44, 0.0 }
 0x11f   : > { %631 = vst.msk [vmem:[%s1187_s27 + $0x1c] sm:$0xf] %vm623_vm1, %v951_v45  ;;  %v709_v56 = vsel %vm640_vm2, %v687_v47, 0.0  ;;  %639 = vst.msk [vmem:[%s1187_s27 + $0x3c] sm:$0xf] %vm623_vm1, %v959_v49 }
 0x120   : > { %v657_v57 = vadd.f32 %v656_v54, %v655_v51  ;;  %v710_v58 = vadd.f32 %v709_v56, %v708_v50  ;;  %v725_v26 = vsel %vm640_vm2, %v695_v20, 0.0 }
 0x122   : > { %v659_v30 = vadd.f32 %v658_v61, %v657_v57  ;;  %v712_v63 = vadd.f32 %v711_v59, %v710_v58 }
 0x124   : > { %v714_v3 = vadd.f32 %v713_v0, %v712_v63  ;;  %v661_v4 = vadd.f32 %v660_v1, %v659_v30 }
 0x126   : > { %v663_v7 = vadd.f32 %v662_v36, %v661_v4  ;;  %v716_v8 = vadd.f32 %v715_v5, %v714_v3 }
 0x128   : > { %v665_v11 = vadd.f32 %v664_v42, %v663_v7  ;;  %v718_v13 = vadd.f32 %v717_v9, %v716_v8 }
 0x12a   : > { %v667_v16 = vadd.f32 %v666_v48, %v665_v11  ;;  %v720_v17 = vadd.f32 %v719_v14, %v718_v13 }
 0x12c   : > { %v722_v60 = vadd.f32 %v721_v18, %v720_v17  ;;  %v669_v21 = vadd.f32 %v668_v19, %v667_v16 }
 0x12e   : > { %v724_v24 = vadd.f32 %v723_v22, %v722_v60  ;;  %v671_v25 = vadd.f32 %v670_v23, %v669_v21 }
 0x130   : > { %v672_v12 = vrot.slane %v671_v25, 4  ;;  %v726_v28 = vadd.f32 %v725_v26, %v724_v24 }
 0x132   : > { %v673_v29 = vadd.f32 %v672_v12, %v671_v25  ;;  %v727_v31 = vrot.slane %v726_v28, 4 }
 0x134   : > { %v674_v32 = vrot.slane %v673_v29, 2  ;;  %v728_v33 = vadd.f32 %v727_v31, %v726_v28 }
 0x136   : > { %v675_v34 = vadd.f32 %v674_v32, %v673_v29  ;;  %v729_v27 = vrot.slane %v728_v33, 2 }
 0x138   : > { %v676_v35 = vrot.slane %v675_v34, 1  ;;  %v730_v37 = vadd.f32 %v729_v27, %v728_v33 }
 0x13a   : > { %v677_v38 = vadd.f32 %v676_v35, %v675_v34  ;;  %v731_v39 = vrot.slane %v730_v37, 1 }
 0x13c   : > { %679 = vst.msk [vmem:[%s251_s4] sm:$0x1] %vm678_vm3, %v677_v38  ;;  %v732_v40 = vadd.f32 %v731_v39, %v730_v37 }
 0x13e   : > { %733 = vst.msk [vmem:[%s251_s4 + $0x1] sm:$0x1] %vm678_vm3, %v732_v40 }
 0x13f PF: > { %s14_s14 = sadd.s32 1, %s1068_s14   ;;  %s1312_s12 = smov %s1064_s13 }
 0x140   : > { %p11_p5 = scmp.ge.s32.totalorder %s14_s14, 4   ;;  %s1313_s13 = smov %s1315_s15 }
 0x142   :  { %13 = sbr.rel (!%p11_p5) target bundleno = 2 (0x2), region = 73 }

// kernel: generator_forward.9
= control target key start
LH: loop header
LB: loop body
LE: loop exit
PB: predicated region body
PF: predicated region fallthrough
CT: control target
= control target key end

     0   :  { %vm316_vm0 = vcmask 257024   ;;  %s768_s0 = inlined_call_operand.vmem [shape: bf16[256,32], index: 0, kind: input, shape index: {}]   ;;  %s769_s1 = inlined_call_operand.vmem [shape: f32[1,32], index: 1, kind: input, shape index: {}]   ;;  %s770_s2 = inlined_call_operand.vmem [shape: f32[1,32], index: 2, kind: input, shape index: {}]   ;;  %s771_s3 = inlined_call_operand.vmem [shape: bf16[256,32], index: 3, kind: output, shape index: {}]  }
   0x1   :  { %v420_v0 = vld [vmem:[%s768_s0] sm:$0xff]   ;;  %v483_v4 = vld [vmem:[%s768_s0 + $0x8] sm:$0xff]   ;;  %v484_v5 = vld [vmem:[%s768_s0 + $0x10] sm:$0xff]  }
   0x2   :  { %v524_v1 = vld [vmem:[%s769_s1] ss:$0 sm:$0xff]  ;;  %v421_v2 = vunpack.c.l.bf16 %v420_v0  ;;  %v422_v3 = vunpack.c.h.bf16 %v420_v0  ;;  %v485_v6 = vld [vmem:[%s768_s0 + $0x18] sm:$0xff]   ;;  %v425_v8 = vunpack.c.l.bf16 %v483_v4  ;;  %v426_v9 = vunpack.c.h.bf16 %v483_v4  ;;  %v487_v41 = vld [vmem:[%s768_s0 + $0x28] sm:$0xff]  }
   0x3   :  { %v538_v7 = vld [vmem:[%s770_s2] ss:$0 sm:$0xff]  ;;  %v429_v10 = vunpack.c.l.bf16 %v484_v5  ;;  %v430_v11 = vunpack.c.h.bf16 %v484_v5  ;;  %v433_v14 = vunpack.c.l.bf16 %v485_v6  ;;  %v434_v15 = vunpack.c.h.bf16 %v485_v6  ;;  %v488_v42 = vld [vmem:[%s768_s0 + $0x30] sm:$0xff]   ;;  %v489_v47 = vld [vmem:[%s768_s0 + $0x38] sm:$0xff]  }
   0x4   :  { %v85_v12 = vmul.f32 %v421_v2, %v524_v1  ;;  %v86_v13 = vmul.f32 %v422_v3, %v524_v1  ;;  %v87_v16 = vmul.f32 %v425_v8, %v524_v1  ;;  %v88_v17 = vmul.f32 %v426_v9, %v524_v1  ;;  %v486_v36 = vld [vmem:[%s768_s0 + $0x20] sm:$0xff]  }
   0x5   :  { %v89_v18 = vmul.f32 %v429_v10, %v524_v1  ;;  %v90_v19 = vmul.f32 %v430_v11, %v524_v1  ;;  %v91_v22 = vmul.f32 %v433_v14, %v524_v1  ;;  %v92_v23 = vmul.f32 %v434_v15, %v524_v1 }
   0x6   :  { %v124_v20 = vadd.f32 %v538_v7, %v85_v12  ;;  %v125_v21 = vadd.f32 %v538_v7, %v86_v13  ;;  %v126_v24 = vadd.f32 %v538_v7, %v87_v16  ;;  %v127_v25 = vadd.f32 %v538_v7, %v88_v17 }
   0x7   :  { %v128_v26 = vadd.f32 %v538_v7, %v89_v18  ;;  %v129_v27 = vadd.f32 %v538_v7, %v90_v19  ;;  %v130_v30 = vadd.f32 %v538_v7, %v91_v22  ;;  %v131_v31 = vadd.f32 %v538_v7, %v92_v23  ;;  %v490_v18 = vld [vmem:[%s768_s0 + $0x40] sm:$0xff]   ;;  %v491_v23 = vld [vmem:[%s768_s0 + $0x48] sm:$0xff]  }
   0x8   :  { %v156_v28 = vmax.f32 %v124_v20, 0.0  ;;  %v157_v29 = vmax.f32 %v125_v21, 0.0  ;;  %v158_v32 = vmax.f32 %v126_v24, 0.0  ;;  %v159_v33 = vmax.f32 %v127_v25, 0.0  ;;  %v492_v24 = vld [vmem:[%s768_s0 + $0x50] sm:$0xff]  }
   0x9   :  { %v160_v34 = vmax.f32 %v128_v26, 0.0  ;;  %v161_v35 = vmax.f32 %v129_v27, 0.0  ;;  %v162_v39 = vmax.f32 %v130_v30, 0.0  ;;  %v163_v40 = vmax.f32 %v131_v31, 0.0 }
   0xa   :  { %v387_v37 = vpack.c.bf16 %v156_v28, %v156_v28  ;;  %v388_v38 = vpack.c.bf16 %v157_v29, %v157_v29  ;;  %v389_v43 = vpack.c.bf16 %v158_v32, %v158_v32  ;;  %v390_v44 = vpack.c.bf16 %v159_v33, %v159_v33  ;;  %v493_v29 = vld [vmem:[%s768_s0 + $0x58] sm:$0xff]  }
   0xb   :  { %v391_v45 = vpack.c.bf16 %v160_v34, %v160_v34  ;;  %v392_v46 = vpack.c.bf16 %v161_v35, %v161_v35  ;;  %v393_v48 = vpack.c.bf16 %v162_v39, %v162_v39  ;;  %v394_v49 = vpack.c.bf16 %v163_v40, %v163_v40 }
   0xc   :  { %317 = vst.msk [vmem:[%s771_s3] sm:$0xf] %vm316_vm0, %v387_v37  ;;  %318 = vst.msk [vmem:[%s771_s3 + $0x4] sm:$0xf] %vm316_vm0, %v388_v38  ;;  %v437_v50 = vunpack.c.l.bf16 %v486_v36  ;;  %v438_v51 = vunpack.c.h.bf16 %v486_v36  ;;  %v441_v52 = vunpack.c.l.bf16 %v487_v41  ;;  %v442_v53 = vunpack.c.h.bf16 %v487_v41 }
   0xd   :  { %319 = vst.msk [vmem:[%s771_s3 + $0x8] sm:$0xf] %vm316_vm0, %v389_v43  ;;  %320 = vst.msk [vmem:[%s771_s3 + $0xc] sm:$0xf] %vm316_vm0, %v390_v44  ;;  %v445_v54 = vunpack.c.l.bf16 %v488_v42  ;;  %v446_v55 = vunpack.c.h.bf16 %v488_v42  ;;  %v449_v58 = vunpack.c.l.bf16 %v489_v47  ;;  %v450_v59 = vunpack.c.h.bf16 %v489_v47 }
   0xe   :  { %321 = vst.msk [vmem:[%s771_s3 + $0x10] sm:$0xf] %vm316_vm0, %v391_v45  ;;  %322 = vst.msk [vmem:[%s771_s3 + $0x14] sm:$0xf] %vm316_vm0, %v392_v46  ;;  %v93_v56 = vmul.f32 %v437_v50, %v524_v1  ;;  %v94_v57 = vmul.f32 %v438_v51, %v524_v1  ;;  %v95_v60 = vmul.f32 %v441_v52, %v524_v1  ;;  %v453_v32 = vunpack.c.l.bf16 %v490_v18 }
   0xf   :  { %323 = vst.msk [vmem:[%s771_s3 + $0x18] sm:$0xf] %vm316_vm0, %v393_v48  ;;  %324 = vst.msk [vmem:[%s771_s3 + $0x1c] sm:$0xf] %vm316_vm0, %v394_v49  ;;  %v96_v61 = vmul.f32 %v442_v53, %v524_v1  ;;  %v97_v62 = vmul.f32 %v445_v54, %v524_v1  ;;  %v98_v63 = vmul.f32 %v446_v55, %v524_v1  ;;  %v454_v33 = vunpack.c.h.bf16 %v490_v18 }
  0x10   :  { %v132_v0 = vadd.f32 %v538_v7, %v93_v56  ;;  %v133_v2 = vadd.f32 %v538_v7, %v94_v57  ;;  %v99_v3 = vmul.f32 %v449_v58, %v524_v1  ;;  %v100_v4 = vmul.f32 %v450_v59, %v524_v1 }
  0x11   :  { %v134_v5 = vadd.f32 %v538_v7, %v95_v60  ;;  %v135_v6 = vadd.f32 %v538_v7, %v96_v61  ;;  %v136_v8 = vadd.f32 %v538_v7, %v97_v62  ;;  %v137_v9 = vadd.f32 %v538_v7, %v98_v63  ;;  %v494_v62 = vld [vmem:[%s768_s0 + $0x60] sm:$0xff]  }
  0x12   :  { %v164_v10 = vmax.f32 %v132_v0, 0.0  ;;  %v165_v11 = vmax.f32 %v133_v2, 0.0  ;;  %v138_v12 = vadd.f32 %v538_v7, %v99_v3  ;;  %v139_v13 = vadd.f32 %v538_v7, %v100_v4  ;;  %v495_v4 = vld [vmem:[%s768_s0 + $0x68] sm:$0xff]  }
  0x13   :  { %v166_v14 = vmax.f32 %v134_v5, 0.0  ;;  %v167_v15 = vmax.f32 %v135_v6, 0.0  ;;  %v168_v16 = vmax.f32 %v136_v8, 0.0  ;;  %v169_v17 = vmax.f32 %v137_v9, 0.0  ;;  %v496_v5 = vld [vmem:[%s768_s0 + $0x70] sm:$0xff]  }
  0x14   :  { %v395_v19 = vpack.c.bf16 %v164_v10, %v164_v10  ;;  %v396_v20 = vpack.c.bf16 %v165_v11, %v165_v11  ;;  %v170_v21 = vmax.f32 %v138_v12, 0.0  ;;  %v171_v22 = vmax.f32 %v139_v13, 0.0  ;;  %v497_v11 = vld [vmem:[%s768_s0 + $0x78] sm:$0xff]  }
  0x15   :  { %v397_v25 = vpack.c.bf16 %v166_v14, %v166_v14  ;;  %v398_v26 = vpack.c.bf16 %v167_v15, %v167_v15  ;;  %v399_v27 = vpack.c.bf16 %v168_v16, %v168_v16  ;;  %v400_v28 = vpack.c.bf16 %v169_v17, %v169_v17 }
  0x16   :  { %325 = vst.msk [vmem:[%s771_s3 + $0x20] sm:$0xf] %vm316_vm0, %v395_v19  ;;  %326 = vst.msk [vmem:[%s771_s3 + $0x24] sm:$0xf] %vm316_vm0, %v396_v20  ;;  %v401_v30 = vpack.c.bf16 %v170_v21, %v170_v21  ;;  %v402_v31 = vpack.c.bf16 %v171_v22, %v171_v22  ;;  %v457_v34 = vunpack.c.l.bf16 %v491_v23  ;;  %v458_v35 = vunpack.c.h.bf16 %v491_v23 }
  0x17   :  { %327 = vst.msk [vmem:[%s771_s3 + $0x28] sm:$0xf] %vm316_vm0, %v397_v25  ;;  %328 = vst.msk [vmem:[%s771_s3 + $0x2c] sm:$0xf] %vm316_vm0, %v398_v26  ;;  %v461_v36 = vunpack.c.l.bf16 %v492_v24  ;;  %v462_v37 = vunpack.c.h.bf16 %v492_v24  ;;  %v101_v38 = vmul.f32 %v453_v32, %v524_v1  ;;  %v102_v39 = vmul.f32 %v454_v33, %v524_v1 }
  0x18   :  { %329 = vst.msk [vmem:[%s771_s3 + $0x30] sm:$0xf] %vm316_vm0, %v399_v27  ;;  %330 = vst.msk [vmem:[%s771_s3 + $0x34] sm:$0xf] %vm316_vm0, %v400_v28  ;;  %v465_v40 = vunpack.c.l.bf16 %v493_v29  ;;  %v466_v41 = vunpack.c.h.bf16 %v493_v29  ;;  %v103_v42 = vmul.f32 %v457_v34, %v524_v1  ;;  %v104_v43 = vmul.f32 %v458_v35, %v524_v1 }
  0x19   :  { %331 = vst.msk [vmem:[%s771_s3 + $0x38] sm:$0xf] %vm316_vm0, %v401_v30  ;;  %332 = vst.msk [vmem:[%s771_s3 + $0x3c] sm:$0xf] %vm316_vm0, %v402_v31  ;;  %v105_v44 = vmul.f32 %v461_v36, %v524_v1  ;;  %v106_v45 = vmul.f32 %v462_v37, %v524_v1  ;;  %v140_v46 = vadd.f32 %v538_v7, %v101_v38  ;;  %v469_v14 = vunpack.c.l.bf16 %v494_v62 }
  0x1a   :  { %v141_v47 = vadd.f32 %v538_v7, %v102_v39  ;;  %v107_v48 = vmul.f32 %v465_v40, %v524_v1  ;;  %v108_v49 = vmul.f32 %v466_v41, %v524_v1  ;;  %v142_v50 = vadd.f32 %v538_v7, %v103_v42 }
  0x1b   :  { %v143_v51 = vadd.f32 %v538_v7, %v104_v43  ;;  %v144_v52 = vadd.f32 %v538_v7, %v105_v44  ;;  %v145_v53 = vadd.f32 %v538_v7, %v106_v45  ;;  %v172_v54 = vmax.f32 %v140_v46, 0.0 }
  0x1c   :  { %v173_v55 = vmax.f32 %v141_v47, 0.0  ;;  %v146_v56 = vadd.f32 %v538_v7, %v107_v48  ;;  %v147_v57 = vadd.f32 %v538_v7, %v108_v49  ;;  %v174_v58 = vmax.f32 %v142_v50, 0.0 }
  0x1d   :  { %v175_v59 = vmax.f32 %v143_v51, 0.0  ;;  %v176_v60 = vmax.f32 %v144_v52, 0.0  ;;  %v177_v61 = vmax.f32 %v145_v53, 0.0  ;;  %v403_v63 = vpack.c.bf16 %v172_v54, %v172_v54 }
  0x1e   :  { %v404_v0 = vpack.c.bf16 %v173_v55, %v173_v55  ;;  %v178_v2 = vmax.f32 %v146_v56, 0.0  ;;  %v179_v3 = vmax.f32 %v147_v57, 0.0  ;;  %v405_v6 = vpack.c.bf16 %v174_v58, %v174_v58 }
  0x1f   :  { %v406_v8 = vpack.c.bf16 %v175_v59, %v175_v59  ;;  %v407_v9 = vpack.c.bf16 %v176_v60, %v176_v60  ;;  %v408_v10 = vpack.c.bf16 %v177_v61, %v177_v61  ;;  %333 = vst.msk [vmem:[%s771_s3 + $0x40] sm:$0xf] %vm316_vm0, %v403_v63  ;;  %v470_v15 = vunpack.c.h.bf16 %v494_v62 }
  0x20   :  { %334 = vst.msk [vmem:[%s771_s3 + $0x44] sm:$0xf] %vm316_vm0, %v404_v0  ;;  %v409_v12 = vpack.c.bf16 %v178_v2, %v178_v2  ;;  %v410_v13 = vpack.c.bf16 %v179_v3, %v179_v3  ;;  %335 = vst.msk [vmem:[%s771_s3 + $0x48] sm:$0xf] %vm316_vm0, %v405_v6  ;;  %v473_v16 = vunpack.c.l.bf16 %v495_v4  ;;  %v474_v17 = vunpack.c.h.bf16 %v495_v4 }
  0x21   :  { %336 = vst.msk [vmem:[%s771_s3 + $0x4c] sm:$0xf] %vm316_vm0, %v406_v8  ;;  %337 = vst.msk [vmem:[%s771_s3 + $0x50] sm:$0xf] %vm316_vm0, %v407_v9  ;;  %v477_v18 = vunpack.c.l.bf16 %v496_v5  ;;  %v478_v19 = vunpack.c.h.bf16 %v496_v5  ;;  %v109_v20 = vmul.f32 %v469_v14, %v524_v1  ;;  %v110_v21 = vmul.f32 %v470_v15, %v524_v1 }
  0x22   :  { %338 = vst.msk [vmem:[%s771_s3 + $0x54] sm:$0xf] %vm316_vm0, %v408_v10  ;;  %339 = vst.msk [vmem:[%s771_s3 + $0x58] sm:$0xf] %vm316_vm0, %v409_v12  ;;  %v481_v22 = vunpack.c.l.bf16 %v497_v11  ;;  %v482_v23 = vunpack.c.h.bf16 %v497_v11  ;;  %v111_v24 = vmul.f32 %v473_v16, %v524_v1  ;;  %v112_v25 = vmul.f32 %v474_v17, %v524_v1 }
  0x23   :  { %340 = vst.msk [vmem:[%s771_s3 + $0x5c] sm:$0xf] %vm316_vm0, %v410_v13  ;;  %v113_v26 = vmul.f32 %v477_v18, %v524_v1  ;;  %v114_v27 = vmul.f32 %v478_v19, %v524_v1  ;;  %v148_v28 = vadd.f32 %v538_v7, %v109_v20  ;;  %v149_v29 = vadd.f32 %v538_v7, %v110_v21 }
  0x24   :  { %v115_v30 = vmul.f32 %v481_v22, %v524_v1  ;;  %v116_v31 = vmul.f32 %v482_v23, %v524_v1  ;;  %v150_v32 = vadd.f32 %v538_v7, %v111_v24  ;;  %v151_v33 = vadd.f32 %v538_v7, %v112_v25 }
  0x25   :  { %v152_v34 = vadd.f32 %v538_v7, %v113_v26  ;;  %v153_v35 = vadd.f32 %v538_v7, %v114_v27  ;;  %v180_v36 = vmax.f32 %v148_v28, 0.0  ;;  %v181_v37 = vmax.f32 %v149_v29, 0.0 }
  0x26   :  { %v154_v38 = vadd.f32 %v538_v7, %v115_v30  ;;  %v155_v39 = vadd.f32 %v538_v7, %v116_v31  ;;  %v182_v40 = vmax.f32 %v150_v32, 0.0  ;;  %v183_v41 = vmax.f32 %v151_v33, 0.0 }
  0x27   :  { %v184_v42 = vmax.f32 %v152_v34, 0.0  ;;  %v185_v43 = vmax.f32 %v153_v35, 0.0  ;;  %v411_v44 = vpack.c.bf16 %v180_v36, %v180_v36  ;;  %v412_v1 = vpack.c.bf16 %v181_v37, %v181_v37 }
  0x28   :  { %v186_v45 = vmax.f32 %v154_v38, 0.0  ;;  %v187_v46 = vmax.f32 %v155_v39, 0.0  ;;  %v413_v47 = vpack.c.bf16 %v182_v40, %v182_v40  ;;  %v414_v48 = vpack.c.bf16 %v183_v41, %v183_v41 }
  0x29   :  { %v415_v49 = vpack.c.bf16 %v184_v42, %v184_v42  ;;  %v416_v50 = vpack.c.bf16 %v185_v43, %v185_v43  ;;  %341 = vst.msk [vmem:[%s771_s3 + $0x60] sm:$0xf] %vm316_vm0, %v411_v44  ;;  %342 = vst.msk [vmem:[%s771_s3 + $0x64] sm:$0xf] %vm316_vm0, %v412_v1 }
  0x2a   :  { %v417_v7 = vpack.c.bf16 %v186_v45, %v186_v45  ;;  %v418_v51 = vpack.c.bf16 %v187_v46, %v187_v46  ;;  %343 = vst.msk [vmem:[%s771_s3 + $0x68] sm:$0xf] %vm316_vm0, %v413_v47  ;;  %344 = vst.msk [vmem:[%s771_s3 + $0x6c] sm:$0xf] %vm316_vm0, %v414_v48 }
  0x2b   :  { %345 = vst.msk [vmem:[%s771_s3 + $0x70] sm:$0xf] %vm316_vm0, %v415_v49  ;;  %346 = vst.msk [vmem:[%s771_s3 + $0x74] sm:$0xf] %vm316_vm0, %v416_v50 }
  0x2c   :  { %347 = vst.msk [vmem:[%s771_s3 + $0x78] sm:$0xf] %vm316_vm0, %v417_v7  ;;  %348 = vst.msk [vmem:[%s771_s3 + $0x7c] sm:$0xf] %vm316_vm0, %v418_v51 }

// kernel: generator_forward.10
= control target key start
LH: loop header
LB: loop body
LE: loop exit
PB: predicated region body
PF: predicated region fallthrough
CT: control target
= control target key end

     0   :  { %s2149_s12 = smov 0   ;;  %s2151_s13 = smov 0   ;;  %s2745_s0 = inlined_call_operand.vmem [shape: bf16[2,512,96], index: 0, kind: input, shape index: {}]   ;;  %s2746_s1 = inlined_call_operand.vmem [shape: bf16[2,96,16], index: 1, kind: input, shape index: {}]   ;;  %s2747_s2 = inlined_call_operand.vmem [shape: bf16[2,512,16], index: 2, kind: output, shape index: {0}]   ;;  %s2748_s3 = inlined_call_operand.vmem [shape: f32[2,1,2,16], index: 3, kind: output, shape index: {1}]  }
   0x1   :  { %s2153_s14 = smov 0  }
   0x2 LB: > { %s26_s15 = sadd.s32 1, %s2123_s13  ;;  %p1707_p0 = scmp.ge.s32.totalorder %s2127_s14, 1  ;;  %s2127_s14 = sphi %s2153_s14, %s14_s14   ;;  %s2123_s13 = sphi %s2151_s13, %s2750_s13   ;;  %s2119_s12 = sphi %s2149_s12, %s2749_s12  }
   0x3   : > { %p28_p1 = scmp.ge.s32.totalorder %s26_s15, 2  ;;  %p173_p2 = scmp.lt.s32.totalorder %s2127_s14, 3 }
   0x5   : > { %s2752_s15 = smov (%p28_p1, %s26_s15), 0  ;;  %p174_p3 = pnand %p1707_p0, %p173_p2 }
   0x6   : > { %p218_p4 = scmp.lt.s32.totalorder (!%p174_p3), %s2119_s12, 1 }
   0x7   : > { %177 = sbr.rel (%p174_p3) target bundleno = 382 (0x17e), region = 28 }
   0xc   : > { %s2754_s12 = smov (!%p218_p4, %s2119_s12), 1  ;;  %vm522_vm0 = vcmask 785408   ;;  %vm1164_vm1 = vcmask 125952   ;;  %vm1229_vm2 = vcmask 130048   ;;  %vm1363_vm3 = vcmask 122880  }
   0xd   : > { %s1850_s16 = sshll.u32 %s2754_s12, 8  ;;  %s2042_s17 = smul.u32 48, %s2754_s12 }
   0xe   : > { %s2176_s20 = scalar_lea.vmem %s2745_s0, %s1850_s16  ;;  %s2250_s26 = scalar_lea.vmem %s2747_s2, %s1850_s16 }
   0xf   : > { %s231_s23 = scalar_lea.vmem %s2746_s1, %s2042_s17  ;;  %v2073_v0 = vld [vmem:[%s2176_s20] sm:$0xff]   ;;  %v2074_v7 = vld [vmem:[%s2176_s20 + $0x8] sm:$0xff]   ;;  %v2075_v8 = vld [vmem:[%s2176_s20 + $0x10] sm:$0xff]   ;;  %s1713_s27 = sshll.u32 %s2754_s12, 1 }
  0x10   : > { %v2067_v1 = vld [vmem:[%s231_s23 + $0x28] sm:$0xff]   ;;  %v2068_v2 = vld [vmem:[%s231_s23 + $0x20] sm:$0xff]   ;;  %1966 = vmatprep.mubr.msk.bf16.mxu0 %vm522_vm0, %v2073_v0  ;;  %v2069_v3 = vld [vmem:[%s231_s23 + $0x18] sm:$0xff]   ;;  %s248_s30 = scalar_lea.vmem %s2748_s3, %s1713_s27 }
  0x11   : > { %1954 = vmatprep.subr.bf16.mxu0 %v2067_v1  ;;  %2030 = vmatprep.subr.bf16.mxu1 %v2067_v1  ;;  %v2070_v4 = vld [vmem:[%s231_s23 + $0x10] sm:$0xff]   ;;  %v2071_v5 = vld [vmem:[%s231_s23 + $0x8] sm:$0xff]   ;;  %v2072_v6 = vld [vmem:[%s231_s23] sm:$0xff]  }
  0x12   : > { %1955 = vmatpush3.bf16.msra.mxu0 %v2067_v1  ;;  %2036 = vmatpush3.bf16.msra.mxu1 %v2067_v1  ;;  %v2089_v9 = vld [vmem:[%s2176_s20 + $0x80] sm:$0xff]   ;;  %v2090_v10 = vld [vmem:[%s2176_s20 + $0x88] sm:$0xff]   ;;  %v2091_v11 = vld [vmem:[%s2176_s20 + $0x90] sm:$0xff]  }
  0x13   : > { %1956 = vmatprep.subr.bf16.mxu0 %v2068_v2  ;;  %2031 = vmatprep.subr.bf16.mxu1 %v2068_v2  ;;  %v2076_v12 = vld [vmem:[%s2176_s20 + $0x18] sm:$0xff]   ;;  %v2077_v13 = vld [vmem:[%s2176_s20 + $0x20] sm:$0xff]   ;;  %v2078_v16 = vld [vmem:[%s2176_s20 + $0x28] sm:$0xff]  }
  0x14   : > { %1998 = vmatprep.mubr.msk.bf16.mxu1 %vm522_vm0, %v2089_v9  ;;  %v2092_v14 = vld [vmem:[%s2176_s20 + $0x98] sm:$0xff]   ;;  %v2093_v15 = vld [vmem:[%s2176_s20 + $0xa0] sm:$0xff]   ;;  %v2094_v17 = vld [vmem:[%s2176_s20 + $0xa8] sm:$0xff]  }
  0x15   : > { %v2079_v18 = vld [vmem:[%s2176_s20 + $0x30] sm:$0xff]   ;;  %v2080_v20 = vld [vmem:[%s2176_s20 + $0x38] sm:$0xff]   ;;  %v2081_v22 = vld [vmem:[%s2176_s20 + $0x40] sm:$0xff]  }
  0x16   : > { %1957 = vmatpush3.bf16.msra.mxu0 %v2068_v2  ;;  %2037 = vmatpush3.bf16.msra.mxu1 %v2068_v2  ;;  %v2095_v19 = vld [vmem:[%s2176_s20 + $0xb0] sm:$0xff]   ;;  %v2096_v21 = vld [vmem:[%s2176_s20 + $0xb8] sm:$0xff]   ;;  %v2097_v23 = vld [vmem:[%s2176_s20 + $0xc0] sm:$0xff]  }
  0x17   : > { %1958 = vmatprep.subr.bf16.mxu0 %v2069_v3  ;;  %2032 = vmatprep.subr.bf16.mxu1 %v2069_v3  ;;  %v2082_v24 = vld [vmem:[%s2176_s20 + $0x48] sm:$0xff]   ;;  %v2083_v26 = vld [vmem:[%s2176_s20 + $0x50] sm:$0xff]   ;;  %v2084_v28 = vld [vmem:[%s2176_s20 + $0x58] sm:$0xff]  }
  0x18   : > { %v2098_v25 = vld [vmem:[%s2176_s20 + $0xc8] sm:$0xff]   ;;  %v2099_v27 = vld [vmem:[%s2176_s20 + $0xd0] sm:$0xff]   ;;  %v2100_v29 = vld [vmem:[%s2176_s20 + $0xd8] sm:$0xff]  }
  0x19   : > { %v2085_v30 = vld [vmem:[%s2176_s20 + $0x60] sm:$0xff]   ;;  %v2086_v32 = vld [vmem:[%s2176_s20 + $0x68] sm:$0xff]   ;;  %v2087_v34 = vld [vmem:[%s2176_s20 + $0x70] sm:$0xff]  }
  0x1a   : > { %1959 = vmatpush3.bf16.msra.mxu0 %v2069_v3  ;;  %2038 = vmatpush3.bf16.msra.mxu1 %v2069_v3  ;;  %v2101_v31 = vld [vmem:[%s2176_s20 + $0xe0] sm:$0xff]   ;;  %v2102_v33 = vld [vmem:[%s2176_s20 + $0xe8] sm:$0xff]   ;;  %v2103_v35 = vld [vmem:[%s2176_s20 + $0xf0] sm:$0xff]  }
  0x1b   : > { %1960 = vmatprep.subr.bf16.mxu0 %v2070_v4  ;;  %2033 = vmatprep.subr.bf16.mxu1 %v2070_v4  ;;  %v2088_v36 = vld [vmem:[%s2176_s20 + $0x78] sm:$0xff]  }
  0x1c   : > { %v2104_v37 = vld [vmem:[%s2176_s20 + $0xf8] sm:$0xff]  }
  0x1e   : > { %1961 = vmatpush3.bf16.msra.mxu0 %v2070_v4  ;;  %2039 = vmatpush3.bf16.msra.mxu1 %v2070_v4 }
  0x1f   : > { %1962 = vmatprep.subr.bf16.mxu0 %v2071_v5  ;;  %2034 = vmatprep.subr.bf16.mxu1 %v2071_v5 }
  0x22   : > { %1963 = vmatpush3.bf16.msra.mxu0 %v2071_v5  ;;  %2040 = vmatpush3.bf16.msra.mxu1 %v2071_v5 }
  0x23   : > { %1964 = vmatprep.subr.bf16.mxu0 %v2072_v6  ;;  %2035 = vmatprep.subr.bf16.mxu1 %v2072_v6 }
  0x26   : > { %1965 = vmatpush3.bf16.msra.mxu0 %v2072_v6  ;;  %2041 = vmatpush3.bf16.msra.mxu1 %v2072_v6 }
  0x29   : > { %1967 = vmatmul.mubr.msk.bf16.vlgmr.msra.gmra.mxu0 %vm522_vm0, %v2074_v7  ;;  %1999 = vmatmul.mubr.msk.bf16.vlgmr.msra.gmra.mxu1 %vm522_vm0, %v2090_v10 }
  0x2a   : > { %1970 = vmatprep.mubr.msk.bf16.mxu0 %vm522_vm0, %v2075_v8  ;;  %2002 = vmatprep.mubr.msk.bf16.mxu1 %vm522_vm0, %v2091_v11 }
  0x31   : > { %1971 = vmatmul.mubr.msk.bf16.gmra.mxu0 %vm522_vm0, %v2076_v12  ;;  %2003 = vmatmul.mubr.msk.bf16.gmra.mxu1 %vm522_vm0, %v2092_v14 }
  0x32   : > { %1974 = vmatprep.mubr.msk.bf16.mxu0 %vm522_vm0, %v2077_v13  ;;  %2006 = vmatprep.mubr.msk.bf16.mxu1 %vm522_vm0, %v2093_v15 }
  0x39   : > { %1975 = vmatmul.mubr.msk.bf16.gmra.mxu0 %vm522_vm0, %v2078_v16  ;;  %2007 = vmatmul.mubr.msk.bf16.gmra.mxu1 %vm522_vm0, %v2094_v17 }
  0x3a   : > { %1978 = vmatprep.mubr.msk.bf16.mxu0 %vm522_vm0, %v2079_v18  ;;  %2010 = vmatprep.mubr.msk.bf16.mxu1 %vm522_vm0, %v2095_v19 }
  0x41   : > { %1979 = vmatmul.mubr.msk.bf16.gmra.mxu0 %vm522_vm0, %v2080_v20  ;;  %2011 = vmatmul.mubr.msk.bf16.gmra.mxu1 %vm522_vm0, %v2096_v21 }
  0x42   : > { %1982 = vmatprep.mubr.msk.bf16.mxu0 %vm522_vm0, %v2081_v22  ;;  %2014 = vmatprep.mubr.msk.bf16.mxu1 %vm522_vm0, %v2097_v23 }
  0x49   : > { %1983 = vmatmul.mubr.msk.bf16.gmra.mxu0 %vm522_vm0, %v2082_v24  ;;  %2015 = vmatmul.mubr.msk.bf16.gmra.mxu1 %vm522_vm0, %v2098_v25 }
  0x4a   : > { %1986 = vmatprep.mubr.msk.bf16.mxu0 %vm522_vm0, %v2083_v26  ;;  %2018 = vmatprep.mubr.msk.bf16.mxu1 %vm522_vm0, %v2099_v27 }
  0x51   : > { %1987 = vmatmul.mubr.msk.bf16.gmra.mxu0 %vm522_vm0, %v2084_v28  ;;  %2019 = vmatmul.mubr.msk.bf16.gmra.mxu1 %vm522_vm0, %v2100_v29 }
  0x52   : > { %1990 = vmatprep.mubr.msk.bf16.mxu0 %vm522_vm0, %v2085_v30  ;;  %2022 = vmatprep.mubr.msk.bf16.mxu1 %vm522_vm0, %v2101_v31 }
  0x59   : > { %1991 = vmatmul.mubr.msk.bf16.gmra.mxu0 %vm522_vm0, %v2086_v32  ;;  %2023 = vmatmul.mubr.msk.bf16.gmra.mxu1 %vm522_vm0, %v2102_v33 }
  0x5a   : > { %1994 = vmatprep.mubr.msk.bf16.mxu0 %vm522_vm0, %v2087_v34  ;;  %2026 = vmatprep.mubr.msk.bf16.mxu1 %vm522_vm0, %v2103_v35 }
  0x61   : > { %1995 = vmatmul.mubr.msk.bf16.gmra.mxu0 %vm522_vm0, %v2088_v36  ;;  %2027 = vmatmul.mubr.msk.bf16.gmra.mxu1 %vm522_vm0, %v2104_v37 }
  0xe9   : > { %v1968_v38 = vpop.f32.mrf.mxu0  ;;  %v2252_v39 = vpop.f32.mrf.mxu1 }
  0xea   : > { %v1854_v40 = vpack.c.bf16 %v1968_v38, %v1968_v38  ;;  %v1886_v41 = vpack.c.bf16 %v2252_v39, %v2252_v39  ;;  %v1367_v50 = vmul.f32 %v1968_v38, %v1968_v38  ;;  %v1233_v58 = vsel %vm1229_vm2, %v1968_v38, 0.0 }
  0xeb   : > { %v653_v42 = vpop.f32.mrf.mxu0  ;;  %v2256_v43 = vpop.f32.mrf.mxu1 }
  0xec   : > { %1167 = vst.msk [vmem:[%s2250_s26 + $0x8] sm:$0xf] %vm1164_vm1, %v1854_v40  ;;  %v1852_v44 = vpack.c.bf16 %v653_v42, %v653_v42  ;;  %1199 = vst.msk [vmem:[%s2250_s26 + $0x88] sm:$0xf] %vm1164_vm1, %v1886_v41  ;;  %v1884_v46 = vpack.c.bf16 %v2256_v43, %v2256_v43  ;;  %v1365_v48 = vmul.f32 %v653_v42, %v653_v42  ;;  %v1230_v54 = vsel %vm1229_vm2, %v653_v42, 0.0 }
  0xed   : > { %v1969_v45 = vpop.f32.mrf.mxu0  ;;  %v2264_v47 = vpop.f32.mrf.mxu1  ;;  %v1432_v8 = vsel %vm1229_vm2, %v1367_v50, 0.0 }
  0xee   : > { %1165 = vst.msk [vmem:[%s2250_s26] sm:$0xf] %vm1164_vm1, %v1852_v44  ;;  %v1855_v49 = vpack.c.bf16 %v1969_v45, %v1969_v45  ;;  %1197 = vst.msk [vmem:[%s2250_s26 + $0x80] sm:$0xf] %vm1164_vm1, %v1884_v46  ;;  %v1887_v52 = vpack.c.bf16 %v2264_v47, %v2264_v47  ;;  %v1429_v63 = vsel %vm1229_vm2, %v1365_v48, 0.0  ;;  %v1368_v0 = vmul.f32 %v1969_v45, %v1969_v45 }
  0xef   : > { %v656_v51 = vpop.f32.mrf.mxu0  ;;  %v2272_v53 = vpop.f32.mrf.mxu1  ;;  %v1235_v9 = vsel %vm1229_vm2, %v1969_v45, 0.0 }
  0xf0   : > { %1168 = vst.msk [vmem:[%s2250_s26 + $0xc] sm:$0xf] %vm1164_vm1, %v1855_v49  ;;  %v1853_v55 = vpack.c.bf16 %v656_v51, %v656_v51  ;;  %v1231_v56 = vsel %vm1229_vm2, %v656_v51, 0.0  ;;  %v1366_v57 = vmul.f32 %v656_v51, %v656_v51  ;;  %1200 = vst.msk [vmem:[%s2250_s26 + $0x8c] sm:$0xf] %vm1164_vm1, %v1887_v52  ;;  %v1885_v61 = vpack.c.bf16 %v2272_v53, %v2272_v53 }
  0xf1   : > { %v1232_v59 = vadd.f32 %v1231_v56, %v1230_v54  ;;  %v1972_v60 = vpop.f32.mrf.mxu0  ;;  %v2283_v62 = vpop.f32.mrf.mxu1  ;;  %v1434_v16 = vsel %vm1229_vm2, %v1368_v0, 0.0 }
  0xf2   : > { %1166 = vst.msk [vmem:[%s2250_s26 + $0x4] sm:$0xf] %vm1164_vm1, %v1853_v55  ;;  %v1430_v1 = vsel %vm1229_vm2, %v1366_v57, 0.0  ;;  %v1858_v2 = vpack.c.bf16 %v1972_v60, %v1972_v60  ;;  %1198 = vst.msk [vmem:[%s2250_s26 + $0x84] sm:$0xf] %vm1164_vm1, %v1885_v61  ;;  %v1890_v6 = vpack.c.bf16 %v2283_v62, %v2283_v62  ;;  %v1371_v19 = vmul.f32 %v1972_v60, %v1972_v60 }
  0xf3   : > { %v1234_v3 = vadd.f32 %v1233_v58, %v1232_v59  ;;  %v1431_v4 = vadd.f32 %v1430_v1, %v1429_v63  ;;  %v669_v5 = vpop.f32.mrf.mxu0  ;;  %v2293_v7 = vpop.f32.mrf.mxu1  ;;  %v1241_v33 = vsel %vm1229_vm2, %v1972_v60, 0.0 }
  0xf4   : > { %1171 = vst.msk [vmem:[%s2250_s26 + $0x18] sm:$0xf] %vm1164_vm1, %v1858_v2  ;;  %v1856_v10 = vpack.c.bf16 %v669_v5, %v669_v5  ;;  %v1369_v11 = vmul.f32 %v669_v5, %v669_v5  ;;  %1203 = vst.msk [vmem:[%s2250_s26 + $0x98] sm:$0xf] %vm1164_vm1, %v1890_v6  ;;  %v1237_v17 = vsel %vm1229_vm2, %v669_v5, 0.0  ;;  %v1888_v23 = vpack.c.bf16 %v2293_v7, %v2293_v7 }
  0xf5   : > { %v1433_v12 = vadd.f32 %v1432_v8, %v1431_v4  ;;  %v1236_v13 = vadd.f32 %v1235_v9, %v1234_v3  ;;  %v1973_v14 = vpop.f32.mrf.mxu0  ;;  %v2301_v15 = vpop.f32.mrf.mxu1  ;;  %v1440_v44 = vsel %vm1229_vm2, %v1371_v19, 0.0 }
  0xf6   : > { %1169 = vst.msk [vmem:[%s2250_s26 + $0x10] sm:$0xf] %vm1164_vm1, %v1856_v10  ;;  %v1859_v18 = vpack.c.bf16 %v1973_v14, %v1973_v14  ;;  %v1436_v25 = vsel %vm1229_vm2, %v1369_v11, 0.0  ;;  %1201 = vst.msk [vmem:[%s2250_s26 + $0x90] sm:$0xf] %vm1164_vm1, %v1888_v23  ;;  %v1372_v34 = vmul.f32 %v1973_v14, %v1973_v14  ;;  %v1891_v41 = vpack.c.bf16 %v2301_v15, %v2301_v15 }
  0xf7   : > { %v1238_v20 = vadd.f32 %v1237_v17, %v1236_v13  ;;  %v1435_v21 = vadd.f32 %v1434_v16, %v1433_v12  ;;  %v672_v22 = vpop.f32.mrf.mxu0  ;;  %v2309_v24 = vpop.f32.mrf.mxu1  ;;  %v1243_v45 = vsel %vm1229_vm2, %v1973_v14, 0.0 }
  0xf8   : > { %1172 = vst.msk [vmem:[%s2250_s26 + $0x1c] sm:$0xf] %vm1164_vm1, %v1859_v18  ;;  %v1857_v26 = vpack.c.bf16 %v672_v22, %v672_v22  ;;  %v1239_v27 = vsel %vm1229_vm2, %v672_v22, 0.0  ;;  %v1370_v28 = vmul.f32 %v672_v22, %v672_v22  ;;  %1204 = vst.msk [vmem:[%s2250_s26 + $0x9c] sm:$0xf] %vm1164_vm1, %v1891_v41  ;;  %v1442_v54 = vsel %vm1229_vm2, %v1372_v34, 0.0 }
  0xf9   : > { %v1437_v29 = vadd.f32 %v1436_v25, %v1435_v21  ;;  %v1240_v30 = vadd.f32 %v1239_v27, %v1238_v20  ;;  %v1976_v31 = vpop.f32.mrf.mxu0  ;;  %v2317_v32 = vpop.f32.mrf.mxu1  ;;  %v1889_v61 = vpack.c.bf16 %v2309_v24, %v2309_v24 }
  0xfa   : > { %1170 = vst.msk [vmem:[%s2250_s26 + $0x14] sm:$0xf] %vm1164_vm1, %v1857_v26  ;;  %v1438_v35 = vsel %vm1229_vm2, %v1370_v28, 0.0  ;;  %v1862_v36 = vpack.c.bf16 %v1976_v31, %v1976_v31  ;;  %v1375_v57 = vmul.f32 %v1976_v31, %v1976_v31  ;;  %v1249_v9 = vsel %vm1229_vm2, %v1976_v31, 0.0 }
  0xfb   : > { %v1242_v37 = vadd.f32 %v1241_v33, %v1240_v30  ;;  %v1439_v38 = vadd.f32 %v1438_v35, %v1437_v29  ;;  %v685_v40 = vpop.f32.mrf.mxu0  ;;  %v2325_v42 = vpop.f32.mrf.mxu1  ;;  %1202 = vst.msk [vmem:[%s2250_s26 + $0x94] sm:$0xf] %vm1164_vm1, %v1889_v61  ;;  %v1894_v17 = vpack.c.bf16 %v2317_v32, %v2317_v32 }
  0xfc   : > { %1175 = vst.msk [vmem:[%s2250_s26 + $0x28] sm:$0xf] %vm1164_vm1, %v1862_v36  ;;  %v1860_v46 = vpack.c.bf16 %v685_v40, %v685_v40  ;;  %v1373_v48 = vmul.f32 %v685_v40, %v685_v40  ;;  %v1245_v55 = vsel %vm1229_vm2, %v685_v40, 0.0  ;;  %v1448_v19 = vsel %vm1229_vm2, %v1375_v57, 0.0 }
  0xfd   : > { %v1441_v49 = vadd.f32 %v1440_v44, %v1439_v38  ;;  %v1244_v50 = vadd.f32 %v1243_v45, %v1242_v37  ;;  %v1977_v51 = vpop.f32.mrf.mxu0  ;;  %v2333_v52 = vpop.f32.mrf.mxu1  ;;  %1207 = vst.msk [vmem:[%s2250_s26 + $0xa8] sm:$0xf] %vm1164_vm1, %v1894_v17  ;;  %v1892_v36 = vpack.c.bf16 %v2325_v42, %v2325_v42 }
  0xfe   : > { %1173 = vst.msk [vmem:[%s2250_s26 + $0x20] sm:$0xf] %vm1164_vm1, %v1860_v46  ;;  %v1863_v56 = vpack.c.bf16 %v1977_v51, %v1977_v51  ;;  %v1444_v0 = vsel %vm1229_vm2, %v1373_v48, 0.0  ;;  %v1376_v10 = vmul.f32 %v1977_v51, %v1977_v51  ;;  %v1251_v20 = vsel %vm1229_vm2, %v1977_v51, 0.0 }
  0xff   : > { %v1246_v58 = vadd.f32 %v1245_v55, %v1244_v50  ;;  %v1443_v59 = vadd.f32 %v1442_v54, %v1441_v49  ;;  %v688_v60 = vpop.f32.mrf.mxu0  ;;  %v2341_v63 = vpop.f32.mrf.mxu1  ;;  %1205 = vst.msk [vmem:[%s2250_s26 + $0xa0] sm:$0xf] %vm1164_vm1, %v1892_v36 }
 0x100   : > { %1176 = vst.msk [vmem:[%s2250_s26 + $0x2c] sm:$0xf] %vm1164_vm1, %v1863_v56  ;;  %v1861_v1 = vpack.c.bf16 %v688_v60, %v688_v60  ;;  %v1247_v2 = vsel %vm1229_vm2, %v688_v60, 0.0  ;;  %v1374_v3 = vmul.f32 %v688_v60, %v688_v60  ;;  %v1450_v28 = vsel %vm1229_vm2, %v1376_v10, 0.0 }
 0x101   : > { %v1445_v4 = vadd.f32 %v1444_v0, %v1443_v59  ;;  %v1248_v5 = vadd.f32 %v1247_v2, %v1246_v58  ;;  %v1980_v6 = vpop.f32.mrf.mxu0  ;;  %v2349_v8 = vpop.f32.mrf.mxu1  ;;  %v1895_v59 = vpack.c.bf16 %v2333_v52, %v2333_v52  ;;  %v1893_v17 = vpack.c.bf16 %v2341_v63, %v2341_v63 }
 0x102   : > { %1174 = vst.msk [vmem:[%s2250_s26 + $0x24] sm:$0xf] %vm1164_vm1, %v1861_v1  ;;  %v1446_v11 = vsel %vm1229_vm2, %v1374_v3, 0.0  ;;  %v1866_v12 = vpack.c.bf16 %v1980_v6, %v1980_v6  ;;  %v1379_v31 = vmul.f32 %v1980_v6, %v1980_v6  ;;  %v1257_v50 = vsel %vm1229_vm2, %v1980_v6, 0.0 }
 0x103   : > { %v1250_v13 = vadd.f32 %v1249_v9, %v1248_v5  ;;  %v1447_v14 = vadd.f32 %v1446_v11, %v1445_v4  ;;  %v701_v16 = vpop.f32.mrf.mxu0  ;;  %v2357_v18 = vpop.f32.mrf.mxu1  ;;  %1208 = vst.msk [vmem:[%s2250_s26 + $0xac] sm:$0xf] %vm1164_vm1, %v1895_v59  ;;  %1206 = vst.msk [vmem:[%s2250_s26 + $0xa4] sm:$0xf] %vm1164_vm1, %v1893_v17 }
 0x104   : > { %1179 = vst.msk [vmem:[%s2250_s26 + $0x38] sm:$0xf] %vm1164_vm1, %v1866_v12  ;;  %v1864_v21 = vpack.c.bf16 %v701_v16, %v701_v16  ;;  %v1377_v22 = vmul.f32 %v701_v16, %v701_v16  ;;  %v1253_v29 = vsel %vm1229_vm2, %v701_v16, 0.0  ;;  %v1456_v61 = vsel %vm1229_vm2, %v1379_v31, 0.0 }
 0x105   : > { %v1449_v23 = vadd.f32 %v1448_v19, %v1447_v14  ;;  %v1252_v25 = vadd.f32 %v1251_v20, %v1250_v13  ;;  %v1981_v26 = vpop.f32.mrf.mxu0  ;;  %v2365_v27 = vpop.f32.mrf.mxu1 }
 0x106   : > { %1177 = vst.msk [vmem:[%s2250_s26 + $0x30] sm:$0xf] %vm1164_vm1, %v1864_v21  ;;  %v1867_v30 = vpack.c.bf16 %v1981_v26, %v1981_v26  ;;  %v1452_v38 = vsel %vm1229_vm2, %v1377_v22, 0.0  ;;  %v1380_v51 = vmul.f32 %v1981_v26, %v1981_v26  ;;  %v1259_v0 = vsel %vm1229_vm2, %v1981_v26, 0.0 }
 0x107   : > { %v1254_v33 = vadd.f32 %v1253_v29, %v1252_v25  ;;  %v1451_v34 = vadd.f32 %v1450_v28, %v1449_v23  ;;  %v704_v35 = vpop.f32.mrf.mxu0  ;;  %v2373_v37 = vpop.f32.mrf.mxu1 }
 0x108   : > { %1180 = vst.msk [vmem:[%s2250_s26 + $0x3c] sm:$0xf] %vm1164_vm1, %v1867_v30  ;;  %v1865_v40 = vpack.c.bf16 %v704_v35, %v704_v35  ;;  %v1255_v41 = vsel %vm1229_vm2, %v704_v35, 0.0  ;;  %v1378_v44 = vmul.f32 %v704_v35, %v704_v35  ;;  %v1458_v9 = vsel %vm1229_vm2, %v1380_v51, 0.0 }
 0x109   : > { %v1453_v45 = vadd.f32 %v1452_v38, %v1451_v34  ;;  %v1256_v46 = vadd.f32 %v1255_v41, %v1254_v33  ;;  %v1984_v48 = vpop.f32.mrf.mxu0  ;;  %v2381_v49 = vpop.f32.mrf.mxu1 }
 0x10a   : > { %1178 = vst.msk [vmem:[%s2250_s26 + $0x34] sm:$0xf] %vm1164_vm1, %v1865_v40  ;;  %v1454_v54 = vsel %vm1229_vm2, %v1378_v44, 0.0  ;;  %v1870_v55 = vpack.c.bf16 %v1984_v48, %v1984_v48  ;;  %v1383_v12 = vmul.f32 %v1984_v48, %v1984_v48  ;;  %v1265_v30 = vsel %vm1229_vm2, %v1984_v48, 0.0 }
 0x10b   : > { %v1258_v56 = vadd.f32 %v1257_v50, %v1256_v46  ;;  %v1455_v57 = vadd.f32 %v1454_v54, %v1453_v45  ;;  %v717_v58 = vpop.f32.mrf.mxu0  ;;  %v2389_v60 = vpop.f32.mrf.mxu1  ;;  %v1898_v40 = vpack.c.bf16 %v2349_v8, %v2349_v8 }
 0x10c   : > { %1183 = vst.msk [vmem:[%s2250_s26 + $0x48] sm:$0xf] %vm1164_vm1, %v1870_v55  ;;  %v1868_v1 = vpack.c.bf16 %v717_v58, %v717_v58  ;;  %v1381_v2 = vmul.f32 %v717_v58, %v717_v58  ;;  %v1261_v10 = vsel %vm1229_vm2, %v717_v58, 0.0  ;;  %v1464_v44 = vsel %vm1229_vm2, %v1383_v12, 0.0 }
 0x10d   : > { %v1457_v3 = vadd.f32 %v1456_v61, %v1455_v57  ;;  %v1260_v4 = vadd.f32 %v1259_v0, %v1258_v56  ;;  %v1985_v5 = vpop.f32.mrf.mxu0  ;;  %v2397_v6 = vpop.f32.mrf.mxu1  ;;  %1211 = vst.msk [vmem:[%s2250_s26 + $0xb8] sm:$0xf] %vm1164_vm1, %v1898_v40 }
 0x10e   : > { %1181 = vst.msk [vmem:[%s2250_s26 + $0x40] sm:$0xf] %vm1164_vm1, %v1868_v1  ;;  %v1871_v11 = vpack.c.bf16 %v1985_v5, %v1985_v5  ;;  %v1460_v20 = vsel %vm1229_vm2, %v1381_v2, 0.0  ;;  %v1384_v31 = vmul.f32 %v1985_v5, %v1985_v5  ;;  %v1267_v45 = vsel %vm1229_vm2, %v1985_v5, 0.0 }
 0x10f   : > { %v1262_v13 = vadd.f32 %v1261_v10, %v1260_v4  ;;  %v1459_v14 = vadd.f32 %v1458_v9, %v1457_v3  ;;  %v720_v16 = vpop.f32.mrf.mxu0  ;;  %v2405_v19 = vpop.f32.mrf.mxu1  ;;  %v1896_v2 = vpack.c.bf16 %v2357_v18, %v2357_v18 }
 0x110   : > { %1184 = vst.msk [vmem:[%s2250_s26 + $0x4c] sm:$0xf] %vm1164_vm1, %v1871_v11  ;;  %v1869_v21 = vpack.c.bf16 %v720_v16, %v720_v16  ;;  %v1263_v22 = vsel %vm1229_vm2, %v720_v16, 0.0  ;;  %v1382_v23 = vmul.f32 %v720_v16, %v720_v16  ;;  %v1466_v56 = vsel %vm1229_vm2, %v1384_v31, 0.0 }
 0x111   : > { %v1461_v25 = vadd.f32 %v1460_v20, %v1459_v14  ;;  %v1264_v26 = vadd.f32 %v1263_v22, %v1262_v13  ;;  %v1988_v28 = vpop.f32.mrf.mxu0  ;;  %v2413_v29 = vpop.f32.mrf.mxu1  ;;  %1209 = vst.msk [vmem:[%s2250_s26 + $0xb0] sm:$0xf] %vm1164_vm1, %v1896_v2 }
 0x112   : > { %1182 = vst.msk [vmem:[%s2250_s26 + $0x44] sm:$0xf] %vm1164_vm1, %v1869_v21  ;;  %v1462_v33 = vsel %vm1229_vm2, %v1382_v23, 0.0  ;;  %v1874_v34 = vpack.c.bf16 %v1988_v28, %v1988_v28  ;;  %v1387_v59 = vmul.f32 %v1988_v28, %v1988_v28  ;;  %v1273_v14 = vsel %vm1229_vm2, %v1988_v28, 0.0 }
 0x113   : > { %v1266_v35 = vadd.f32 %v1265_v30, %v1264_v26  ;;  %v1463_v36 = vadd.f32 %v1462_v33, %v1461_v25  ;;  %v733_v38 = vpop.f32.mrf.mxu0  ;;  %v2421_v41 = vpop.f32.mrf.mxu1  ;;  %v1899_v25 = vpack.c.bf16 %v2365_v27, %v2365_v27 }
 0x114   : > { %1187 = vst.msk [vmem:[%s2250_s26 + $0x58] sm:$0xf] %vm1164_vm1, %v1874_v34  ;;  %v1872_v46 = vpack.c.bf16 %v733_v38, %v733_v38  ;;  %v1385_v48 = vmul.f32 %v733_v38, %v733_v38  ;;  %v1269_v57 = vsel %vm1229_vm2, %v733_v38, 0.0  ;;  %v1472_v26 = vsel %vm1229_vm2, %v1387_v59, 0.0 }
 0x115   : > { %v1465_v50 = vadd.f32 %v1464_v44, %v1463_v36  ;;  %v1268_v51 = vadd.f32 %v1267_v45, %v1266_v35  ;;  %v1989_v54 = vpop.f32.mrf.mxu0  ;;  %v2429_v55 = vpop.f32.mrf.mxu1  ;;  %1212 = vst.msk [vmem:[%s2250_s26 + $0xbc] sm:$0xf] %vm1164_vm1, %v1899_v25 }
 0x116   : > { %1185 = vst.msk [vmem:[%s2250_s26 + $0x50] sm:$0xf] %vm1164_vm1, %v1872_v46  ;;  %v1875_v58 = vpack.c.bf16 %v1989_v54, %v1989_v54  ;;  %v1468_v3 = vsel %vm1229_vm2, %v1385_v48, 0.0  ;;  %v1388_v16 = vmul.f32 %v1989_v54, %v1989_v54  ;;  %v1275_v30 = vsel %vm1229_vm2, %v1989_v54, 0.0 }
 0x117   : > { %v1270_v61 = vadd.f32 %v1269_v57, %v1268_v51  ;;  %v1467_v0 = vadd.f32 %v1466_v56, %v1465_v50  ;;  %v736_v1 = vpop.f32.mrf.mxu0  ;;  %v2441_v10 = vpop.f32.mrf.mxu1  ;;  %v1897_v51 = vpack.c.bf16 %v2373_v37, %v2373_v37 }
 0x118   : > { %1188 = vst.msk [vmem:[%s2250_s26 + $0x5c] sm:$0xf] %vm1164_vm1, %v1875_v58  ;;  %v1873_v4 = vpack.c.bf16 %v736_v1, %v736_v1  ;;  %v1271_v5 = vsel %vm1229_vm2, %v736_v1, 0.0  ;;  %v1386_v9 = vmul.f32 %v736_v1, %v736_v1  ;;  %v1474_v38 = vsel %vm1229_vm2, %v1388_v16, 0.0 }
 0x119   : > { %v1469_v11 = vadd.f32 %v1468_v3, %v1467_v0  ;;  %v1272_v12 = vadd.f32 %v1271_v5, %v1270_v61  ;;  %v1992_v13 = vpop.f32.mrf.mxu0  ;;  %v2455_v33 = vpop.f32.mrf.mxu1  ;;  %1210 = vst.msk [vmem:[%s2250_s26 + $0xb4] sm:$0xf] %vm1164_vm1, %v1897_v51 }
 0x11a   : > { %1186 = vst.msk [vmem:[%s2250_s26 + $0x54] sm:$0xf] %vm1164_vm1, %v1873_v4  ;;  %v1470_v17 = vsel %vm1229_vm2, %v1386_v9, 0.0  ;;  %v1878_v20 = vpack.c.bf16 %v1992_v13, %v1992_v13  ;;  %v1391_v45 = vmul.f32 %v1992_v13, %v1992_v13  ;;  %v1281_v2 = vsel %vm1229_vm2, %v1992_v13, 0.0 }
 0x11b   : > { %v1274_v21 = vadd.f32 %v1273_v14, %v1272_v12  ;;  %v1471_v22 = vadd.f32 %v1470_v17, %v1469_v11  ;;  %v749_v23 = vpop.f32.mrf.mxu0  ;;  %v2469_v59 = vpop.f32.mrf.mxu1  ;;  %v1902_v14 = vpack.c.bf16 %v2381_v49, %v2381_v49 }
 0x11c   : > { %1191 = vst.msk [vmem:[%s2250_s26 + $0x68] sm:$0xf] %vm1164_vm1, %v1878_v20  ;;  %v1876_v28 = vpack.c.bf16 %v749_v23, %v749_v23  ;;  %v1389_v31 = vmul.f32 %v749_v23, %v749_v23  ;;  %v1277_v40 = vsel %vm1229_vm2, %v749_v23, 0.0  ;;  %v1480_v16 = vsel %vm1229_vm2, %v1391_v45, 0.0 }
 0x11d   : > { %v1473_v34 = vadd.f32 %v1472_v26, %v1471_v22  ;;  %v1276_v35 = vadd.f32 %v1275_v30, %v1274_v21  ;;  %v1993_v36 = vpop.f32.mrf.mxu0  ;;  %v2483_v21 = vpop.f32.mrf.mxu1  ;;  %1215 = vst.msk [vmem:[%s2250_s26 + $0xc8] sm:$0xf] %vm1164_vm1, %v1902_v14 }
 0x11e   : > { %1189 = vst.msk [vmem:[%s2250_s26 + $0x60] sm:$0xf] %vm1164_vm1, %v1876_v28  ;;  %v1879_v44 = vpack.c.bf16 %v1993_v36, %v1993_v36  ;;  %v1476_v54 = vsel %vm1229_vm2, %v1389_v31, 0.0  ;;  %v1392_v3 = vmul.f32 %v1993_v36, %v1993_v36  ;;  %v1283_v17 = vsel %vm1229_vm2, %v1993_v36, 0.0 }
 0x11f   : > { %v1278_v46 = vadd.f32 %v1277_v40, %v1276_v35  ;;  %v1475_v48 = vadd.f32 %v1474_v38, %v1473_v34  ;;  %v752_v50 = vpop.f32.mrf.mxu0  ;;  %v1900_v38 = vpack.c.bf16 %v2389_v60, %v2389_v60 }
 0x120   : > { %1192 = vst.msk [vmem:[%s2250_s26 + $0x6c] sm:$0xf] %vm1164_vm1, %v1879_v44  ;;  %v1877_v56 = vpack.c.bf16 %v752_v50, %v752_v50  ;;  %v1279_v57 = vsel %vm1229_vm2, %v752_v50, 0.0  ;;  %v1390_v58 = vmul.f32 %v752_v50, %v752_v50  ;;  %v1482_v26 = vsel %vm1229_vm2, %v1392_v3, 0.0 }
 0x121   : > { %v1477_v61 = vadd.f32 %v1476_v54, %v1475_v48  ;;  %v1280_v0 = vadd.f32 %v1279_v57, %v1278_v46  ;;  %v1996_v1 = vpop.f32.mrf.mxu0  ;;  %v2497_v48 = vpop.f32.mrf.mxu1  ;;  %1213 = vst.msk [vmem:[%s2250_s26 + $0xc0] sm:$0xf] %vm1164_vm1, %v1900_v38  ;;  %v1910_v38 = vpack.c.bf16 %v2455_v33, %v2455_v33 }
 0x122   : > { %1190 = vst.msk [vmem:[%s2250_s26 + $0x64] sm:$0xf] %vm1164_vm1, %v1877_v56  ;;  %v1478_v4 = vsel %vm1229_vm2, %v1390_v58, 0.0  ;;  %v1882_v5 = vpack.c.bf16 %v1996_v1, %v1996_v1  ;;  %v1395_v31 = vmul.f32 %v1996_v1, %v1996_v1  ;;  %v1289_v54 = vsel %vm1229_vm2, %v1996_v1, 0.0 }
 0x123   : > { %v1282_v9 = vadd.f32 %v1281_v2, %v1280_v0  ;;  %v1479_v11 = vadd.f32 %v1478_v4, %v1477_v61  ;;  %v765_v12 = vpop.f32.mrf.mxu0  ;;  %v1903_v58 = vpack.c.bf16 %v2397_v6, %v2397_v6  ;;  %v1901_v2 = vpack.c.bf16 %v2405_v19, %v2405_v19  ;;  %1223 = vst.msk [vmem:[%s2250_s26 + $0xe8] sm:$0xf] %vm1164_vm1, %v1910_v38 }
 0x124   : > { %1195 = vst.msk [vmem:[%s2250_s26 + $0x78] sm:$0xf] %vm1164_vm1, %v1882_v5  ;;  %v1880_v13 = vpack.c.bf16 %v765_v12, %v765_v12  ;;  %v1393_v20 = vmul.f32 %v765_v12, %v765_v12  ;;  %v1285_v30 = vsel %vm1229_vm2, %v765_v12, 0.0  ;;  %v1488_v3 = vsel %vm1229_vm2, %v1395_v31, 0.0 }
 0x125   : > { %v1481_v22 = vadd.f32 %v1480_v16, %v1479_v11  ;;  %v1284_v23 = vadd.f32 %v1283_v17, %v1282_v9  ;;  %v1997_v25 = vpop.f32.mrf.mxu0  ;;  %v1397_v1 = vmul.f32 %v2256_v43, %v2256_v43  ;;  %1216 = vst.msk [vmem:[%s2250_s26 + $0xcc] sm:$0xf] %vm1164_vm1, %v1903_v58  ;;  %v1906_v5 = vpack.c.bf16 %v2413_v29, %v2413_v29  ;;  %v2517_v9 = vpop.f32.mrf.mxu1 }
 0x126   : > { %1193 = vst.msk [vmem:[%s2250_s26 + $0x70] sm:$0xf] %vm1164_vm1, %v1880_v13  ;;  %v1883_v28 = vpack.c.bf16 %v1997_v25, %v1997_v25  ;;  %v1484_v40 = vsel %vm1229_vm2, %v1393_v20, 0.0  ;;  %v1396_v56 = vmul.f32 %v1997_v25, %v1997_v25  ;;  %v1291_v4 = vsel %vm1229_vm2, %v1997_v25, 0.0  ;;  %1214 = vst.msk [vmem:[%s2250_s26 + $0xc4] sm:$0xf] %vm1164_vm1, %v1901_v2 }
 0x127   : > { %v1286_v34 = vadd.f32 %v1285_v30, %v1284_v23  ;;  %v1483_v35 = vadd.f32 %v1482_v26, %v1481_v22  ;;  %v768_v36 = vpop.f32.mrf.mxu0  ;;  %v1293_v16 = vsel %vm1229_vm2, %v2256_v43, 0.0  ;;  %v1398_v17 = vmul.f32 %v2272_v53, %v2272_v53  ;;  %1219 = vst.msk [vmem:[%s2250_s26 + $0xd8] sm:$0xf] %vm1164_vm1, %v1906_v5 }
 0x128   : > { %1196 = vst.msk [vmem:[%s2250_s26 + $0x7c] sm:$0xf] %vm1164_vm1, %v1883_v28  ;;  %v1881_v44 = vpack.c.bf16 %v768_v36, %v768_v36  ;;  %v1287_v45 = vsel %vm1229_vm2, %v768_v36, 0.0  ;;  %v1394_v46 = vmul.f32 %v768_v36, %v768_v36  ;;  %v1490_v14 = vsel %vm1229_vm2, %v1396_v56, 0.0  ;;  %v2541_v28 = vpop.f32.mrf.mxu1 }
 0x129   : > { %v1485_v50 = vadd.f32 %v1484_v40, %v1483_v35  ;;  %v1288_v51 = vadd.f32 %v1287_v45, %v1286_v34  ;;  %v1904_v13 = vpack.c.bf16 %v2421_v41, %v2421_v41  ;;  %v1907_v23 = vpack.c.bf16 %v2429_v55, %v2429_v55 }
 0x12a   : > { %1194 = vst.msk [vmem:[%s2250_s26 + $0x74] sm:$0xf] %vm1164_vm1, %v1881_v44  ;;  %v1486_v57 = vsel %vm1229_vm2, %v1394_v46, 0.0  ;;  %v1399_v25 = vmul.f32 %v2252_v39, %v2252_v39  ;;  %v1492_v26 = vsel %vm1229_vm2, %v1397_v1, 0.0  ;;  %v1295_v43 = vsel %vm1229_vm2, %v2272_v53, 0.0 }
 0x12b   : > { %v1290_v61 = vadd.f32 %v1289_v54, %v1288_v51  ;;  %v1487_v0 = vadd.f32 %v1486_v57, %v1485_v50  ;;  %1217 = vst.msk [vmem:[%s2250_s26 + $0xd0] sm:$0xf] %vm1164_vm1, %v1904_v13  ;;  %v1905_v30 = vpack.c.bf16 %v2441_v10, %v2441_v10  ;;  %1220 = vst.msk [vmem:[%s2250_s26 + $0xdc] sm:$0xf] %vm1164_vm1, %v1907_v23  ;;  %v1297_v35 = vsel %vm1229_vm2, %v2252_v39, 0.0  ;;  %v2565_v54 = vpop.f32.mrf.mxu1 }
 0x12c   : > { %v1400_v36 = vmul.f32 %v2264_v47, %v2264_v47  ;;  %v1494_v53 = vsel %vm1229_vm2, %v1398_v17, 0.0  ;;  %v1908_v45 = vpack.c.bf16 %v2469_v59, %v2469_v59  ;;  %v1496_v46 = vsel %vm1229_vm2, %v1399_v25, 0.0 }
 0x12d   : > { %v1292_v11 = vadd.f32 %v1291_v4, %v1290_v61  ;;  %v1489_v12 = vadd.f32 %v1488_v3, %v1487_v0  ;;  %1218 = vst.msk [vmem:[%s2250_s26 + $0xd4] sm:$0xf] %vm1164_vm1, %v1905_v30  ;;  %v1299_v39 = vsel %vm1229_vm2, %v2264_v47, 0.0  ;;  %v1401_v50 = vmul.f32 %v2293_v7, %v2293_v7 }
 0x12e   : > { %v1911_v51 = vpack.c.bf16 %v2483_v21, %v2483_v21  ;;  %1221 = vst.msk [vmem:[%s2250_s26 + $0xe0] sm:$0xf] %vm1164_vm1, %v1908_v45  ;;  %v1498_v58 = vsel %vm1229_vm2, %v1400_v36, 0.0  ;;  %v1301_v47 = vsel %vm1229_vm2, %v2293_v7, 0.0  ;;  %v1402_v61 = vmul.f32 %v2309_v24, %v2309_v24 }
 0x12f   : > { %v1491_v20 = vadd.f32 %v1490_v14, %v1489_v12  ;;  %v1294_v22 = vadd.f32 %v1293_v16, %v1292_v11  ;;  %v1909_v0 = vpack.c.bf16 %v2497_v48, %v2497_v48  ;;  %v1914_v4 = vpack.c.bf16 %v2517_v9, %v2517_v9  ;;  %v2589_v12 = vpop.f32.mrf.mxu1 }
 0x130   : > { %1224 = vst.msk [vmem:[%s2250_s26 + $0xec] sm:$0xf] %vm1164_vm1, %v1911_v51  ;;  %v1403_v1 = vmul.f32 %v2283_v62, %v2283_v62  ;;  %v1500_v5 = vsel %vm1229_vm2, %v1401_v50, 0.0  ;;  %v1303_v7 = vsel %vm1229_vm2, %v2309_v24, 0.0  ;;  %v1912_v11 = vpack.c.bf16 %v2541_v28, %v2541_v28 }
 0x131   : > { %v1296_v31 = vadd.f32 %v1295_v43, %v1294_v22  ;;  %v1493_v34 = vadd.f32 %v1492_v26, %v1491_v20  ;;  %1222 = vst.msk [vmem:[%s2250_s26 + $0xe4] sm:$0xf] %vm1164_vm1, %v1909_v0  ;;  %1227 = vst.msk [vmem:[%s2250_s26 + $0xf8] sm:$0xf] %vm1164_vm1, %v1914_v4  ;;  %v1305_v17 = vsel %vm1229_vm2, %v2283_v62, 0.0  ;;  %v1404_v13 = vmul.f32 %v2301_v15, %v2301_v15 }
 0x132   : > { %v1502_v24 = vsel %vm1229_vm2, %v1402_v61, 0.0  ;;  %1225 = vst.msk [vmem:[%s2250_s26 + $0xf0] sm:$0xf] %vm1164_vm1, %v1912_v11  ;;  %v1915_v20 = vpack.c.bf16 %v2565_v54, %v2565_v54  ;;  %v1913_v25 = vpack.c.bf16 %v2589_v12, %v2589_v12  ;;  %v1504_v26 = vsel %vm1229_vm2, %v1403_v1, 0.0 }
 0x133   : > { %v1298_v40 = vadd.f32 %v1297_v35, %v1296_v31  ;;  %v1495_v44 = vadd.f32 %v1494_v53, %v1493_v34  ;;  %v1307_v62 = vsel %vm1229_vm2, %v2301_v15, 0.0  ;;  %v1405_v43 = vmul.f32 %v2325_v42, %v2325_v42 }
 0x134   : > { %1228 = vst.msk [vmem:[%s2250_s26 + $0xfc] sm:$0xf] %vm1164_vm1, %v1915_v20  ;;  %1226 = vst.msk [vmem:[%s2250_s26 + $0xf4] sm:$0xf] %vm1164_vm1, %v1913_v25  ;;  %v1506_v34 = vsel %vm1229_vm2, %v1404_v13, 0.0  ;;  %v1309_v35 = vsel %vm1229_vm2, %v2325_v42, 0.0  ;;  %v1406_v36 = vmul.f32 %v2341_v63, %v2341_v63  ;;  %v1407_v15 = vmul.f32 %v2317_v32, %v2317_v32 }
 0x135   : > { %v1497_v56 = vadd.f32 %v1496_v46, %v1495_v44  ;;  %v1300_v57 = vadd.f32 %v1299_v39, %v1298_v40  ;;  %v1508_v40 = vsel %vm1229_vm2, %v1405_v43, 0.0  ;;  %v1311_v44 = vsel %vm1229_vm2, %v2341_v63, 0.0 }
 0x136   : > { %v1313_v39 = vsel %vm1229_vm2, %v2317_v32, 0.0  ;;  %v1408_v42 = vmul.f32 %v2333_v52, %v2333_v52  ;;  %v1510_v50 = vsel %vm1229_vm2, %v1406_v36, 0.0  ;;  %v1409_v63 = vmul.f32 %v2357_v18, %v2357_v18 }
 0x137   : > { %v1302_v2 = vadd.f32 %v1301_v47, %v1300_v57  ;;  %v1499_v3 = vadd.f32 %v1498_v58, %v1497_v56  ;;  %v1512_v57 = vsel %vm1229_vm2, %v1407_v15, 0.0  ;;  %v1315_v58 = vsel %vm1229_vm2, %v2333_v52, 0.0 }
 0x138   : > { %v1514_v0 = vsel %vm1229_vm2, %v1408_v42, 0.0  ;;  %v1317_v32 = vsel %vm1229_vm2, %v2357_v18, 0.0  ;;  %v1411_v1 = vmul.f32 %v2349_v8, %v2349_v8  ;;  %v1516_v52 = vsel %vm1229_vm2, %v1409_v63, 0.0 }
 0x139   : > { %v1501_v14 = vadd.f32 %v1500_v5, %v1499_v3  ;;  %v1304_v16 = vadd.f32 %v1303_v7, %v1302_v2  ;;  %v1410_v2 = vmul.f32 %v2373_v37, %v2373_v37  ;;  %v1319_v5 = vsel %vm1229_vm2, %v2373_v37, 0.0 }
 0x13a   : > { %v1412_v18 = vmul.f32 %v2365_v27, %v2365_v27  ;;  %v1323_v20 = vsel %vm1229_vm2, %v2365_v27, 0.0  ;;  %v1413_v37 = vmul.f32 %v2389_v60, %v2389_v60  ;;  %v1329_v36 = vsel %vm1229_vm2, %v2381_v49, 0.0 }
 0x13b   : > { %v1306_v22 = vadd.f32 %v1305_v17, %v1304_v16  ;;  %v1503_v23 = vadd.f32 %v1502_v24, %v1501_v14  ;;  %v1321_v14 = vsel %vm1229_vm2, %v2349_v8, 0.0  ;;  %v1518_v16 = vsel %vm1229_vm2, %v1410_v2, 0.0 }
 0x13c   : > { %v1520_v24 = vsel %vm1229_vm2, %v1411_v1, 0.0  ;;  %v1522_v25 = vsel %vm1229_vm2, %v1412_v18, 0.0  ;;  %v1325_v8 = vsel %vm1229_vm2, %v2389_v60, 0.0  ;;  %v1524_v27 = vsel %vm1229_vm2, %v1413_v37, 0.0 }
 0x13d   : > { %v1505_v30 = vadd.f32 %v1504_v26, %v1503_v23  ;;  %v1308_v31 = vadd.f32 %v1307_v62, %v1306_v22  ;;  %v1414_v26 = vmul.f32 %v2405_v19, %v2405_v19  ;;  %v1416_v60 = vmul.f32 %v2397_v6, %v2397_v6 }
 0x13e   : > { %v1418_v42 = vmul.f32 %v2441_v10, %v2441_v10  ;;  %v1343_v18 = vsel %vm1229_vm2, %v2497_v48, 0.0 }
 0x13f   : > { %v1310_v53 = vadd.f32 %v1309_v35, %v1308_v31  ;;  %v1507_v38 = vadd.f32 %v1506_v34, %v1505_v30  ;;  %v1415_v30 = vmul.f32 %v2381_v49, %v2381_v49  ;;  %v1327_v31 = vsel %vm1229_vm2, %v2405_v19, 0.0 }
 0x140   : > { %v1417_v19 = vmul.f32 %v2421_v41, %v2421_v41  ;;  %v1333_v49 = vsel %vm1229_vm2, %v2421_v41, 0.0  ;;  %v1420_v41 = vmul.f32 %v2429_v55, %v2429_v55 }
 0x141   : > { %v1509_v45 = vadd.f32 %v1508_v40, %v1507_v38  ;;  %v1312_v46 = vadd.f32 %v1311_v44, %v1310_v53  ;;  %v1526_v53 = vsel %vm1229_vm2, %v1414_v26, 0.0  ;;  %v1528_v40 = vsel %vm1229_vm2, %v1415_v30, 0.0 }
 0x142   : > { %v1331_v44 = vsel %vm1229_vm2, %v2397_v6, 0.0  ;;  %v1532_v6 = vsel %vm1229_vm2, %v1417_v19, 0.0 }
 0x143   : > { %v1314_v51 = vadd.f32 %v1313_v39, %v1312_v46  ;;  %v1511_v56 = vadd.f32 %v1510_v50, %v1509_v45  ;;  %v1530_v39 = vsel %vm1229_vm2, %v1416_v60, 0.0 }
 0x145   : > { %v1513_v47 = vadd.f32 %v1512_v57, %v1511_v56  ;;  %v1316_v61 = vadd.f32 %v1315_v58, %v1314_v51  ;;  %v1419_v56 = vmul.f32 %v2413_v29, %v2413_v29  ;;  %v1335_v57 = vsel %vm1229_vm2, %v2441_v10, 0.0 }
 0x146   : > { %v1421_v10 = vmul.f32 %v2469_v59, %v2469_v59 }
 0x147   : > { %v1318_v3 = vadd.f32 %v1317_v32, %v1316_v61  ;;  %v1515_v4 = vadd.f32 %v1514_v0, %v1513_v47  ;;  %v1337_v47 = vsel %vm1229_vm2, %v2413_v29, 0.0  ;;  %v1534_v61 = vsel %vm1229_vm2, %v1418_v42, 0.0 }
 0x148   : > { %v1536_v2 = vsel %vm1229_vm2, %v1419_v56, 0.0  ;;  %v1341_v29 = vsel %vm1229_vm2, %v2469_v59, 0.0  ;;  %v1424_v59 = vmul.f32 %v2483_v21, %v2483_v21 }
 0x149   : > { %v1517_v7 = vadd.f32 %v1516_v52, %v1515_v4  ;;  %v1320_v11 = vadd.f32 %v1319_v5, %v1318_v3  ;;  %v1339_v3 = vsel %vm1229_vm2, %v2429_v55, 0.0  ;;  %v1538_v52 = vsel %vm1229_vm2, %v1420_v41, 0.0 }
 0x14a   : > { %v1422_v5 = vmul.f32 %v2497_v48, %v2497_v48  ;;  %v1540_v55 = vsel %vm1229_vm2, %v1421_v10, 0.0  ;;  %v1425_v48 = vmul.f32 %v2541_v28, %v2541_v28  ;;  %v1546_v26 = vsel %vm1229_vm2, %v1424_v59, 0.0 }
 0x14b   : > { %v1322_v17 = vadd.f32 %v1321_v14, %v1320_v11  ;;  %v1519_v13 = vadd.f32 %v1518_v16, %v1517_v7  ;;  %v1423_v14 = vmul.f32 %v2455_v33, %v2455_v33 }
 0x14d   : > { %v1521_v22 = vadd.f32 %v1520_v24, %v1519_v13  ;;  %v1324_v23 = vadd.f32 %v1323_v20, %v1322_v17  ;;  %v1345_v13 = vsel %vm1229_vm2, %v2455_v33, 0.0  ;;  %v1542_v24 = vsel %vm1229_vm2, %v1422_v5, 0.0 }
 0x14e   : > { %v1349_v33 = vsel %vm1229_vm2, %v2541_v28, 0.0  ;;  %v1428_v28 = vmul.f32 %v2565_v54, %v2565_v54 }
 0x14f   : > { %v1326_v62 = vadd.f32 %v1325_v8, %v1324_v23  ;;  %v1523_v43 = vadd.f32 %v1522_v25, %v1521_v22  ;;  %v1544_v22 = vsel %vm1229_vm2, %v1423_v14, 0.0  ;;  %v1347_v23 = vsel %vm1229_vm2, %v2483_v21, 0.0 }
 0x150   : > { %v1548_v21 = vsel %vm1229_vm2, %v1425_v48, 0.0  ;;  %v1554_v19 = vsel %vm1229_vm2, %v1428_v28, 0.0 }
 0x151   : > { %v1525_v34 = vadd.f32 %v1524_v27, %v1523_v43  ;;  %v1328_v35 = vadd.f32 %v1327_v31, %v1326_v62  ;;  %v1426_v62 = vmul.f32 %v2589_v12, %v2589_v12  ;;  %v1427_v27 = vmul.f32 %v2517_v9, %v2517_v9 }
 0x152   : > { %v1351_v31 = vsel %vm1229_vm2, %v2589_v12, 0.0 }
 0x153   : > { %v1330_v38 = vadd.f32 %v1329_v36, %v1328_v35  ;;  %v1527_v15 = vadd.f32 %v1526_v53, %v1525_v34  ;;  %v1353_v36 = vsel %vm1229_vm2, %v2517_v9, 0.0  ;;  %v1550_v60 = vsel %vm1229_vm2, %v1426_v62, 0.0 }
 0x155   : > { %v1529_v45 = vadd.f32 %v1528_v40, %v1527_v15  ;;  %v1332_v46 = vadd.f32 %v1331_v44, %v1330_v38  ;;  %v1552_v15 = vsel %vm1229_vm2, %v1427_v27, 0.0  ;;  %v1355_v40 = vsel %vm1229_vm2, %v2565_v54, 0.0 }
 0x157   : > { %v1334_v50 = vadd.f32 %v1333_v49, %v1332_v46  ;;  %v1531_v51 = vadd.f32 %v1530_v39, %v1529_v45 }
 0x159   : > { %v1533_v58 = vadd.f32 %v1532_v6, %v1531_v51  ;;  %v1336_v63 = vadd.f32 %v1335_v57, %v1334_v50 }
 0x15b   : > { %v1338_v0 = vadd.f32 %v1337_v47, %v1336_v63  ;;  %v1535_v32 = vadd.f32 %v1534_v61, %v1533_v58 }
 0x15d   : > { %v1537_v4 = vadd.f32 %v1536_v2, %v1535_v32  ;;  %v1340_v1 = vadd.f32 %v1339_v3, %v1338_v0 }
 0x15f   : > { %v1342_v7 = vadd.f32 %v1341_v29, %v1340_v1  ;;  %v1539_v11 = vadd.f32 %v1538_v52, %v1537_v4 }
 0x161   : > { %v1541_v16 = vadd.f32 %v1540_v55, %v1539_v11  ;;  %v1344_v17 = vadd.f32 %v1343_v18, %v1342_v7 }
 0x163   : > { %v1346_v20 = vadd.f32 %v1345_v13, %v1344_v17  ;;  %v1543_v37 = vadd.f32 %v1542_v24, %v1541_v16 }
 0x165   : > { %v1545_v25 = vadd.f32 %v1544_v22, %v1543_v37  ;;  %v1348_v8 = vadd.f32 %v1347_v23, %v1346_v20 }
 0x167   : > { %v1350_v43 = vadd.f32 %v1349_v33, %v1348_v8  ;;  %v1547_v30 = vadd.f32 %v1546_v26, %v1545_v25 }
 0x169   : > { %v1549_v34 = vadd.f32 %v1548_v21, %v1547_v30  ;;  %v1352_v35 = vadd.f32 %v1351_v31, %v1350_v43 }
 0x16b   : > { %v1354_v53 = vadd.f32 %v1353_v36, %v1352_v35  ;;  %v1551_v38 = vadd.f32 %v1550_v60, %v1549_v34 }
 0x16d   : > { %v1356_v44 = vadd.f32 %v1355_v40, %v1354_v53  ;;  %v1553_v12 = vadd.f32 %v1552_v15, %v1551_v38 }
 0x16f   : > { %v1357_v45 = vrot.slane %v1356_v44, 4  ;;  %v1555_v46 = vadd.f32 %v1554_v19, %v1553_v12 }
 0x171   : > { %v1358_v9 = vadd.f32 %v1357_v45, %v1356_v44  ;;  %v1556_v39 = vrot.slane %v1555_v46, 4 }
 0x173   : > { %v1359_v49 = vrot.slane %v1358_v9, 2  ;;  %v1557_v42 = vadd.f32 %v1556_v39, %v1555_v46 }
 0x175   : > { %v1360_v50 = vadd.f32 %v1359_v49, %v1358_v9  ;;  %v1558_v51 = vrot.slane %v1557_v42, 2 }
 0x177   : > { %v1361_v56 = vrot.slane %v1360_v50, 1  ;;  %v1559_v6 = vadd.f32 %v1558_v51, %v1557_v42 }
 0x179   : > { %v1362_v54 = vadd.f32 %v1361_v56, %v1360_v50  ;;  %v1560_v57 = vrot.slane %v1559_v6, 1 }
 0x17b   : > { %1364 = vst.msk [vmem:[%s248_s30] sm:$0x1] %vm1363_vm3, %v1362_v54  ;;  %v1561_v58 = vadd.f32 %v1560_v57, %v1559_v6 }
 0x17d   : > { %1562 = vst.msk [vmem:[%s248_s30 + $0x1] sm:$0x1] %vm1363_vm3, %v1561_v58 }
 0x17e PF: > { %s14_s14 = sadd.s32 1, %s2127_s14   ;;  %s2749_s12 = smov %s2123_s13 }
 0x17f   : > { %p11_p5 = scmp.ge.s32.totalorder %s14_s14, 4   ;;  %s2750_s13 = smov %s2752_s15 }
 0x181   :  { %13 = sbr.rel (!%p11_p5) target bundleno = 2 (0x2), region = 73 }

// kernel: tile.53
= control target key start
LH: loop header
LB: loop body
LE: loop exit
PB: predicated region body
PF: predicated region fallthrough
CT: control target
= control target key end

     0   :  { %s40_s0 = inlined_call_operand.vmem [shape: f32[8], index: 0, kind: input, shape index: {}]   ;;  %s41_s1 = inlined_call_operand.vmem [shape: f32[32,8], index: 1, kind: output, shape index: {}]  }
   0x1   :  { %v4_v0 = vld [vmem:[%s40_s0] ss:$0 sm:$0xff] }
   0x2   :  { %5 = vst [vmem:[%s41_s1] sm:$0xff] %v4_v0  ;;  %12 = vst [vmem:[%s41_s1 + $0x8] sm:$0xff] %v4_v0 }
   0x3   :  { %13 = vst [vmem:[%s41_s1 + $0x10] sm:$0xff] %v4_v0  ;;  %14 = vst [vmem:[%s41_s1 + $0x18] sm:$0xff] %v4_v0 }

// kernel: tile.58
= control target key start
LH: loop header
LB: loop body
LE: loop exit
PB: predicated region body
PF: predicated region fallthrough
CT: control target
= control target key end

     0   :  { %s7_s6 = smov 3  ;;  %s21_s9 = smov 3  ;;  %vm4_vm0 = vcmask 64512   ;;  %vm11_vm1 = vcmask 1048512   ;;  %vm18_vm2 = vcmask 982912   ;;  %vm25_vm3 = vcmask 917312   ;;  %s235_s0 = inlined_call_operand.vmem [shape: f32[32,8], index: 0, kind: input, shape index: {}]   ;;  %s236_s1 = inlined_call_operand.vmem [shape: f32[1,256], index: 1, kind: output, shape index: {}]  }
   0x1   :  { %v125_v0 = vld [vmem:[%s235_s0 + $0xf] ss:$16 sm:%s7_s6]   ;;  %s156_s10 = smov 120   ;;  %v127_v1 = vld [vmem:[%s235_s0 + $0xd] ss:$16 sm:%s21_s9]   ;;  %s14_s13 = smov 3 }
   0x2   :  { %9 = vrot.lane.b32.xlu0 %v125_v0, %s156_s10  ;;  %s157_s14 = smov 104   ;;  %v126_v2 = vld [vmem:[%s235_s0 + $0xe] ss:$16 sm:%s14_s13]   ;;  %s28_s17 = smov 3  ;;  %vm32_vm4 = vcmask 851712   ;;  %vm39_vm5 = vcmask 786112  }
   0x3   :  { %23 = vrot.lane.b32.xlu1 %v127_v1, %s157_s14  ;;  %v128_v3 = vld [vmem:[%s235_s0 + $0xc] ss:$16 sm:%s28_s17]   ;;  %s35_s20 = smov 3  ;;  %s42_s21 = smov 3  ;;  %vm46_vm6 = vcmask 720512   ;;  %vm53_vm7 = vcmask 654912  }
   0x4   :  { %s158_s22 = smov 112   ;;  %s159_s23 = smov 96   ;;  %v129_v4 = vld [vmem:[%s235_s0 + $0xb] ss:$16 sm:%s35_s20]   ;;  %v130_v5 = vld [vmem:[%s235_s0 + $0xa] ss:$16 sm:%s42_s21]  }
   0x5   :  { %s49_s28 = smov 3  ;;  %s56_s29 = smov 3  ;;  %vm60_vm8 = vcmask 589312   ;;  %vm67_vm9 = vcmask 523712   ;;  %vm74_vm10 = vcmask 458112   ;;  %vm81_vm11 = vcmask 392512  }
   0x6   :  { %16 = vrot.lane.b32.xlu0 %v126_v2, %s158_s22  ;;  %s160_s30 = smov 88   ;;  %s161_s2 = smov 80   ;;  %v131_v6 = vld [vmem:[%s235_s0 + $0x9] ss:$16 sm:%s49_s28]   ;;  %vm88_vm12 = vcmask 326912   ;;  %vm95_vm13 = vcmask 261312  }
   0x7   :  { %30 = vrot.lane.b32.xlu1 %v128_v3, %s159_s23  ;;  %v132_v7 = vld [vmem:[%s235_s0 + $0x8] ss:$16 sm:%s56_s29]   ;;  %s63_s7 = smov 3  ;;  %s70_s8 = smov 3  ;;  %vm102_vm14 = vcmask 195712   ;;  %vm109_vm15 = vcmask 130112  }
   0x8   :  { %s162_s9 = smov 72   ;;  %s163_s10 = smov 64   ;;  %v133_v8 = vld [vmem:[%s235_s0 + $0x7] ss:$16 sm:%s63_s7]   ;;  %v134_v9 = vld [vmem:[%s235_s0 + $0x6] ss:$16 sm:%s70_s8]  }
   0x9   :  { %s2_s13 = smov 3  ;;  %s77_s16 = smov 3 }
   0xa   :  { %37 = vrot.lane.b32.xlu0 %v129_v4, %s160_s30  ;;  %v3_v10 = vld [vmem:[%s235_s0] ss:$16 sm:%s2_s13]   ;;  %s84_s19 = smov 3  ;;  %s164_s20 = smov 56  }
   0xb   :  { %44 = vrot.lane.b32.xlu1 %v130_v5, %s161_s2  ;;  %5 = vst.msk [vmem:[#allocation0] ss:$8 sm:$0x3] %vm4_vm0, %v3_v10   ;;  %s165_s21 = smov 48   ;;  %v135_v11 = vld [vmem:[%s235_s0 + $0x5] ss:$16 sm:%s77_s16]  }
   0xc   :  { %v136_v12 = vld [vmem:[%s235_s0 + $0x4] ss:$16 sm:%s84_s19]   ;;  %s91_s26 = smov 3  ;;  %s98_s27 = smov 3 }
   0xd   :  { %s166_s28 = smov 40   ;;  %s167_s29 = smov 32   ;;  %v137_v13 = vld [vmem:[%s235_s0 + $0x3] ss:$16 sm:%s91_s26]   ;;  %v138_v14 = vld [vmem:[%s235_s0 + $0x2] ss:$16 sm:%s98_s27]  }
   0xe   :  { %51 = vrot.lane.b32.xlu0 %v131_v6, %s162_s9  ;;  %s105_s5 = smov 3  ;;  %s168_s6 = smov 24  }
   0xf   :  { %58 = vrot.lane.b32.xlu1 %v132_v7, %s163_s10  ;;  %s169_s7 = smov 16   ;;  %v139_v15 = vld [vmem:[%s235_s0 + $0x1] ss:$16 sm:%s105_s5]   ;;  %s170_s0 = smov 8  }
  0x12   :  { %65 = vrot.lane.b32.xlu0 %v133_v8, %s164_s20 }
  0x13   :  { %72 = vrot.lane.b32.xlu1 %v134_v9, %s165_s21 }
  0x16   :  { %79 = vrot.lane.b32.xlu0 %v135_v11, %s166_s28 }
  0x17   :  { %86 = vrot.lane.b32.xlu1 %v136_v12, %s167_s29 }
  0x1a   :  { %93 = vrot.lane.b32.xlu0 %v137_v13, %s168_s6 }
  0x1b   :  { %100 = vrot.lane.b32.xlu1 %v138_v14, %s169_s7 }
  0x1e   :  { %107 = vrot.lane.b32.xlu0 %v139_v15, %s170_s0 }
  0x74   :  { %v10_v16 = vpop.permute.xlu0 %9  }
  0x75   :  { %12 = vst.msk [vmem:[#allocation0] ss:$8 sm:$0x3] %vm11_vm1, %v10_v16   ;;  %v24_v17 = vpop.permute.xlu1 %23  }
  0x78   :  { %v17_v18 = vpop.permute.xlu0 %16  }
  0x79   :  { %19 = vst.msk [vmem:[#allocation0] ss:$8 sm:$0x3] %vm18_vm2, %v17_v18   ;;  %v31_v19 = vpop.permute.xlu1 %30  }
  0x7a   :  { %26 = vst.msk [vmem:[#allocation0] ss:$8 sm:$0x3] %vm25_vm3, %v24_v17  }
  0x7b   :  { %33 = vst.msk [vmem:[#allocation0] ss:$8 sm:$0x3] %vm32_vm4, %v31_v19  }
  0x7c   :  { %v38_v20 = vpop.permute.xlu0 %37  }
  0x7d   :  { %40 = vst.msk [vmem:[#allocation0] ss:$8 sm:$0x3] %vm39_vm5, %v38_v20   ;;  %v45_v21 = vpop.permute.xlu1 %44  }
  0x7e   :  { %47 = vst.msk [vmem:[#allocation0] ss:$8 sm:$0x3] %vm46_vm6, %v45_v21  }
  0x80   :  { %v52_v22 = vpop.permute.xlu0 %51  }
  0x81   :  { %54 = vst.msk [vmem:[#allocation0] ss:$8 sm:$0x3] %vm53_vm7, %v52_v22   ;;  %v59_v23 = vpop.permute.xlu1 %58  }
  0x82   :  { %61 = vst.msk [vmem:[#allocation0] ss:$8 sm:$0x3] %vm60_vm8, %v59_v23  }
  0x84   :  { %v66_v24 = vpop.permute.xlu0 %65  }
  0x85   :  { %68 = vst.msk [vmem:[#allocation0] ss:$8 sm:$0x3] %vm67_vm9, %v66_v24   ;;  %v73_v25 = vpop.permute.xlu1 %72  }
  0x86   :  { %75 = vst.msk [vmem:[#allocation0] ss:$8 sm:$0x3] %vm74_vm10, %v73_v25  }
  0x88   :  { %v80_v26 = vpop.permute.xlu0 %79  }
  0x89   :  { %82 = vst.msk [vmem:[#allocation0] ss:$8 sm:$0x3] %vm81_vm11, %v80_v26   ;;  %v87_v27 = vpop.permute.xlu1 %86  }
  0x8a   :  { %89 = vst.msk [vmem:[#allocation0] ss:$8 sm:$0x3] %vm88_vm12, %v87_v27  }
  0x8c   :  { %v94_v28 = vpop.permute.xlu0 %93  }
  0x8d   :  { %96 = vst.msk [vmem:[#allocation0] ss:$8 sm:$0x3] %vm95_vm13, %v94_v28   ;;  %v101_v29 = vpop.permute.xlu1 %100  }
  0x8e   :  { %103 = vst.msk [vmem:[#allocation0] ss:$8 sm:$0x3] %vm102_vm14, %v101_v29  }
  0x90   :  { %v108_v30 = vpop.permute.xlu0 %107  }
  0x91   :  { %110 = vst.msk [vmem:[#allocation0] ss:$8 sm:$0x3] %vm109_vm15, %v108_v30  }
  0x98   :  { %v115_v31 = vld [vmem:[#allocation0] sm:$0x1]  ;;  %v120_v32 = vld [vmem:[#allocation0 + $0x8] sm:$0x1] }
  0x99   :  { %118 = vst [vmem:[%s236_s1] sm:$0x1] %v115_v31  ;;  %140 = vst [vmem:[%s236_s1 + $0x1] sm:$0x1] %v120_v32 }

// kernel: generator_forward.11
= control target key start
LH: loop header
LB: loop body
LE: loop exit
PB: predicated region body
PF: predicated region fallthrough
CT: control target
= control target key end

     0   :  { %v44_v5 = vlaneseq  ;;  %vm323_vm0 = vcmask 785408   ;;  %s619_s3 = inlined_call_operand.vmem [shape: bf16[256,96], index: 3, kind: input, shape index: {}]   ;;  %s620_s0 = inlined_call_operand.vmem [shape: bf16[64,256], index: 0, kind: input, shape index: {}]   ;;  %s621_s1 = inlined_call_operand.vmem [shape: f32[1,256], index: 1, kind: input, shape index: {}]   ;;  %s622_s2 = inlined_call_operand.vmem [shape: f32[1,256], index: 2, kind: input, shape index: {}]   ;;  %s623_s4 = inlined_call_operand.vmem [shape: f32[64,96], index: 4, kind: output, shape index: {}]  }
   0x1   :  { %v408_v0 = vld [vmem:[%s619_s3 + $0x78] sm:$0xff]   ;;  %v410_v2 = vld [vmem:[%s619_s3 + $0x70] sm:$0xff]   ;;  %v412_v4 = vld [vmem:[%s619_s3 + $0x68] sm:$0xff]  }
   0x2   :  { %v409_v1 = vld [vmem:[%s619_s3 + $0x38] sm:$0xff]   ;;  %352 = vmatprep.subr.bf16.mxu0 %v408_v0  ;;  %392 = vmatprep.subr.bf16.mxu1 %v408_v0  ;;  %v411_v3 = vld [vmem:[%s619_s3 + $0x30] sm:$0xff]   ;;  %v413_v6 = vld [vmem:[%s619_s3 + $0x28] sm:$0xff]   ;;  %v45_v8 = vshrl.u32 %v44_v5, 7 }
   0x3   :  { %353 = vmatpush3.bf16.msra.mxu0 %v409_v1  ;;  %400 = vmatpush3.bf16.msra.mxu1 %v409_v1  ;;  %v414_v7 = vld [vmem:[%s619_s3 + $0x60] sm:$0xff]   ;;  %v416_v10 = vld [vmem:[%s619_s3 + $0x58] sm:$0xff]   ;;  %v418_v14 = vld [vmem:[%s619_s3 + $0x50] sm:$0xff]  }
   0x4   :  { %354 = vmatprep.subr.bf16.mxu0 %v410_v2  ;;  %393 = vmatprep.subr.bf16.mxu1 %v410_v2  ;;  %v415_v9 = vld [vmem:[%s619_s3 + $0x20] sm:$0xff]   ;;  %v46_v11 = vsub.s32 0, %v45_v8  ;;  %v417_v12 = vld [vmem:[%s619_s3 + $0x18] sm:$0xff]   ;;  %v50_v13 = vsub.s32 1, %v45_v8  ;;  %v19_v16 = vld [vmem:[%s620_s0 + $0x8] sm:$0xff] }
   0x5   :  { %v18_v15 = vld [vmem:[%s620_s0] sm:$0xff]  ;;  %v29_v20 = vunpack.c.l.bf16 %v19_v16  ;;  %v30_v21 = vunpack.c.h.bf16 %v19_v16  ;;  %v23_v24 = vld [vmem:[%s620_s0 + $0x28] sm:$0xff]  ;;  %v527_v29 = vld [vmem:[%s620_s0 + $0x10] sm:$0xff] }
   0x6   :  { %v26_v17 = vld [vmem:[%s621_s1] sm:$0x3]  ;;  %v27_v18 = vunpack.c.l.bf16 %v18_v15  ;;  %v28_v19 = vunpack.c.h.bf16 %v18_v15  ;;  %v419_v30 = vld [vmem:[%s619_s3 + $0x10] sm:$0xff]   ;;  %v37_v33 = vunpack.c.l.bf16 %v23_v24  ;;  %v38_v34 = vunpack.c.h.bf16 %v23_v24  ;;  %v420_v35 = vld [vmem:[%s619_s3 + $0x48] sm:$0xff]  }
   0x7   :  { %355 = vmatpush3.bf16.msra.mxu0 %v411_v3  ;;  %401 = vmatpush3.bf16.msra.mxu1 %v411_v3  ;;  %v70_v22 = vld [vmem:[%s622_s2] sm:$0x3]  ;;  %v516_v25 = vrot.slane %v26_v17, %v46_v11  ;;  %v518_v26 = vrot.slane %v26_v17, %v50_v13  ;;  %v21_v39 = vld [vmem:[%s620_s0 + $0x18] sm:$0xff]  ;;  %v32_v40 = vunpack.c.h.bf16 %v527_v29  ;;  %v421_v49 = vld [vmem:[%s619_s3 + $0x8] sm:$0xff]  }
   0x8   :  { %356 = vmatprep.subr.bf16.mxu0 %v412_v4  ;;  %394 = vmatprep.subr.bf16.mxu1 %v412_v4  ;;  %v22_v23 = vld [vmem:[%s620_s0 + $0x20] sm:$0xff]  ;;  %v520_v27 = vrot.slane %v70_v22, %v46_v11  ;;  %v522_v28 = vrot.slane %v70_v22, %v50_v13  ;;  %v34_v53 = vunpack.c.h.bf16 %v21_v39  ;;  %v24_v59 = vld [vmem:[%s620_s0 + $0x30] sm:$0xff]  ;;  %v25_v0 = vld [vmem:[%s620_s0 + $0x38] sm:$0xff]  ;;  %v31_v13 = vunpack.c.l.bf16 %v527_v29 }
   0x9   :  { %v35_v31 = vunpack.c.l.bf16 %v22_v23  ;;  %v36_v32 = vunpack.c.h.bf16 %v22_v23  ;;  %v55_v36 = vmul.f32 %v518_v26, %v28_v19  ;;  %v57_v37 = vmul.f32 %v518_v26, %v30_v21  ;;  %v422_v54 = vld [vmem:[%s619_s3 + $0x40] sm:$0xff]  }
   0xa   :  { %v54_v38 = vmul.f32 %v516_v25, %v27_v18  ;;  %v65_v42 = vmul.f32 %v518_v26, %v38_v34  ;;  %v56_v43 = vmul.f32 %v516_v25, %v29_v20  ;;  %v64_v48 = vmul.f32 %v516_v25, %v37_v33  ;;  %v423_v5 = vld [vmem:[%s619_s3] sm:$0xff]  }
   0xb   :  { %357 = vmatpush3.bf16.msra.mxu0 %v413_v6  ;;  %402 = vmatpush3.bf16.msra.mxu1 %v413_v6  ;;  %v63_v41 = vmul.f32 %v518_v26, %v36_v32  ;;  %v62_v44 = vmul.f32 %v516_v25, %v35_v31  ;;  %v83_v45 = vadd.f32 %v522_v28, %v55_v36  ;;  %v33_v16 = vunpack.c.l.bf16 %v21_v39 }
   0xc   :  { %358 = vmatprep.subr.bf16.mxu0 %v414_v7  ;;  %395 = vmatprep.subr.bf16.mxu1 %v414_v7  ;;  %v85_v46 = vadd.f32 %v522_v28, %v57_v37  ;;  %v82_v47 = vadd.f32 %v520_v27, %v54_v38  ;;  %v93_v51 = vadd.f32 %v522_v28, %v65_v42  ;;  %v39_v17 = vunpack.c.l.bf16 %v24_v59 }
   0xd   :  { %v91_v50 = vadd.f32 %v522_v28, %v63_v41  ;;  %v84_v52 = vadd.f32 %v520_v27, %v56_v43  ;;  %v99_v55 = vmax.f32 %v83_v45, 0.0  ;;  %v90_v58 = vadd.f32 %v520_v27, %v62_v44 }
   0xe   :  { %v101_v56 = vmax.f32 %v85_v46, 0.0  ;;  %v98_v57 = vmax.f32 %v82_v47, 0.0  ;;  %v109_v61 = vmax.f32 %v93_v51, 0.0  ;;  %v92_v63 = vadd.f32 %v520_v27, %v64_v48 }
   0xf   :  { %359 = vmatpush3.bf16.msra.mxu0 %v415_v9  ;;  %403 = vmatpush3.bf16.msra.mxu1 %v415_v9  ;;  %v107_v60 = vmax.f32 %v91_v50, 0.0  ;;  %v100_v62 = vmax.f32 %v84_v52, 0.0  ;;  %v106_v2 = vmax.f32 %v90_v58, 0.0  ;;  %v59_v3 = vmul.f32 %v518_v26, %v32_v40 }
  0x10   :  { %360 = vmatprep.subr.bf16.mxu0 %v416_v10  ;;  %396 = vmatprep.subr.bf16.mxu1 %v416_v10  ;;  %v115_v1 = vpack.c.bf16 %v101_v56, %v99_v55  ;;  %v61_v4 = vmul.f32 %v518_v26, %v34_v53  ;;  %v108_v8 = vmax.f32 %v92_v63, 0.0  ;;  %v40_v9 = vunpack.c.h.bf16 %v24_v59 }
  0x11   :  { %v119_v6 = vpack.c.bf16 %v109_v61, %v107_v60  ;;  %v114_v7 = vpack.c.bf16 %v100_v62, %v98_v57  ;;  %v87_v10 = vadd.f32 %v522_v28, %v59_v3  ;;  %v58_v21 = vmul.f32 %v516_v25, %v31_v13 }
  0x12   :  { %v89_v11 = vadd.f32 %v522_v28, %v61_v4  ;;  %282 = vmatprep.mubr.bf16.mxu0 %v115_v1  ;;  %v67_v15 = vmul.f32 %v518_v26, %v40_v9  ;;  %v60_v23 = vmul.f32 %v516_v25, %v33_v16  ;;  %v41_v24 = vunpack.c.l.bf16 %v25_v0 }
  0x13   :  { %361 = vmatpush3.bf16.msra.mxu0 %v417_v12  ;;  %404 = vmatpush3.bf16.msra.mxu1 %v417_v12  ;;  %v42_v12 = vunpack.c.h.bf16 %v25_v0  ;;  %v103_v18 = vmax.f32 %v87_v10, 0.0  ;;  %v66_v29 = vmul.f32 %v516_v25, %v39_v17  ;;  %v86_v32 = vadd.f32 %v520_v27, %v58_v21 }
  0x14   :  { %362 = vmatprep.subr.bf16.mxu0 %v418_v14  ;;  %397 = vmatprep.subr.bf16.mxu1 %v418_v14  ;;  %v118_v14 = vpack.c.bf16 %v108_v8, %v106_v2  ;;  %v105_v19 = vmax.f32 %v89_v11, 0.0  ;;  %v95_v22 = vadd.f32 %v522_v28, %v67_v15  ;;  %v88_v34 = vadd.f32 %v520_v27, %v60_v23 }
  0x15   :  { %298 = vmatprep.mubr.bf16.mxu1 %v119_v6  ;;  %v69_v20 = vmul.f32 %v518_v26, %v42_v12  ;;  %v68_v26 = vmul.f32 %v516_v25, %v41_v24  ;;  %v102_v37 = vmax.f32 %v86_v32, 0.0 }
  0x16   :  { %v111_v33 = vmax.f32 %v95_v22, 0.0  ;;  %v104_v38 = vmax.f32 %v88_v34, 0.0 }
  0x17   :  { %363 = vmatpush3.bf16.msra.mxu0 %v419_v30  ;;  %405 = vmatpush3.bf16.msra.mxu1 %v419_v30  ;;  %v117_v30 = vpack.c.bf16 %v105_v19, %v103_v18  ;;  %v97_v31 = vadd.f32 %v522_v28, %v69_v20  ;;  %v96_v39 = vadd.f32 %v520_v27, %v68_v26 }
  0x18   :  { %364 = vmatprep.subr.bf16.mxu0 %v420_v35  ;;  %398 = vmatprep.subr.bf16.mxu1 %v420_v35  ;;  %v94_v35 = vadd.f32 %v520_v27, %v66_v29  ;;  %v116_v42 = vpack.c.bf16 %v104_v38, %v102_v37 }
  0x19   :  { %v113_v36 = vmax.f32 %v97_v31, 0.0  ;;  %v112_v28 = vmax.f32 %v96_v39, 0.0 }
  0x1a   :  { %v110_v40 = vmax.f32 %v94_v35, 0.0 }
  0x1b   :  { %365 = vmatpush3.bf16.msra.mxu0 %v421_v49  ;;  %406 = vmatpush3.bf16.msra.mxu1 %v421_v49  ;;  %v121_v41 = vpack.c.bf16 %v113_v36, %v111_v33 }
  0x1c   :  { %366 = vmatprep.subr.bf16.mxu0 %v422_v54  ;;  %399 = vmatprep.subr.bf16.mxu1 %v422_v54  ;;  %v120_v43 = vpack.c.bf16 %v112_v28, %v110_v40 }
  0x1f   :  { %367 = vmatpush3.bf16.msra.mxu0 %v423_v5  ;;  %407 = vmatpush3.bf16.msra.mxu1 %v423_v5 }
  0x22   :  { %283 = vmatmul.mubr.bf16.vlgmr.msra.gmra.mxu0 %v114_v7  ;;  %299 = vmatmul.mubr.bf16.vlgmr.msra.gmra.mxu1 %v118_v14 }
  0x23   :  { %290 = vmatprep.mubr.bf16.mxu0 %v117_v30  ;;  %306 = vmatprep.mubr.bf16.mxu1 %v121_v41 }
  0x2a   :  { %291 = vmatmul.mubr.bf16.gmra.mxu0 %v116_v42  ;;  %307 = vmatmul.mubr.bf16.gmra.mxu1 %v120_v43 }
  0xe2   :  { %v368_v44 = vpop.f32.mrf.mxu0  ;;  %v380_v25 = vpop.f32.mrf.mxu1 }
  0xe4   :  { %v369_v45 = vpop.f32.mrf.mxu0  ;;  %v381_v46 = vpop.f32.mrf.mxu1 }
  0xe5   :  { %v370_v47 = vadd.f32 %v369_v45, %v368_v44  ;;  %v382_v48 = vadd.f32 %v381_v46, %v380_v25 }
  0xe6   :  { %v371_v49 = vpop.f32.mrf.mxu0  ;;  %v383_v50 = vpop.f32.mrf.mxu1 }
  0xe7   :  { %424 = vtanh.f32 %v370_v47 }
  0xe8   :  { %426 = vtanh.f32 %v382_v48  ;;  %v372_v51 = vpop.f32.mrf.mxu0  ;;  %v384_v27 = vpop.f32.mrf.mxu1 }
  0xe9   :  { %v373_v52 = vadd.f32 %v372_v51, %v371_v49  ;;  %v385_v53 = vadd.f32 %v384_v27, %v383_v50 }
  0xea   :  { %v374_v54 = vpop.f32.mrf.mxu0  ;;  %v386_v55 = vpop.f32.mrf.mxu1 }
  0xeb   :  { %428 = vtanh.f32 %v373_v52 }
  0xec   :  { %430 = vtanh.f32 %v385_v53  ;;  %v375_v56 = vpop.f32.mrf.mxu0  ;;  %v387_v57 = vpop.f32.mrf.mxu1 }
  0xed   :  { %v376_v58 = vadd.f32 %v375_v56, %v374_v54  ;;  %v388_v59 = vadd.f32 %v387_v57, %v386_v55 }
  0xee   :  { %v377_v60 = vpop.f32.mrf.mxu0  ;;  %v389_v61 = vpop.f32.mrf.mxu1 }
  0xef   :  { %432 = vtanh.f32 %v376_v58 }
  0xf0   :  { %434 = vtanh.f32 %v388_v59  ;;  %v378_v62 = vpop.f32.mrf.mxu0  ;;  %v390_v63 = vpop.f32.mrf.mxu1 }
  0xf1   :  { %v379_v0 = vadd.f32 %v378_v62, %v377_v60  ;;  %v391_v1 = vadd.f32 %v390_v63, %v389_v61 }
  0xf3   :  { %436 = vtanh.f32 %v379_v0 }
  0xf4   :  { %v425_v2 = vpop.eup %424  ;;  %438 = vtanh.f32 %v391_v1 }
  0xf5   :  { %v427_v3 = vpop.eup %426  ;;  %324 = vst.msk [vmem:[%s623_s4] sm:$0xff] %vm323_vm0, %v425_v2 }
  0xf6   :  { %328 = vst.msk [vmem:[%s623_s4 + $0x20] sm:$0xff] %vm323_vm0, %v427_v3 }
  0xf8   :  { %v429_v4 = vpop.eup %428 }
  0xf9   :  { %v431_v5 = vpop.eup %430  ;;  %325 = vst.msk [vmem:[%s623_s4 + $0x8] sm:$0xff] %vm323_vm0, %v429_v4 }
  0xfa   :  { %329 = vst.msk [vmem:[%s623_s4 + $0x28] sm:$0xff] %vm323_vm0, %v431_v5 }
  0xfc   :  { %v433_v6 = vpop.eup %432 }
  0xfd   :  { %v435_v7 = vpop.eup %434  ;;  %326 = vst.msk [vmem:[%s623_s4 + $0x10] sm:$0xff] %vm323_vm0, %v433_v6 }
  0xfe   :  { %330 = vst.msk [vmem:[%s623_s4 + $0x30] sm:$0xff] %vm323_vm0, %v435_v7 }
 0x100   :  { %v437_v8 = vpop.eup %436 }
 0x101   :  { %v439_v9 = vpop.eup %438  ;;  %327 = vst.msk [vmem:[%s623_s4 + $0x18] sm:$0xff] %vm323_vm0, %v437_v8 }
 0x102   :  { %331 = vst.msk [vmem:[%s623_s4 + $0x38] sm:$0xff] %vm323_vm0, %v439_v9 }

</bundles_post_ra>
